<compile_context>
chip_gen: v7x
topology: tpu7x:2x2x1
jax: 0.10.0
libtpu: 0.0.40
codegen_flags: <defaults>
</compile_context>

<pallas_src>
import functools

import numpy as np

import jax
import jax.numpy as jnp
from jax.experimental import pallas as pl
from jax.experimental.pallas import tpu as pltpu


_LANE = 128              # vreg lane width -> lane-dense output padding
_TM_MAX = 1024           # max rows per tile for the M-tiled (layer-1) matmul
_FUSED_BN_MAX_M = 4096   # single-tile fused-BN path limit (rows)
_BN_EPS = 1e-5
_LEAK = 0.2


def _round_up(x, m):
    return ((x + m - 1) // m) * m


def _vmem_limit(est_bytes):
    # Size the scoped-VMEM request from the actual block footprint (plus a
    # margin for double-buffering / Mosaic scratch). No 32 MiB floor: v7x has
    # only 64 MiB physical VMEM and these kernels need well under 4 MiB.
    return int(min(max(2 * est_bytes + (2 << 20), 4 << 20), 64 << 20))


# ----------------------------------------------------------------------------
# Pallas kernels
# ----------------------------------------------------------------------------
def _conv_leaky_kernel(x_ref, w_ref, o_ref):
    """y = X @ W ; LeakyReLU(0.2). M-tiled (grid over rows), weight resident."""
    y = jnp.dot(x_ref[...], w_ref[...], preferred_element_type=jnp.float32)
    o_ref[...] = jnp.where(y >= 0.0, y, _LEAK * y).astype(o_ref.dtype)


def _conv_bn_leaky_kernel(x_ref, w_ref, g_ref, b_ref, o_ref, *, inv_m):
    """Fused single pass: conv-matmul + BatchNorm (training-mode batch stats,
    centered variance) + LeakyReLU(0.2). The whole M lives in one tile so the
    per-channel statistics are computed directly from the f32 matmul result
    and the fp32 intermediate never round-trips through HBM."""
    y = jnp.dot(x_ref[...], w_ref[...], preferred_element_type=jnp.float32)
    mean = jnp.sum(y, axis=0, keepdims=True) * inv_m           # (1, Cp)
    yc = y - mean
    var = jnp.sum(yc * yc, axis=0, keepdims=True) * inv_m      # biased, centered
    yn = yc * (jax.lax.rsqrt(var + _BN_EPS) * g_ref[...]) + b_ref[...]
    o_ref[...] = jnp.where(yn >= 0.0, yn, _LEAK * yn).astype(o_ref.dtype)


def _dense_sigmoid_kernel(x_ref, w_ref, o_ref):
    """Final 4x4/stride-1 conv on a 4x4 map == dense layer; numerically
    stable sigmoid with an exact divide (no approx reciprocal)."""
    y = jnp.dot(x_ref[...], w_ref[...], preferred_element_type=jnp.float32)
    z = jnp.exp(-jnp.abs(y))
    num = jnp.where(y >= 0.0, 1.0, z)
    o_ref[...] = (num / (1.0 + z)).astype(o_ref.dtype)


# ----------------------------------------------------------------------------
# pallas_call wrappers (per layer)
# ----------------------------------------------------------------------------
def _extract_patches(x_nhwc, ksize, stride, pad):
    """NHWC -> (N*OH*OW, Cin*ksize*ksize) patch matrix via one XLA op.
    The feature order is whatever conv_general_dilated_patches emits; it is
    probed at prep time and baked into the weight row order."""
    n, _, _, c = x_nhwc.shape
    patches = jax.lax.conv_general_dilated_patches(
        x_nhwc, (ksize, ksize), (stride, stride),
        ((pad, pad), (pad, pad)),
        dimension_numbers=("NHWC", "HWIO", "NHWC"))
    oh, ow = patches.shape[1], patches.shape[2]
    return patches.reshape(n * oh * ow, c * ksize * ksize), oh, ow


def _conv_leaky_layer(x_nhwc, w_mat, cout, *, stride, pad):
    n = x_nhwc.shape[0]
    patches, oh, ow = _extract_patches(x_nhwc, 4, stride, pad)
    m, k = patches.shape
    cp = w_mat.shape[1]
    if m > _TM_MAX:
        tm = _TM_MAX
        m_pad = _round_up(m, tm)
    else:
        tm = m_pad = _round_up(max(m, 8), 8)
    if m_pad != m:
        patches = jnp.pad(patches, ((0, m_pad - m), (0, 0)))
    est = tm * k * 2 + k * cp * 2 + tm * cp * 2
    y = pl.pallas_call(
        _conv_leaky_kernel,
        out_shape=jax.ShapeDtypeStruct((m_pad, cp), jnp.bfloat16),
        grid=(m_pad // tm,),
        in_specs=[
            pl.BlockSpec((tm, k), lambda i: (i, 0)),
            pl.BlockSpec((k, cp), lambda i: (0, 0)),     # resident weight
        ],
        out_specs=pl.BlockSpec((tm, cp), lambda i: (i, 0)),
        compiler_params=pltpu.CompilerParams(
            dimension_semantics=("parallel",),           # 2 tiles -> both TCs on v7x
            vmem_limit_bytes=_vmem_limit(est)),
    )(patches, w_mat)
    return y[:m, :cout].reshape(n, oh, ow, cout)


def _conv_bn_leaky_layer(x_nhwc, w_mat, gamma, beta, cout, *, stride, pad):
    n = x_nhwc.shape[0]
    patches, oh, ow = _extract_patches(x_nhwc, 4, stride, pad)
    m, k = patches.shape
    cp = w_mat.shape[1]
    # Fused single-pass BN: whole M in one tile, no padded rows, so the batch
    # statistics are exact and the fp32 conv output never leaves the kernel.
    assert m % 8 == 0 and m <= _FUSED_BN_MAX_M, (
        f"fused-BN path needs M % 8 == 0 and M <= {_FUSED_BN_MAX_M}, got M={m}")
    # TODO(synk): add a tiled two-pass (bf16-y) fallback for very large batch.
    est = m * k * 2 + k * cp * 2 + m * cp * 4 + m * cp * 2 + 4 * cp * 4
    y = pl.pallas_call(
        functools.partial(_conv_bn_leaky_kernel, inv_m=1.0 / float(m)),
        out_shape=jax.ShapeDtypeStruct((m, cp), jnp.bfloat16),
        grid=(1,),
        in_specs=[
            pl.BlockSpec((m, k), lambda i: (0, 0)),
            pl.BlockSpec((k, cp), lambda i: (0, 0)),
            pl.BlockSpec((1, cp), lambda i: (0, 0)),
            pl.BlockSpec((1, cp), lambda i: (0, 0)),
        ],
        out_specs=pl.BlockSpec((m, cp), lambda i: (0, 0)),
        compiler_params=pltpu.CompilerParams(
            dimension_semantics=("arbitrary",),
            vmem_limit_bytes=_vmem_limit(est)),
    )(patches, w_mat, gamma, beta)
    return y[:, :cout].reshape(n, oh, ow, cout)


def _head_sigmoid_layer(x_nhwc, w_mat):
    # Layer 5: 4x4 conv, stride 1, pad 0 on a (N, 4, 4, C) map == dense layer.
    n, h, w, c = x_nhwc.shape
    x2 = x_nhwc.reshape(n, h * w * c)            # row order (kh, kw, c)
    k = h * w * c
    cp = w_mat.shape[1]
    m_pad = _round_up(max(n, 8), 8)
    if m_pad != n:
        x2 = jnp.pad(x2, ((0, m_pad - n), (0, 0)))
    est = m_pad * k * 2 + k * cp * 2 + m_pad * cp * 4
    y = pl.pallas_call(
        _dense_sigmoid_kernel,
        out_shape=jax.ShapeDtypeStruct((m_pad, cp), jnp.float32),
        grid=(1,),
        in_specs=[
            pl.BlockSpec((m_pad, k), lambda i: (0, 0)),
            pl.BlockSpec((k, cp), lambda i: (0, 0)),
        ],
        out_specs=pl.BlockSpec((m_pad, cp), lambda i: (0, 0)),
        compiler_params=pltpu.CompilerParams(
            dimension_semantics=("arbitrary",),
            vmem_limit_bytes=_vmem_limit(est)),
    )(x2, w_mat)
    return y[:n, :1].reshape(n, 1, 1, 1)


# ----------------------------------------------------------------------------
# Forward pass (activations stay NHWC/bf16 between layers)
# ----------------------------------------------------------------------------
def _forward_impl(x_nchw, prep, *, couts):
    x = jnp.transpose(x_nchw, (0, 2, 3, 1)).astype(jnp.bfloat16)  # single transpose + cast
    y = _conv_leaky_layer(x, prep["w1"], couts[0], stride=2, pad=1)
    y = _conv_bn_leaky_layer(y, prep["w2"], prep["g2"], prep["b2"], couts[1],
                             stride=2, pad=1)
    y = _conv_bn_leaky_layer(y, prep["w3"], prep["g3"], prep["b3"], couts[2],
                             stride=2, pad=1)
    y = _conv_bn_leaky_layer(y, prep["w4"], prep["g4"], prep["b4"], couts[3],
                             stride=2, pad=1)
    return _head_sigmoid_layer(y, prep["w5"])     # (N,1,1,1): NHWC == NCHW here


# ----------------------------------------------------------------------------
# One-time parameter preparation (hoisted out of the forward path)
# ----------------------------------------------------------------------------
def _patch_row_order(cin, k):
    """Probe the patch-feature ordering emitted by conv_general_dilated_patches
    (documented as channel-major (c, kh, kw)); using the probed permutation
    makes the weight layout robust regardless of library internals."""
    probe = np.arange(k * k * cin, dtype=np.float32).reshape(1, k, k, cin)
    out = jax.lax.conv_general_dilated_patches(
        jnp.asarray(probe), (k, k), (1, 1), ((0, 0), (0, 0)),
        dimension_numbers=("NHWC", "HWIO", "NHWC"))
    return np.asarray(out).reshape(-1).astype(np.int64)


def prepare_params(params):
    """Flatten conv weights into matmul layout (rows matched to the probed
    patch order), pad Cout to a lane-dense multiple of 128, cast to bf16;
    pad BN affine params in f32. Returns (prep_dict, couts)."""
    def conv_w(w):
        w = np.asarray(w, np.float32)
        cout, cin, kh, kw = w.shape
        cp = _round_up(max(cout, _LANE), _LANE)
        rows = np.transpose(w, (2, 3, 1, 0)).reshape(kh * kw * cin, cout)  # (kh,kw,c)
        rows = rows[_patch_row_order(cin, kh)]                             # -> patch order
        rows = np.pad(rows, ((0, 0), (0, cp - cout)))
        return jnp.asarray(rows, dtype=jnp.bfloat16)

    def head_w(w):
        w = np.asarray(w, np.float32)
        cout, cin, kh, kw = w.shape
        cp = _round_up(max(cout, _LANE), _LANE)
        rows = np.transpose(w, (2, 3, 1, 0)).reshape(kh * kw * cin, cout)  # (kh,kw,c)
        rows = np.pad(rows, ((0, 0), (0, cp - cout)))
        return jnp.asarray(rows, dtype=jnp.bfloat16)

    def bn_p(g, b):
        g = np.asarray(g, np.float32)
        b = np.asarray(b, np.float32)
        c = g.shape[0]
        cp = _round_up(max(c, _LANE), _LANE)
        g2 = np.pad(g.reshape(1, c), ((0, 0), (0, cp - c)), constant_values=1.0)
        b2 = np.pad(b.reshape(1, c), ((0, 0), (0, cp - c)))
        return jnp.asarray(g2), jnp.asarray(b2)

    prep = {"w1": conv_w(params["w1"]),
            "w2": conv_w(params["w2"]),
            "w3": conv_w(params["w3"]),
            "w4": conv_w(params["w4"]),
            "w5": head_w(params["w5"])}
    prep["g2"], prep["b2"] = bn_p(params["g2"], params["b2"])
    prep["g3"], prep["b3"] = bn_p(params["g3"], params["b3"])
    prep["g4"], prep["b4"] = bn_p(params["g4"], params["b4"])
    couts = tuple(int(params[f"w{i}"].shape[0]) for i in range(1, 5))
    return prep, couts


# ----------------------------------------------------------------------------
# Deterministic parameter init (DCGAN-style weights_init_general)
# ----------------------------------------------------------------------------
def init_params(key, image_channels, packing, gc, w_mean=0.0, w_std=0.02):
    in_ch = image_channels * packing
    ks = jax.random.split(key, 8)

    def conv_w(k, cout, cin):
        return w_mean + w_std * jax.random.normal(k, (cout, cin, 4, 4), jnp.float32)

    def bn_g(k, c):
        return 1.0 + w_std * jax.random.normal(k, (c,), jnp.float32)

    return {
        "w1": conv_w(ks[0], gc, in_ch),
        "w2": conv_w(ks[1], 2 * gc, gc),
        "w3": conv_w(ks[2], 4 * gc, 2 * gc),
        "w4": conv_w(ks[3], 8 * gc, 4 * gc),
        "w5": conv_w(ks[4], 1, 8 * gc),
        "g2": bn_g(ks[5], 2 * gc), "b2": jnp.zeros((2 * gc,), jnp.float32),
        "g3": bn_g(ks[6], 4 * gc), "b3": jnp.zeros((4 * gc,), jnp.float32),
        "g4": bn_g(ks[7], 8 * gc), "b4": jnp.zeros((8 * gc,), jnp.float32),
    }


# ----------------------------------------------------------------------------
# Pure-JAX reference (same dtype strategy as the kernels) for self-check
# ----------------------------------------------------------------------------
def _reference_forward(x_nchw, params):
    def conv(x, w, stride, pad):
        return jax.lax.conv_general_dilated(
            x, jnp.asarray(w, jnp.bfloat16), (stride, stride),
            ((pad, pad), (pad, pad)),
            dimension_numbers=("NHWC", "OIHW", "NHWC"),
            preferred_element_type=jnp.float32)

    def lrelu(y):
        return jnp.where(y >= 0.0, y, _LEAK * y)

    def bn(y, g, b):
        mean = jnp.mean(y, axis=(0, 1, 2), keepdims=True)
        var = jnp.mean((y - mean) ** 2, axis=(0, 1, 2), keepdims=True)
        return (y - mean) * jax.lax.rsqrt(var + _BN_EPS) * g + b

    x = jnp.transpose(x_nchw, (0, 2, 3, 1)).astype(jnp.bfloat16)
    y = lrelu(conv(x, params["w1"], 2, 1)).astype(jnp.bfloat16)
    y = lrelu(bn(conv(y, params["w2"], 2, 1), params["g2"], params["b2"])).astype(jnp.bfloat16)
    y = lrelu(bn(conv(y, params["w3"], 2, 1), params["g3"], params["b3"])).astype(jnp.bfloat16)
    y = lrelu(bn(conv(y, params["w4"], 2, 1), params["g4"], params["b4"])).astype(jnp.bfloat16)
    y = jax.nn.sigmoid(conv(y, params["w5"], 1, 0))
    return jnp.transpose(y, (0, 3, 1, 2))


# ----------------------------------------------------------------------------
if __name__ == "__main__":
    key = jax.random.PRNGKey(0)
    k_x, k_p = jax.random.split(key)

    # Discriminator64 requires 64x64 spatial input (layer 5 consumes a 4x4 map).
    N, image_channels, packing, gc = 2, 3, 1, 8
    x = jax.random.normal(k_x, (N, image_channels * packing, 64, 64), jnp.float32)
    params = init_params(k_p, image_channels, packing, gc)

    prep, couts = prepare_params(params)                 # one-time weight prep
    fwd = jax.jit(functools.partial(_forward_impl, couts=couts))

    out = jax.block_until_ready(fwd(x, prep))

    assert out.shape == (N, 1, 1, 1), out.shape
    assert bool(jnp.all(jnp.isfinite(out)))
    assert bool(jnp.all((out >= 0.0) & (out <= 1.0)))    # sigmoid output range

    # Numerical self-check against a pure-JAX (lax.conv) reference with the
    # same dtype strategy; catches any patch/weight layout mistakes.
    ref = jax.jit(_reference_forward)(x, params)
    err = float(jnp.max(jnp.abs(out - ref)))
    assert err < 2e-2, f"max|out - reference| = {err}"

    print("KERNEL_OK")
</pallas_src>

<mosaic_0001>
module attributes {stable_mosaic.version = 11 : i64} {
  func.func @_conv_leaky_kernel(%arg0: i32, %arg1: memref<1024x48xbf16, #tpu.memory_space<vmem>>, %arg2: memref<48x128xbf16, #tpu.memory_space<vmem>>, %arg3: memref<1024x128xbf16, #tpu.memory_space<vmem>>) attributes {dimension_semantics = [#tpu.dimension_semantics<parallel>], iteration_bounds = array<i64: 2>, scalar_prefetch = 0 : i64, scratch_operands = 0 : i64, tpu.core_type = #tpu.core_type<tc>, window_params = [{transform_indices = @transform_0, window_bounds = array<i64: 1024, 48>}, {pipeline_mode = #tpu.pipeline_mode<synchronous>, transform_indices = @transform_1, window_bounds = array<i64: 48, 128>}, {transform_indices = @transform_2, window_bounds = array<i64: 1024, 128>}]} {
    %c0 = arith.constant 0 : index
    %c0_0 = arith.constant 0 : index
    %0 = vector.load %arg1[%c0, %c0_0] : memref<1024x48xbf16, #tpu.memory_space<vmem>>, vector<1024x48xbf16>
    %c0_1 = arith.constant 0 : index
    %c0_2 = arith.constant 0 : index
    %1 = vector.load %arg2[%c0_1, %c0_2] : memref<48x128xbf16, #tpu.memory_space<vmem>>, vector<48x128xbf16>
    %cst = arith.constant dense<0.000000e+00> : vector<1024x128xf32>
    %2 = tpu.matmul %0, %1, %cst {dimension_numbers = #tpu.dot_dimension_numbers<[1], [0], [0], [1], [0, 0, 1, 1], [], []>} : vector<1024x48xbf16>, vector<48x128xbf16>, vector<1024x128xf32> -> vector<1024x128xf32>
    %cst_3 = arith.constant 0.000000e+00 : f32
    %3 = vector.broadcast %cst_3 : f32 to vector<1024x128xf32>
    %4 = arith.cmpf oge, %2, %3 : vector<1024x128xf32>
    %cst_4 = arith.constant 2.000000e-01 : f32
    %5 = vector.broadcast %cst_4 : f32 to vector<1024x128xf32>
    %6 = arith.mulf %5, %2 : vector<1024x128xf32>
    %7 = arith.select %4, %2, %6 : vector<1024x128xi1>, vector<1024x128xf32>
    %8 = arith.truncf %7 : vector<1024x128xf32> to vector<1024x128xbf16>
    %c0_5 = arith.constant 0 : index
    %c0_6 = arith.constant 0 : index
    %9 = vector.load %arg3[%c0_5, %c0_6] : memref<1024x128xbf16, #tpu.memory_space<vmem>>, vector<1024x128xbf16>
    tpu.vector_store %arg3[%c0_5, %c0_6], %8 {strides = array<i32>} : memref<1024x128xbf16, #tpu.memory_space<vmem>>, vector<1024x128xbf16>,
    return
  }
  func.func @transform_0(%arg0: i32) -> (i32, i32) {
    %c0_i32 = arith.constant 0 : i32
    %c0_i32_0 = arith.constant 0 : i32
    return %arg0, %c0_i32 : i32, i32
  }
  func.func @transform_1(%arg0: i32) -> (i32, i32) {
    %c0_i32 = arith.constant 0 : i32
    %c0_i32_0 = arith.constant 0 : i32
    %c0_i32_1 = arith.constant 0 : i32
    return %c0_i32, %c0_i32_0 : i32, i32
  }
  func.func @transform_2(%arg0: i32) -> (i32, i32) {
    %c0_i32 = arith.constant 0 : i32
    %c0_i32_0 = arith.constant 0 : i32
    return %arg0, %c0_i32 : i32, i32
  }
}

module attributes {stable_mosaic.version = 11 : i64} {
  func.func @_conv_bn_leaky_kernel(%arg0: i32, %arg1: memref<512x128xbf16, #tpu.memory_space<vmem>>, %arg2: memref<128x128xbf16, #tpu.memory_space<vmem>>, %arg3: memref<1x128xf32, #tpu.memory_space<vmem>>, %arg4: memref<1x128xf32, #tpu.memory_space<vmem>>, %arg5: memref<512x128xbf16, #tpu.memory_space<vmem>>) attributes {dimension_semantics = [#tpu.dimension_semantics<arbitrary>], iteration_bounds = array<i64: 1>, scalar_prefetch = 0 : i64, scratch_operands = 0 : i64, tpu.core_type = #tpu.core_type<tc>, window_params = [{pipeline_mode = #tpu.pipeline_mode<synchronous>, transform_indices = @transform_0, window_bounds = array<i64: 512, 128>}, {pipeline_mode = #tpu.pipeline_mode<synchronous>, transform_indices = @transform_1, window_bounds = array<i64: 128, 128>}, {pipeline_mode = #tpu.pipeline_mode<synchronous>, transform_indices = @transform_2, window_bounds = array<i64: 1, 128>}, {pipeline_mode = #tpu.pipeline_mode<synchronous>, transform_indices = @transform_3, window_bounds = array<i64: 1, 128>}, {pipeline_mode = #tpu.pipeline_mode<synchronous>, transform_indices = @transform_4, window_bounds = array<i64: 512, 128>}]} {
    %c0 = arith.constant 0 : index
    %c0_0 = arith.constant 0 : index
    %0 = vector.load %arg1[%c0, %c0_0] : memref<512x128xbf16, #tpu.memory_space<vmem>>, vector<512x128xbf16>
    %c0_1 = arith.constant 0 : index
    %c0_2 = arith.constant 0 : index
    %1 = vector.load %arg2[%c0_1, %c0_2] : memref<128x128xbf16, #tpu.memory_space<vmem>>, vector<128x128xbf16>
    %cst = arith.constant dense<0.000000e+00> : vector<512x128xf32>
    %2 = tpu.matmul %0, %1, %cst {dimension_numbers = #tpu.dot_dimension_numbers<[1], [0], [0], [1], [0, 0, 1, 1], [], []>} : vector<512x128xbf16>, vector<128x128xbf16>, vector<512x128xf32> -> vector<512x128xf32>
    %cst_3 = arith.constant dense<0.000000e+00> : vector<128xf32>
    %3 = vector.multi_reduction <add>, %2, %cst_3 [0] : vector<512x128xf32> to vector<128xf32>
    %4 = vector.shape_cast %3 : vector<128xf32> to vector<1x128xf32>
    %cst_4 = arith.constant 0.001953125 : f32
    %5 = vector.broadcast %cst_4 : f32 to vector<1x128xf32>
    %6 = arith.mulf %4, %5 : vector<1x128xf32>
    %7 = vector.broadcast %6 : vector<1x128xf32> to vector<512x128xf32>
    %8 = arith.subf %2, %7 : vector<512x128xf32>
    %9 = arith.mulf %8, %8 : vector<512x128xf32>
    %cst_5 = arith.constant dense<0.000000e+00> : vector<128xf32>
    %10 = vector.multi_reduction <add>, %9, %cst_5 [0] : vector<512x128xf32> to vector<128xf32>
    %11 = vector.shape_cast %10 : vector<128xf32> to vector<1x128xf32>
    %cst_6 = arith.constant 0.001953125 : f32
    %12 = vector.broadcast %cst_6 : f32 to vector<1x128xf32>
    %13 = arith.mulf %11, %12 : vector<1x128xf32>
    %cst_7 = arith.constant 9.99999974E-6 : f32
    %14 = vector.broadcast %cst_7 : f32 to vector<1x128xf32>
    %15 = arith.addf %13, %14 : vector<1x128xf32>
    %16 = math.rsqrt %15 : vector<1x128xf32>
    %c0_8 = arith.constant 0 : index
    %c0_9 = arith.constant 0 : index
    %17 = vector.load %arg3[%c0_8, %c0_9] : memref<1x128xf32, #tpu.memory_space<vmem>>, vector<1x128xf32>
    %18 = arith.mulf %16, %17 : vector<1x128xf32>
    %19 = vector.broadcast %18 : vector<1x128xf32> to vector<512x128xf32>
    %20 = arith.mulf %8, %19 : vector<512x128xf32>
    %c0_10 = arith.constant 0 : index
    %c0_11 = arith.constant 0 : index
    %21 = vector.load %arg4[%c0_10, %c0_11] : memref<1x128xf32, #tpu.memory_space<vmem>>, vector<1x128xf32>
    %22 = vector.broadcast %21 : vector<1x128xf32> to vector<512x128xf32>
    %23 = arith.addf %20, %22 : vector<512x128xf32>
    %cst_12 = arith.constant 0.000000e+00 : f32
    %24 = vector.broadcast %cst_12 : f32 to vector<512x128xf32>
    %25 = arith.cmpf oge, %23, %24 : vector<512x128xf32>
    %cst_13 = arith.constant 2.000000e-01 : f32
    %26 = vector.broadcast %cst_13 : f32 to vector<512x128xf32>
    %27 = arith.mulf %26, %23 : vector<512x128xf32>
    %28 = arith.select %25, %23, %27 : vector<512x128xi1>, vector<512x128xf32>
    %29 = arith.truncf %28 : vector<512x128xf32> to vector<512x128xbf16>
    %c0_14 = arith.constant 0 : index
    %c0_15 = arith.constant 0 : index
    %30 = vector.load %arg5[%c0_14, %c0_15] : memref<512x128xbf16, #tpu.memory_space<vmem>>, vector<512x128xbf16>
    tpu.vector_store %arg5[%c0_14, %c0_15], %29 {strides = array<i32>} : memref<512x128xbf16, #tpu.memory_space<vmem>>, vector<512x128xbf16>,
    return
  }
  func.func @transform_0(%arg0: i32) -> (i32, i32) {
    %c0_i32 = arith.constant 0 : i32
    %c0_i32_0 = arith.constant 0 : i32
    %c0_i32_1 = arith.constant 0 : i32
    return %c0_i32, %c0_i32_0 : i32, i32
  }
  func.func @transform_1(%arg0: i32) -> (i32, i32) {
    %c0_i32 = arith.constant 0 : i32
    %c0_i32_0 = arith.constant 0 : i32
    %c0_i32_1 = arith.constant 0 : i32
    return %c0_i32, %c0_i32_0 : i32, i32
  }
  func.func @transform_2(%arg0: i32) -> (i32, i32) {
    %c0_i32 = arith.constant 0 : i32
    %c0_i32_0 = arith.constant 0 : i32
    %c0_i32_1 = arith.constant 0 : i32
    return %c0_i32, %c0_i32_0 : i32, i32
  }
  func.func @transform_3(%arg0: i32) -> (i32, i32) {
    %c0_i32 = arith.constant 0 : i32
    %c0_i32_0 = arith.constant 0 : i32
    %c0_i32_1 = arith.constant 0 : i32
    return %c0_i32, %c0_i32_0 : i32, i32
  }
  func.func @transform_4(%arg0: i32) -> (i32, i32) {
    %c0_i32 = arith.constant 0 : i32
    %c0_i32_0 = arith.constant 0 : i32
    %c0_i32_1 = arith.constant 0 : i32
    return %c0_i32, %c0_i32_0 : i32, i32
  }
}

module attributes {stable_mosaic.version = 11 : i64} {
  func.func @_conv_bn_leaky_kernel(%arg0: i32, %arg1: memref<128x256xbf16, #tpu.memory_space<vmem>>, %arg2: memref<256x128xbf16, #tpu.memory_space<vmem>>, %arg3: memref<1x128xf32, #tpu.memory_space<vmem>>, %arg4: memref<1x128xf32, #tpu.memory_space<vmem>>, %arg5: memref<128x128xbf16, #tpu.memory_space<vmem>>) attributes {dimension_semantics = [#tpu.dimension_semantics<arbitrary>], iteration_bounds = array<i64: 1>, scalar_prefetch = 0 : i64, scratch_operands = 0 : i64, tpu.core_type = #tpu.core_type<tc>, window_params = [{pipeline_mode = #tpu.pipeline_mode<synchronous>, transform_indices = @transform_0, window_bounds = array<i64: 128, 256>}, {pipeline_mode = #tpu.pipeline_mode<synchronous>, transform_indices = @transform_1, window_bounds = array<i64: 256, 128>}, {pipeline_mode = #tpu.pipeline_mode<synchronous>, transform_indices = @transform_2, window_bounds = array<i64: 1, 128>}, {pipeline_mode = #tpu.pipeline_mode<synchronous>, transform_indices = @transform_3, window_bounds = array<i64: 1, 128>}, {pipeline_mode = #tpu.pipeline_mode<synchronous>, transform_indices = @transform_4, window_bounds = array<i64: 128, 128>}]} {
    %c0 = arith.constant 0 : index
    %c0_0 = arith.constant 0 : index
    %0 = vector.load %arg1[%c0, %c0_0] : memref<128x256xbf16, #tpu.memory_space<vmem>>, vector<128x256xbf16>
    %c0_1 = arith.constant 0 : index
    %c0_2 = arith.constant 0 : index
    %1 = vector.load %arg2[%c0_1, %c0_2] : memref<256x128xbf16, #tpu.memory_space<vmem>>, vector<256x128xbf16>
    %cst = arith.constant dense<0.000000e+00> : vector<128x128xf32>
    %2 = tpu.matmul %0, %1, %cst {dimension_numbers = #tpu.dot_dimension_numbers<[1], [0], [0], [1], [0, 0, 1, 1], [], []>} : vector<128x256xbf16>, vector<256x128xbf16>, vector<128x128xf32> -> vector<128x128xf32>
    %cst_3 = arith.constant dense<0.000000e+00> : vector<128xf32>
    %3 = vector.multi_reduction <add>, %2, %cst_3 [0] : vector<128x128xf32> to vector<128xf32>
    %4 = vector.shape_cast %3 : vector<128xf32> to vector<1x128xf32>
    %cst_4 = arith.constant 7.812500e-03 : f32
    %5 = vector.broadcast %cst_4 : f32 to vector<1x128xf32>
    %6 = arith.mulf %4, %5 : vector<1x128xf32>
    %7 = vector.broadcast %6 : vector<1x128xf32> to vector<128x128xf32>
    %8 = arith.subf %2, %7 : vector<128x128xf32>
    %9 = arith.mulf %8, %8 : vector<128x128xf32>
    %cst_5 = arith.constant dense<0.000000e+00> : vector<128xf32>
    %10 = vector.multi_reduction <add>, %9, %cst_5 [0] : vector<128x128xf32> to vector<128xf32>
    %11 = vector.shape_cast %10 : vector<128xf32> to vector<1x128xf32>
    %cst_6 = arith.constant 7.812500e-03 : f32
    %12 = vector.broadcast %cst_6 : f32 to vector<1x128xf32>
    %13 = arith.mulf %11, %12 : vector<1x128xf32>
    %cst_7 = arith.constant 9.99999974E-6 : f32
    %14 = vector.broadcast %cst_7 : f32 to vector<1x128xf32>
    %15 = arith.addf %13, %14 : vector<1x128xf32>
    %16 = math.rsqrt %15 : vector<1x128xf32>
    %c0_8 = arith.constant 0 : index
    %c0_9 = arith.constant 0 : index
    %17 = vector.load %arg3[%c0_8, %c0_9] : memref<1x128xf32, #tpu.memory_space<vmem>>, vector<1x128xf32>
    %18 = arith.mulf %16, %17 : vector<1x128xf32>
    %19 = vector.broadcast %18 : vector<1x128xf32> to vector<128x128xf32>
    %20 = arith.mulf %8, %19 : vector<128x128xf32>
    %c0_10 = arith.constant 0 : index
    %c0_11 = arith.constant 0 : index
    %21 = vector.load %arg4[%c0_10, %c0_11] : memref<1x128xf32, #tpu.memory_space<vmem>>, vector<1x128xf32>
    %22 = vector.broadcast %21 : vector<1x128xf32> to vector<128x128xf32>
    %23 = arith.addf %20, %22 : vector<128x128xf32>
    %cst_12 = arith.constant 0.000000e+00 : f32
    %24 = vector.broadcast %cst_12 : f32 to vector<128x128xf32>
    %25 = arith.cmpf oge, %23, %24 : vector<128x128xf32>
    %cst_13 = arith.constant 2.000000e-01 : f32
    %26 = vector.broadcast %cst_13 : f32 to vector<128x128xf32>
    %27 = arith.mulf %26, %23 : vector<128x128xf32>
    %28 = arith.select %25, %23, %27 : vector<128x128xi1>, vector<128x128xf32>
    %29 = arith.truncf %28 : vector<128x128xf32> to vector<128x128xbf16>
    %c0_14 = arith.constant 0 : index
    %c0_15 = arith.constant 0 : index
    %30 = vector.load %arg5[%c0_14, %c0_15] : memref<128x128xbf16, #tpu.memory_space<vmem>>, vector<128x128xbf16>
    tpu.vector_store %arg5[%c0_14, %c0_15], %29 {strides = array<i32>} : memref<128x128xbf16, #tpu.memory_space<vmem>>, vector<128x128xbf16>,
    return
  }
  func.func @transform_0(%arg0: i32) -> (i32, i32) {
    %c0_i32 = arith.constant 0 : i32
    %c0_i32_0 = arith.constant 0 : i32
    %c0_i32_1 = arith.constant 0 : i32
    return %c0_i32, %c0_i32_0 : i32, i32
  }
  func.func @transform_1(%arg0: i32) -> (i32, i32) {
    %c0_i32 = arith.constant 0 : i32
    %c0_i32_0 = arith.constant 0 : i32
    %c0_i32_1 = arith.constant 0 : i32
    return %c0_i32, %c0_i32_0 : i32, i32
  }
  func.func @transform_2(%arg0: i32) -> (i32, i32) {
    %c0_i32 = arith.constant 0 : i32
    %c0_i32_0 = arith.constant 0 : i32
    %c0_i32_1 = arith.constant 0 : i32
    return %c0_i32, %c0_i32_0 : i32, i32
  }
  func.func @transform_3(%arg0: i32) -> (i32, i32) {
    %c0_i32 = arith.constant 0 : i32
    %c0_i32_0 = arith.constant 0 : i32
    %c0_i32_1 = arith.constant 0 : i32
    return %c0_i32, %c0_i32_0 : i32, i32
  }
  func.func @transform_4(%arg0: i32) -> (i32, i32) {
    %c0_i32 = arith.constant 0 : i32
    %c0_i32_0 = arith.constant 0 : i32
    %c0_i32_1 = arith.constant 0 : i32
    return %c0_i32, %c0_i32_0 : i32, i32
  }
}

module attributes {stable_mosaic.version = 11 : i64} {
  func.func @_conv_bn_leaky_kernel(%arg0: i32, %arg1: memref<32x512xbf16, #tpu.memory_space<vmem>>, %arg2: memref<512x128xbf16, #tpu.memory_space<vmem>>, %arg3: memref<1x128xf32, #tpu.memory_space<vmem>>, %arg4: memref<1x128xf32, #tpu.memory_space<vmem>>, %arg5: memref<32x128xbf16, #tpu.memory_space<vmem>>) attributes {dimension_semantics = [#tpu.dimension_semantics<arbitrary>], iteration_bounds = array<i64: 1>, scalar_prefetch = 0 : i64, scratch_operands = 0 : i64, tpu.core_type = #tpu.core_type<tc>, window_params = [{pipeline_mode = #tpu.pipeline_mode<synchronous>, transform_indices = @transform_0, window_bounds = array<i64: 32, 512>}, {pipeline_mode = #tpu.pipeline_mode<synchronous>, transform_indices = @transform_1, window_bounds = array<i64: 512, 128>}, {pipeline_mode = #tpu.pipeline_mode<synchronous>, transform_indices = @transform_2, window_bounds = array<i64: 1, 128>}, {pipeline_mode = #tpu.pipeline_mode<synchronous>, transform_indices = @transform_3, window_bounds = array<i64: 1, 128>}, {pipeline_mode = #tpu.pipeline_mode<synchronous>, transform_indices = @transform_4, window_bounds = array<i64: 32, 128>}]} {
    %c0 = arith.constant 0 : index
    %c0_0 = arith.constant 0 : index
    %0 = vector.load %arg1[%c0, %c0_0] : memref<32x512xbf16, #tpu.memory_space<vmem>>, vector<32x512xbf16>
    %c0_1 = arith.constant 0 : index
    %c0_2 = arith.constant 0 : index
    %1 = vector.load %arg2[%c0_1, %c0_2] : memref<512x128xbf16, #tpu.memory_space<vmem>>, vector<512x128xbf16>
    %cst = arith.constant dense<0.000000e+00> : vector<32x128xf32>
    %2 = tpu.matmul %0, %1, %cst {dimension_numbers = #tpu.dot_dimension_numbers<[1], [0], [0], [1], [0, 0, 1, 1], [], []>} : vector<32x512xbf16>, vector<512x128xbf16>, vector<32x128xf32> -> vector<32x128xf32>
    %cst_3 = arith.constant dense<0.000000e+00> : vector<128xf32>
    %3 = vector.multi_reduction <add>, %2, %cst_3 [0] : vector<32x128xf32> to vector<128xf32>
    %4 = vector.shape_cast %3 : vector<128xf32> to vector<1x128xf32>
    %cst_4 = arith.constant 3.125000e-02 : f32
    %5 = vector.broadcast %cst_4 : f32 to vector<1x128xf32>
    %6 = arith.mulf %4, %5 : vector<1x128xf32>
    %7 = vector.broadcast %6 : vector<1x128xf32> to vector<32x128xf32>
    %8 = arith.subf %2, %7 : vector<32x128xf32>
    %9 = arith.mulf %8, %8 : vector<32x128xf32>
    %cst_5 = arith.constant dense<0.000000e+00> : vector<128xf32>
    %10 = vector.multi_reduction <add>, %9, %cst_5 [0] : vector<32x128xf32> to vector<128xf32>
    %11 = vector.shape_cast %10 : vector<128xf32> to vector<1x128xf32>
    %cst_6 = arith.constant 3.125000e-02 : f32
    %12 = vector.broadcast %cst_6 : f32 to vector<1x128xf32>
    %13 = arith.mulf %11, %12 : vector<1x128xf32>
    %cst_7 = arith.constant 9.99999974E-6 : f32
    %14 = vector.broadcast %cst_7 : f32 to vector<1x128xf32>
    %15 = arith.addf %13, %14 : vector<1x128xf32>
    %16 = math.rsqrt %15 : vector<1x128xf32>
    %c0_8 = arith.constant 0 : index
    %c0_9 = arith.constant 0 : index
    %17 = vector.load %arg3[%c0_8, %c0_9] : memref<1x128xf32, #tpu.memory_space<vmem>>, vector<1x128xf32>
    %18 = arith.mulf %16, %17 : vector<1x128xf32>
    %19 = vector.broadcast %18 : vector<1x128xf32> to vector<32x128xf32>
    %20 = arith.mulf %8, %19 : vector<32x128xf32>
    %c0_10 = arith.constant 0 : index
    %c0_11 = arith.constant 0 : index
    %21 = vector.load %arg4[%c0_10, %c0_11] : memref<1x128xf32, #tpu.memory_space<vmem>>, vector<1x128xf32>
    %22 = vector.broadcast %21 : vector<1x128xf32> to vector<32x128xf32>
    %23 = arith.addf %20, %22 : vector<32x128xf32>
    %cst_12 = arith.constant 0.000000e+00 : f32
    %24 = vector.broadcast %cst_12 : f32 to vector<32x128xf32>
    %25 = arith.cmpf oge, %23, %24 : vector<32x128xf32>
    %cst_13 = arith.constant 2.000000e-01 : f32
    %26 = vector.broadcast %cst_13 : f32 to vector<32x128xf32>
    %27 = arith.mulf %26, %23 : vector<32x128xf32>
    %28 = arith.select %25, %23, %27 : vector<32x128xi1>, vector<32x128xf32>
    %29 = arith.truncf %28 : vector<32x128xf32> to vector<32x128xbf16>
    %c0_14 = arith.constant 0 : index
    %c0_15 = arith.constant 0 : index
    %30 = vector.load %arg5[%c0_14, %c0_15] : memref<32x128xbf16, #tpu.memory_space<vmem>>, vector<32x128xbf16>
    tpu.vector_store %arg5[%c0_14, %c0_15], %29 {strides = array<i32>} : memref<32x128xbf16, #tpu.memory_space<vmem>>, vector<32x128xbf16>,
    return
  }
  func.func @transform_0(%arg0: i32) -> (i32, i32) {
    %c0_i32 = arith.constant 0 : i32
    %c0_i32_0 = arith.constant 0 : i32
    %c0_i32_1 = arith.constant 0 : i32
    return %c0_i32, %c0_i32_0 : i32, i32
  }
  func.func @transform_1(%arg0: i32) -> (i32, i32) {
    %c0_i32 = arith.constant 0 : i32
    %c0_i32_0 = arith.constant 0 : i32
    %c0_i32_1 = arith.constant 0 : i32
    return %c0_i32, %c0_i32_0 : i32, i32
  }
  func.func @transform_2(%arg0: i32) -> (i32, i32) {
    %c0_i32 = arith.constant 0 : i32
    %c0_i32_0 = arith.constant 0 : i32
    %c0_i32_1 = arith.constant 0 : i32
    return %c0_i32, %c0_i32_0 : i32, i32
  }
  func.func @transform_3(%arg0: i32) -> (i32, i32) {
    %c0_i32 = arith.constant 0 : i32
    %c0_i32_0 = arith.constant 0 : i32
    %c0_i32_1 = arith.constant 0 : i32
    return %c0_i32, %c0_i32_0 : i32, i32
  }
  func.func @transform_4(%arg0: i32) -> (i32, i32) {
    %c0_i32 = arith.constant 0 : i32
    %c0_i32_0 = arith.constant 0 : i32
    %c0_i32_1 = arith.constant 0 : i32
    return %c0_i32, %c0_i32_0 : i32, i32
  }
}

module attributes {stable_mosaic.version = 11 : i64} {
  func.func @_dense_sigmoid_kernel(%arg0: i32, %arg1: memref<8x1024xbf16, #tpu.memory_space<vmem>>, %arg2: memref<1024x128xbf16, #tpu.memory_space<vmem>>, %arg3: memref<8x128xf32, #tpu.memory_space<vmem>>) attributes {dimension_semantics = [#tpu.dimension_semantics<arbitrary>], iteration_bounds = array<i64: 1>, scalar_prefetch = 0 : i64, scratch_operands = 0 : i64, tpu.core_type = #tpu.core_type<tc>, window_params = [{pipeline_mode = #tpu.pipeline_mode<synchronous>, transform_indices = @transform_0, window_bounds = array<i64: 8, 1024>}, {pipeline_mode = #tpu.pipeline_mode<synchronous>, transform_indices = @transform_1, window_bounds = array<i64: 1024, 128>}, {pipeline_mode = #tpu.pipeline_mode<synchronous>, transform_indices = @transform_2, window_bounds = array<i64: 8, 128>}]} {
    %c0 = arith.constant 0 : index
    %c0_0 = arith.constant 0 : index
    %0 = vector.load %arg1[%c0, %c0_0] : memref<8x1024xbf16, #tpu.memory_space<vmem>>, vector<8x1024xbf16>
    %c0_1 = arith.constant 0 : index
    %c0_2 = arith.constant 0 : index
    %1 = vector.load %arg2[%c0_1, %c0_2] : memref<1024x128xbf16, #tpu.memory_space<vmem>>, vector<1024x128xbf16>
    %cst = arith.constant dense<0.000000e+00> : vector<8x128xf32>
    %2 = tpu.matmul %0, %1, %cst {dimension_numbers = #tpu.dot_dimension_numbers<[1], [0], [0], [1], [0, 0, 1, 1], [], []>} : vector<8x1024xbf16>, vector<1024x128xbf16>, vector<8x128xf32> -> vector<8x128xf32>
    %3 = math.absf %2 : vector<8x128xf32>
    %cst_3 = arith.constant 0.000000e+00 : f32
    %4 = vector.broadcast %cst_3 : f32 to vector<8x128xf32>
    %5 = arith.subf %4, %3 : vector<8x128xf32>
    %6 = math.exp %5 : vector<8x128xf32>
    %cst_4 = arith.constant 0.000000e+00 : f32
    %7 = vector.broadcast %cst_4 : f32 to vector<8x128xf32>
    %8 = arith.cmpf oge, %2, %7 : vector<8x128xf32>
    %cst_5 = arith.constant 1.000000e+00 : f32
    %9 = vector.broadcast %cst_5 : f32 to vector<8x128xf32>
    %10 = arith.select %8, %9, %6 : vector<8x128xi1>, vector<8x128xf32>
    %cst_6 = arith.constant 1.000000e+00 : f32
    %11 = vector.broadcast %cst_6 : f32 to vector<8x128xf32>
    %12 = arith.addf %11, %6 : vector<8x128xf32>
    %13 = arith.divf %10, %12 : vector<8x128xf32>
    %c0_7 = arith.constant 0 : index
    %c0_8 = arith.constant 0 : index
    %14 = vector.load %arg3[%c0_7, %c0_8] : memref<8x128xf32, #tpu.memory_space<vmem>>, vector<8x128xf32>
    tpu.vector_store %arg3[%c0_7, %c0_8], %13 {strides = array<i32>} : memref<8x128xf32, #tpu.memory_space<vmem>>, vector<8x128xf32>,
    return
  }
  func.func @transform_0(%arg0: i32) -> (i32, i32) {
    %c0_i32 = arith.constant 0 : i32
    %c0_i32_0 = arith.constant 0 : i32
    %c0_i32_1 = arith.constant 0 : i32
    return %c0_i32, %c0_i32_0 : i32, i32
  }
  func.func @transform_1(%arg0: i32) -> (i32, i32) {
    %c0_i32 = arith.constant 0 : i32
    %c0_i32_0 = arith.constant 0 : i32
    %c0_i32_1 = arith.constant 0 : i32
    return %c0_i32, %c0_i32_0 : i32, i32
  }
  func.func @transform_2(%arg0: i32) -> (i32, i32) {
    %c0_i32 = arith.constant 0 : i32
    %c0_i32_0 = arith.constant 0 : i32
    %c0_i32_1 = arith.constant 0 : i32
    return %c0_i32, %c0_i32_0 : i32, i32
  }
}

</mosaic_0001>

<bundles_post_ra>
// kernel: _forward_impl.5
= control target key start
LH: loop header
LB: loop body
LE: loop exit
PB: predicated region body
PF: predicated region fallthrough
CT: control target
= control target key end

     0   :  { %s3524_s9 = smov 0   ;;  %s3768_s0 = inlined_call_operand.vmem [shape: bf16[2048,48], index: 0, kind: input, shape index: {}]   ;;  %s3769_s1 = inlined_call_operand.vmem [shape: bf16[48,128], index: 1, kind: input, shape index: {}]   ;;  %s3770_s2 = inlined_call_operand.vmem [shape: bf16[2048,128], index: 2, kind: output, shape index: {}]  }
   0x1 LB: > { %s2438_s10 = sadd.s32 4294967295, %s3507_s9   ;;  %p2442_p0 = scmp.ge.s32.totalorder %s3507_s9, 1  ;;  %s3507_s9 = sphi %s3524_s9, %s12_s9  }
   0x2   : > { %p113_p1 = scmp.lt.s32.totalorder %s3507_s9, 3 }
   0x4   : > { %p114_p2 = pnand %p2442_p0, %p113_p1 }
   0x5   : > { %v3434_v0 = vld [vmem:[%s3769_s1] sm:$0xff] (!%p114_p2)   ;;  %s2443_s13 = sshll.u32 (!%p114_p2), %s2438_s10, 7  ;;  %v3435_v1 = vld [vmem:[%s3769_s1 + $0x8] sm:$0xff] (!%p114_p2)   ;;  %v3436_v2 = vld [vmem:[%s3769_s1 + $0x10] sm:$0xff] (!%p114_p2)   ;;  %vm620_vm0 = vcmask (!%p114_p2), 392192  }
   0x6   : > { %117 = sbr.rel (%p114_p2) target bundleno = 361 (0x169), region = 28  ;;  %p136_p3 = scmp.lt.s32.totalorder (!%p114_p2), %s2443_s13, 255  ;;  %3286 = vmatprep.subr.bf16.mxu0 (!%p114_p2), %v3434_v0  ;;  %3420 = vmatprep.subr.bf16.mxu1 (!%p114_p2), %v3434_v0 }
   0x7   : > { %3287 = vmatpush3.bf16.msra.mxu0 (!%p114_p2), %v3434_v0  ;;  %3423 = vmatpush3.bf16.msra.mxu1 (!%p114_p2), %v3434_v0 }
   0x8   : > { %3288 = vmatprep.subr.bf16.mxu0 (!%p114_p2), %v3435_v1  ;;  %3421 = vmatprep.subr.bf16.mxu1 (!%p114_p2), %v3435_v1 }
   0xb   : > { %3289 = vmatpush3.bf16.msra.mxu0 (!%p114_p2), %v3435_v1  ;;  %3424 = vmatpush3.bf16.msra.mxu1 (!%p114_p2), %v3435_v1 }
   0xc   : > { %3290 = vmatprep.subr.bf16.mxu0 (!%p114_p2), %v3436_v2  ;;  %3422 = vmatprep.subr.bf16.mxu1 (!%p114_p2), %v3436_v2 }
   0xd   : > { %s3772_s13 = smov (!%p136_p3, %s2443_s13), 255 }
   0xe   : > { %s2444_s18 = sshll.u32 %s3772_s13, 2 }
   0xf   : > { %s3549_s21 = scalar_lea.vmem %s3768_s0, %s2444_s18  ;;  %3291 = vmatpush3.bf16.msra.mxu0 %v3436_v2  ;;  %3425 = vmatpush3.bf16.msra.mxu1 %v3436_v2  ;;  %s3684_s24 = scalar_lea.vmem %s3770_s2, %s2444_s18 }
  0x10   : > { %v3437_v3 = vld [vmem:[%s3549_s21] sm:$0xff]   ;;  %v3439_v5 = vld [vmem:[%s3549_s21 + $0x8] sm:$0xff]   ;;  %v3441_v7 = vld [vmem:[%s3549_s21 + $0x10] sm:$0xff]  }
  0x11   : > { %v3438_v4 = vld [vmem:[%s3549_s21 + $0x100] sm:$0xff]   ;;  %3292 = vmatprep.mubr.msk.bf16.mxu0 %vm620_vm0, %v3437_v3  ;;  %v3440_v6 = vld [vmem:[%s3549_s21 + $0x108] sm:$0xff]   ;;  %v3442_v8 = vld [vmem:[%s3549_s21 + $0x110] sm:$0xff]  }
  0x12   : > { %3356 = vmatprep.mubr.msk.bf16.mxu1 %vm620_vm0, %v3438_v4  ;;  %3293 = vmatmul.mubr.msk.bf16.vlgmr.msra.gmra.mrb[0].mxu0 %vm620_vm0, %v3439_v5  ;;  %v3443_v9 = vld [vmem:[%s3549_s21 + $0x18] sm:$0xff]   ;;  %v3445_v11 = vld [vmem:[%s3549_s21 + $0x20] sm:$0xff]   ;;  %v3447_v13 = vld [vmem:[%s3549_s21 + $0x28] sm:$0xff]  }
  0x13   : > { %3357 = vmatmul.mubr.msk.bf16.vlgmr.msra.gmra.mrb[0].mxu1 %vm620_vm0, %v3440_v6  ;;  %3296 = vmatprep.mubr.msk.bf16.mxu0 %vm620_vm0, %v3441_v7  ;;  %v3444_v10 = vld [vmem:[%s3549_s21 + $0x118] sm:$0xff]   ;;  %v3446_v12 = vld [vmem:[%s3549_s21 + $0x120] sm:$0xff]   ;;  %v3448_v14 = vld [vmem:[%s3549_s21 + $0x128] sm:$0xff]  }
  0x14   : > { %3360 = vmatprep.mubr.msk.bf16.mxu1 %vm620_vm0, %v3442_v8  ;;  %v3449_v15 = vld [vmem:[%s3549_s21 + $0x30] sm:$0xff]   ;;  %v3451_v17 = vld [vmem:[%s3549_s21 + $0x38] sm:$0xff]   ;;  %v3453_v19 = vld [vmem:[%s3549_s21 + $0x40] sm:$0xff]  }
  0x15   : > { %v3450_v16 = vld [vmem:[%s3549_s21 + $0x130] sm:$0xff]   ;;  %v3452_v18 = vld [vmem:[%s3549_s21 + $0x138] sm:$0xff]   ;;  %v3454_v20 = vld [vmem:[%s3549_s21 + $0x140] sm:$0xff]  }
  0x16   : > { %v3455_v21 = vld [vmem:[%s3549_s21 + $0x48] sm:$0xff]   ;;  %v3457_v23 = vld [vmem:[%s3549_s21 + $0x50] sm:$0xff]   ;;  %v3459_v25 = vld [vmem:[%s3549_s21 + $0x58] sm:$0xff]  }
  0x17   : > { %v3456_v22 = vld [vmem:[%s3549_s21 + $0x148] sm:$0xff]   ;;  %v3458_v24 = vld [vmem:[%s3549_s21 + $0x150] sm:$0xff]   ;;  %v3460_v26 = vld [vmem:[%s3549_s21 + $0x158] sm:$0xff]  }
  0x18   : > { %v3461_v27 = vld [vmem:[%s3549_s21 + $0x60] sm:$0xff]   ;;  %v3463_v29 = vld [vmem:[%s3549_s21 + $0x68] sm:$0xff]   ;;  %v3465_v31 = vld [vmem:[%s3549_s21 + $0x70] sm:$0xff]  }
  0x19   : > { %v3462_v28 = vld [vmem:[%s3549_s21 + $0x160] sm:$0xff]   ;;  %v3464_v30 = vld [vmem:[%s3549_s21 + $0x168] sm:$0xff]   ;;  %v3466_v32 = vld [vmem:[%s3549_s21 + $0x170] sm:$0xff]  }
  0x1a   : > { %3297 = vmatmul.mubr.msk.bf16.gmra.mrb[4].mxu0 %vm620_vm0, %v3443_v9  ;;  %v3467_v33 = vld [vmem:[%s3549_s21 + $0x78] sm:$0xff]   ;;  %v3469_v35 = vld [vmem:[%s3549_s21 + $0x80] sm:$0xff]   ;;  %v3471_v37 = vld [vmem:[%s3549_s21 + $0x88] sm:$0xff]  }
  0x1b   : > { %3361 = vmatmul.mubr.msk.bf16.gmra.mrb[4].mxu1 %vm620_vm0, %v3444_v10  ;;  %3300 = vmatprep.mubr.msk.bf16.mxu0 %vm620_vm0, %v3445_v11  ;;  %v3468_v34 = vld [vmem:[%s3549_s21 + $0x178] sm:$0xff]   ;;  %v3470_v36 = vld [vmem:[%s3549_s21 + $0x180] sm:$0xff]   ;;  %v3472_v38 = vld [vmem:[%s3549_s21 + $0x188] sm:$0xff]  }
  0x1c   : > { %3364 = vmatprep.mubr.msk.bf16.mxu1 %vm620_vm0, %v3446_v12  ;;  %v3473_v39 = vld [vmem:[%s3549_s21 + $0x90] sm:$0xff]   ;;  %v3475_v41 = vld [vmem:[%s3549_s21 + $0x98] sm:$0xff]   ;;  %v3477_v43 = vld [vmem:[%s3549_s21 + $0xa0] sm:$0xff]  }
  0x1d   : > { %v3474_v40 = vld [vmem:[%s3549_s21 + $0x190] sm:$0xff]   ;;  %v3476_v42 = vld [vmem:[%s3549_s21 + $0x198] sm:$0xff]   ;;  %v3478_v44 = vld [vmem:[%s3549_s21 + $0x1a0] sm:$0xff]  }
  0x1e   : > { %v3479_v45 = vld [vmem:[%s3549_s21 + $0xa8] sm:$0xff]   ;;  %v3481_v47 = vld [vmem:[%s3549_s21 + $0xb0] sm:$0xff]   ;;  %v3483_v49 = vld [vmem:[%s3549_s21 + $0xb8] sm:$0xff]  }
  0x1f   : > { %v3480_v46 = vld [vmem:[%s3549_s21 + $0x1a8] sm:$0xff]   ;;  %v3482_v48 = vld [vmem:[%s3549_s21 + $0x1b0] sm:$0xff]   ;;  %v3484_v50 = vld [vmem:[%s3549_s21 + $0x1b8] sm:$0xff]  }
  0x20   : > { %v3485_v51 = vld [vmem:[%s3549_s21 + $0xc0] sm:$0xff]   ;;  %v3487_v53 = vld [vmem:[%s3549_s21 + $0xc8] sm:$0xff]   ;;  %v3489_v55 = vld [vmem:[%s3549_s21 + $0xd0] sm:$0xff]  }
  0x21   : > { %v3486_v52 = vld [vmem:[%s3549_s21 + $0x1c0] sm:$0xff]   ;;  %v3488_v54 = vld [vmem:[%s3549_s21 + $0x1c8] sm:$0xff]   ;;  %v3490_v56 = vld [vmem:[%s3549_s21 + $0x1d0] sm:$0xff]  }
  0x22   : > { %3301 = vmatmul.mubr.msk.bf16.gmra.mrb[8].mxu0 %vm620_vm0, %v3447_v13  ;;  %v3491_v57 = vld [vmem:[%s3549_s21 + $0xd8] sm:$0xff]   ;;  %v3493_v59 = vld [vmem:[%s3549_s21 + $0xe0] sm:$0xff]   ;;  %v3495_v61 = vld [vmem:[%s3549_s21 + $0xe8] sm:$0xff]  }
  0x23   : > { %3365 = vmatmul.mubr.msk.bf16.gmra.mrb[8].mxu1 %vm620_vm0, %v3448_v14  ;;  %3304 = vmatprep.mubr.msk.bf16.mxu0 %vm620_vm0, %v3449_v15  ;;  %v3492_v58 = vld [vmem:[%s3549_s21 + $0x1d8] sm:$0xff]   ;;  %v3494_v60 = vld [vmem:[%s3549_s21 + $0x1e0] sm:$0xff]   ;;  %v3496_v62 = vld [vmem:[%s3549_s21 + $0x1e8] sm:$0xff]  }
  0x24   : > { %3368 = vmatprep.mubr.msk.bf16.mxu1 %vm620_vm0, %v3450_v16  ;;  %v3497_v63 = vld [vmem:[%s3549_s21 + $0xf0] sm:$0xff]   ;;  %v3499_v1 = vld [vmem:[%s3549_s21 + $0xf8] sm:$0xff]  }
  0x25   : > { %v3498_v0 = vld [vmem:[%s3549_s21 + $0x1f0] sm:$0xff]   ;;  %v3500_v2 = vld [vmem:[%s3549_s21 + $0x1f8] sm:$0xff]  }
  0x2a   : > { %3305 = vmatmul.mubr.msk.bf16.gmra.mrb[12].mxu0 %vm620_vm0, %v3451_v17 }
  0x2b   : > { %3369 = vmatmul.mubr.msk.bf16.gmra.mrb[12].mxu1 %vm620_vm0, %v3452_v18  ;;  %3308 = vmatprep.mubr.msk.bf16.mxu0 %vm620_vm0, %v3453_v19 }
  0x2c   : > { %3372 = vmatprep.mubr.msk.bf16.mxu1 %vm620_vm0, %v3454_v20 }
  0x32   : > { %3309 = vmatmul.mubr.msk.bf16.gmra.mrb[16].mxu0 %vm620_vm0, %v3455_v21 }
  0x33   : > { %3373 = vmatmul.mubr.msk.bf16.gmra.mrb[16].mxu1 %vm620_vm0, %v3456_v22  ;;  %3312 = vmatprep.mubr.msk.bf16.mxu0 %vm620_vm0, %v3457_v23 }
  0x34   : > { %3376 = vmatprep.mubr.msk.bf16.mxu1 %vm620_vm0, %v3458_v24 }
  0x3a   : > { %3313 = vmatmul.mubr.msk.bf16.gmra.mrb[20].mxu0 %vm620_vm0, %v3459_v25 }
  0x3b   : > { %3377 = vmatmul.mubr.msk.bf16.gmra.mrb[20].mxu1 %vm620_vm0, %v3460_v26  ;;  %3316 = vmatprep.mubr.msk.bf16.mxu0 %vm620_vm0, %v3461_v27 }
  0x3c   : > { %3380 = vmatprep.mubr.msk.bf16.mxu1 %vm620_vm0, %v3462_v28 }
  0x42   : > { %3317 = vmatmul.mubr.msk.bf16.gmra.mrb[24].mxu0 %vm620_vm0, %v3463_v29 }
  0x43   : > { %3381 = vmatmul.mubr.msk.bf16.gmra.mrb[24].mxu1 %vm620_vm0, %v3464_v30  ;;  %3320 = vmatprep.mubr.msk.bf16.mxu0 %vm620_vm0, %v3465_v31 }
  0x44   : > { %3384 = vmatprep.mubr.msk.bf16.mxu1 %vm620_vm0, %v3466_v32 }
  0x4a   : > { %3321 = vmatmul.mubr.msk.bf16.gmra.mrb[28].mxu0 %vm620_vm0, %v3467_v33 }
  0x4b   : > { %3385 = vmatmul.mubr.msk.bf16.gmra.mrb[28].mxu1 %vm620_vm0, %v3468_v34  ;;  %3324 = vmatprep.mubr.msk.bf16.mxu0 %vm620_vm0, %v3469_v35 }
  0x4c   : > { %3388 = vmatprep.mubr.msk.bf16.mxu1 %vm620_vm0, %v3470_v36 }
  0x52   : > { %3325 = vmatmul.mubr.msk.bf16.gmra.mrb[32].mxu0 %vm620_vm0, %v3471_v37 }
  0x53   : > { %3389 = vmatmul.mubr.msk.bf16.gmra.mrb[32].mxu1 %vm620_vm0, %v3472_v38  ;;  %3328 = vmatprep.mubr.msk.bf16.mxu0 %vm620_vm0, %v3473_v39 }
  0x54   : > { %3392 = vmatprep.mubr.msk.bf16.mxu1 %vm620_vm0, %v3474_v40 }
  0x5a   : > { %3329 = vmatmul.mubr.msk.bf16.gmra.mrb[36].mxu0 %vm620_vm0, %v3475_v41 }
  0x5b   : > { %3393 = vmatmul.mubr.msk.bf16.gmra.mrb[36].mxu1 %vm620_vm0, %v3476_v42  ;;  %3332 = vmatprep.mubr.msk.bf16.mxu0 %vm620_vm0, %v3477_v43 }
  0x5c   : > { %3396 = vmatprep.mubr.msk.bf16.mxu1 %vm620_vm0, %v3478_v44 }
  0x62   : > { %3333 = vmatmul.mubr.msk.bf16.gmra.mrb[40].mxu0 %vm620_vm0, %v3479_v45 }
  0x63   : > { %3397 = vmatmul.mubr.msk.bf16.gmra.mrb[40].mxu1 %vm620_vm0, %v3480_v46  ;;  %3336 = vmatprep.mubr.msk.bf16.mxu0 %vm620_vm0, %v3481_v47 }
  0x64   : > { %3400 = vmatprep.mubr.msk.bf16.mxu1 %vm620_vm0, %v3482_v48 }
  0x6a   : > { %3337 = vmatmul.mubr.msk.bf16.gmra.mrb[44].mxu0 %vm620_vm0, %v3483_v49 }
  0x6b   : > { %3401 = vmatmul.mubr.msk.bf16.gmra.mrb[44].mxu1 %vm620_vm0, %v3484_v50  ;;  %3340 = vmatprep.mubr.msk.bf16.mxu0 %vm620_vm0, %v3485_v51 }
  0x6c   : > { %3404 = vmatprep.mubr.msk.bf16.mxu1 %vm620_vm0, %v3486_v52 }
  0x72   : > { %3341 = vmatmul.mubr.msk.bf16.gmra.mrb[48].mxu0 %vm620_vm0, %v3487_v53 }
  0x73   : > { %3405 = vmatmul.mubr.msk.bf16.gmra.mrb[48].mxu1 %vm620_vm0, %v3488_v54  ;;  %3344 = vmatprep.mubr.msk.bf16.mxu0 %vm620_vm0, %v3489_v55 }
  0x74   : > { %3408 = vmatprep.mubr.msk.bf16.mxu1 %vm620_vm0, %v3490_v56 }
  0x7a   : > { %3345 = vmatmul.mubr.msk.bf16.gmra.mrb[52].mxu0 %vm620_vm0, %v3491_v57 }
  0x7b   : > { %3409 = vmatmul.mubr.msk.bf16.gmra.mrb[52].mxu1 %vm620_vm0, %v3492_v58  ;;  %3348 = vmatprep.mubr.msk.bf16.mxu0 %vm620_vm0, %v3493_v59 }
  0x7c   : > { %3412 = vmatprep.mubr.msk.bf16.mxu1 %vm620_vm0, %v3494_v60 }
  0x82   : > { %3349 = vmatmul.mubr.msk.bf16.gmra.mrb[56].mxu0 %vm620_vm0, %v3495_v61 }
  0x83   : > { %3413 = vmatmul.mubr.msk.bf16.gmra.mrb[56].mxu1 %vm620_vm0, %v3496_v62  ;;  %3352 = vmatprep.mubr.msk.bf16.mxu0 %vm620_vm0, %v3497_v63 }
  0x84   : > { %3416 = vmatprep.mubr.msk.bf16.mxu1 %vm620_vm0, %v3498_v0 }
  0x8a   : > { %3353 = vmatmul.mubr.msk.bf16.gmra.mrb[60].mxu0 %vm620_vm0, %v3499_v1 }
  0x8b   : > { %3417 = vmatmul.mubr.msk.bf16.gmra.mrb[60].mxu1 %vm620_vm0, %v3500_v2 }
  0xe5   : > { %v3294_v3 = vpop.f32.mrb[0].mxu0 }
  0xe6   : > { %v3358_v4 = vpop.f32.mrb[0].mxu1  ;;  %vm1360_vm1 = vcmp.ge.f32.partialorder %v3294_v3, 0.0  ;;  %v1488_v5 = vmul.f32 0.2, %v3294_v3  ;;  %v847_v7 = vpop.f32.mrb[1].mxu0 }
  0xe7   : > { %v1552_v6 = vmul.f32 0.2, %v3358_v4  ;;  %vm1424_vm2 = vcmp.ge.f32.partialorder %v3358_v4, 0.0  ;;  %v1103_v8 = vpop.f32.mrb[1].mxu1  ;;  %v1486_v9 = vmul.f32 0.2, %v847_v7 }
  0xe8   : > { %v3295_v10 = vpop.f32.mrb[2].mxu0  ;;  %v3359_v11 = vpop.f32.mrb[2].mxu1  ;;  %v1616_v12 = vsel %vm1360_vm1, %v3294_v3, %v1488_v5  ;;  %v1550_v13 = vmul.f32 0.2, %v1103_v8  ;;  %vm1358_vm4 = vcmp.ge.f32.partialorder %v847_v7, 0.0  ;;  %vm1422_vm6 = vcmp.ge.f32.partialorder %v1103_v8, 0.0 }
  0xe9   : > { %vm1361_vm3 = vcmp.ge.f32.partialorder %v3295_v10, 0.0  ;;  %v1489_v14 = vmul.f32 0.2, %v3295_v10  ;;  %v1680_v15 = vsel %vm1424_vm2, %v3358_v4, %v1552_v6  ;;  %vm1425_vm5 = vcmp.ge.f32.partialorder %v3359_v11, 0.0  ;;  %v850_v17 = vpop.f32.mrb[3].mxu0  ;;  %v1106_v18 = vpop.f32.mrb[3].mxu1 }
  0xea   : > { %v1553_v16 = vmul.f32 0.2, %v3359_v11  ;;  %vm1359_vm7 = vcmp.ge.f32.partialorder %v850_v17, 0.0  ;;  %v1487_v20 = vmul.f32 0.2, %v850_v17  ;;  %vm1423_vm8 = vcmp.ge.f32.partialorder %v1106_v18, 0.0 }
  0xeb   : > { %v1617_v19 = vsel %vm1361_vm3, %v3295_v10, %v1489_v14  ;;  %v1551_v23 = vmul.f32 0.2, %v1106_v18  ;;  %v1614_v24 = vsel %vm1358_vm4, %v847_v7, %v1486_v9  ;;  %v1678_v29 = vsel %vm1422_vm6, %v1103_v8, %v1550_v13 }
  0xec   : > { %v2844_v21 = vpack.c.bf16 %v1617_v19, %v1616_v12  ;;  %v1681_v22 = vsel %vm1425_vm5, %v3359_v11, %v1553_v16  ;;  %v1615_v26 = vsel %vm1359_vm7, %v850_v17, %v1487_v20 }
  0xed   : > { %v3004_v25 = vpack.c.bf16 %v1681_v22, %v1680_v15  ;;  %v3298_v27 = vpop.f32.mrb[4].mxu0  ;;  %v2839_v30 = vpack.c.bf16 %v1615_v26, %v1614_v24  ;;  %v1679_v31 = vsel %vm1423_vm8, %v1106_v18, %v1551_v23 }
  0xee   : > { %v3362_v28 = vpop.f32.mrb[4].mxu1  ;;  %3156 = vst [vmem:[%s3684_s24 + $0x8] sm:$0xff] %v2844_v21   ;;  %v1492_v32 = vmul.f32 0.2, %v3298_v27  ;;  %v863_v33 = vpop.f32.mrb[5].mxu0  ;;  %v2999_v35 = vpack.c.bf16 %v1679_v31, %v1678_v29  ;;  %vm1364_vm9 = vcmp.ge.f32.partialorder %v3298_v27, 0.0 }
  0xef   : > { %v1119_v34 = vpop.f32.mrb[5].mxu1  ;;  %3188 = vst [vmem:[%s3684_s24 + $0x108] sm:$0xff] %v3004_v25   ;;  %v1556_v36 = vmul.f32 0.2, %v3362_v28  ;;  %v3299_v37 = vpop.f32.mrb[6].mxu0  ;;  %2840 = vst [vmem:[%s3684_s24] sm:$0xff] %v2839_v30   ;;  %vm1428_vm10 = vcmp.ge.f32.partialorder %v3362_v28, 0.0 }
  0xf0   : > { %v3363_v38 = vpop.f32.mrb[6].mxu1  ;;  %v1490_v39 = vmul.f32 0.2, %v863_v33  ;;  %v1554_v40 = vmul.f32 0.2, %v1119_v34  ;;  %v866_v41 = vpop.f32.mrb[7].mxu0  ;;  %v1620_v44 = vsel %vm1364_vm9, %v3298_v27, %v1492_v32 }
  0xf1   : > { %3187 = vst [vmem:[%s3684_s24 + $0x100] sm:$0xff] %v2999_v35   ;;  %vm1362_vm11 = vcmp.ge.f32.partialorder %v863_v33, 0.0  ;;  %vm1365_vm12 = vcmp.ge.f32.partialorder %v3299_v37, 0.0  ;;  %v1493_v42 = vmul.f32 0.2, %v3299_v37  ;;  %vm1429_vm13 = vcmp.ge.f32.partialorder %v3363_v38, 0.0 }
  0xf2   : > { %v1122_v43 = vpop.f32.mrb[7].mxu1  ;;  %vm1426_vm14 = vcmp.ge.f32.partialorder %v1119_v34, 0.0  ;;  %v1557_v45 = vmul.f32 0.2, %v3363_v38  ;;  %vm1363_vm15 = vcmp.ge.f32.partialorder %v866_v41, 0.0  ;;  %v1684_v49 = vsel %vm1428_vm10, %v3362_v28, %v1556_v36 }
  0xf3   : > { %v1621_v46 = vsel %vm1365_vm12, %v3299_v37, %v1493_v42  ;;  %v1491_v47 = vmul.f32 0.2, %v866_v41  ;;  %vm1427_vm0 = vcmp.ge.f32.partialorder %v1122_v43, 0.0  ;;  %v1555_v48 = vmul.f32 0.2, %v1122_v43 }
  0xf4   : > { %v1618_v50 = vsel %vm1362_vm11, %v863_v33, %v1490_v39  ;;  %v2854_v51 = vpack.c.bf16 %v1621_v46, %v1620_v44  ;;  %v1685_v52 = vsel %vm1429_vm13, %v3363_v38, %v1557_v45  ;;  %v1682_v53 = vsel %vm1426_vm14, %v1119_v34, %v1554_v40 }
  0xf5   : > { %v3014_v54 = vpack.c.bf16 %v1685_v52, %v1684_v49  ;;  %v1619_v55 = vsel %vm1363_vm15, %v866_v41, %v1491_v47  ;;  %v1683_v56 = vsel %vm1427_vm0, %v1122_v43, %v1555_v48  ;;  %v3302_v57 = vpop.f32.mrb[8].mxu0 }
  0xf6   : > { %v3366_v58 = vpop.f32.mrb[8].mxu1  ;;  %3158 = vst [vmem:[%s3684_s24 + $0x18] sm:$0xff] %v2854_v51   ;;  %v2849_v59 = vpack.c.bf16 %v1619_v55, %v1618_v50  ;;  %v3009_v60 = vpack.c.bf16 %v1683_v56, %v1682_v53  ;;  %vm1368_vm1 = vcmp.ge.f32.partialorder %v3302_v57, 0.0  ;;  %v1496_v61 = vmul.f32 0.2, %v3302_v57  ;;  %v879_v62 = vpop.f32.mrb[9].mxu0 }
  0xf7   : > { %v1135_v63 = vpop.f32.mrb[9].mxu1  ;;  %3190 = vst [vmem:[%s3684_s24 + $0x118] sm:$0xff] %v3014_v54   ;;  %vm1432_vm2 = vcmp.ge.f32.partialorder %v3366_v58, 0.0  ;;  %v1560_v0 = vmul.f32 0.2, %v3366_v58  ;;  %v3303_v3 = vpop.f32.mrb[10].mxu0 }
  0xf8   : > { %3157 = vst [vmem:[%s3684_s24 + $0x10] sm:$0xff] %v2849_v59   ;;  %3189 = vst [vmem:[%s3684_s24 + $0x110] sm:$0xff] %v3009_v60   ;;  %v1494_v1 = vmul.f32 0.2, %v879_v62  ;;  %v1558_v2 = vmul.f32 0.2, %v1135_v63  ;;  %v1624_v5 = vsel %vm1368_vm1, %v3302_v57, %v1496_v61 }
  0xf9   : > { %v3367_v4 = vpop.f32.mrb[10].mxu1  ;;  %vm1366_vm3 = vcmp.ge.f32.partialorder %v879_v62, 0.0  ;;  %vm1369_vm4 = vcmp.ge.f32.partialorder %v3303_v3, 0.0  ;;  %v1497_v6 = vmul.f32 0.2, %v3303_v3  ;;  %v882_v7 = vpop.f32.mrb[11].mxu0  ;;  %v1688_v13 = vsel %vm1432_vm2, %v3366_v58, %v1560_v0 }
  0xfa   : > { %v1138_v8 = vpop.f32.mrb[11].mxu1  ;;  %vm1430_vm5 = vcmp.ge.f32.partialorder %v1135_v63, 0.0  ;;  %vm1433_vm6 = vcmp.ge.f32.partialorder %v3367_v4, 0.0  ;;  %v1561_v9 = vmul.f32 0.2, %v3367_v4  ;;  %vm1367_vm7 = vcmp.ge.f32.partialorder %v882_v7, 0.0 }
  0xfb   : > { %v1625_v10 = vsel %vm1369_vm4, %v3303_v3, %v1497_v6  ;;  %v1495_v11 = vmul.f32 0.2, %v882_v7  ;;  %vm1431_vm8 = vcmp.ge.f32.partialorder %v1138_v8, 0.0  ;;  %v1559_v12 = vmul.f32 0.2, %v1138_v8 }
  0xfc   : > { %v1622_v14 = vsel %vm1366_vm3, %v879_v62, %v1494_v1  ;;  %v2864_v15 = vpack.c.bf16 %v1625_v10, %v1624_v5  ;;  %v1689_v16 = vsel %vm1433_vm6, %v3367_v4, %v1561_v9  ;;  %v1686_v17 = vsel %vm1430_vm5, %v1135_v63, %v1558_v2 }
  0xfd   : > { %v3024_v18 = vpack.c.bf16 %v1689_v16, %v1688_v13  ;;  %v1623_v19 = vsel %vm1367_vm7, %v882_v7, %v1495_v11  ;;  %v1687_v20 = vsel %vm1431_vm8, %v1138_v8, %v1559_v12  ;;  %v3306_v21 = vpop.f32.mrb[12].mxu0 }
  0xfe   : > { %v3370_v22 = vpop.f32.mrb[12].mxu1  ;;  %3160 = vst [vmem:[%s3684_s24 + $0x28] sm:$0xff] %v2864_v15   ;;  %v2859_v23 = vpack.c.bf16 %v1623_v19, %v1622_v14  ;;  %v3019_v24 = vpack.c.bf16 %v1687_v20, %v1686_v17  ;;  %vm1372_vm9 = vcmp.ge.f32.partialorder %v3306_v21, 0.0  ;;  %v1500_v25 = vmul.f32 0.2, %v3306_v21  ;;  %v895_v26 = vpop.f32.mrb[13].mxu0 }
  0xff   : > { %v1151_v27 = vpop.f32.mrb[13].mxu1  ;;  %3192 = vst [vmem:[%s3684_s24 + $0x128] sm:$0xff] %v3024_v18   ;;  %vm1436_vm10 = vcmp.ge.f32.partialorder %v3370_v22, 0.0  ;;  %v1564_v28 = vmul.f32 0.2, %v3370_v22  ;;  %v3307_v31 = vpop.f32.mrb[14].mxu0 }
 0x100   : > { %3159 = vst [vmem:[%s3684_s24 + $0x20] sm:$0xff] %v2859_v23   ;;  %3191 = vst [vmem:[%s3684_s24 + $0x120] sm:$0xff] %v3019_v24   ;;  %v1498_v29 = vmul.f32 0.2, %v895_v26  ;;  %v1562_v30 = vmul.f32 0.2, %v1151_v27  ;;  %v1628_v33 = vsel %vm1372_vm9, %v3306_v21, %v1500_v25 }
 0x101   : > { %v3371_v32 = vpop.f32.mrb[14].mxu1  ;;  %vm1370_vm11 = vcmp.ge.f32.partialorder %v895_v26, 0.0  ;;  %vm1373_vm12 = vcmp.ge.f32.partialorder %v3307_v31, 0.0  ;;  %v1501_v34 = vmul.f32 0.2, %v3307_v31  ;;  %v898_v35 = vpop.f32.mrb[15].mxu0  ;;  %v1692_v41 = vsel %vm1436_vm10, %v3370_v22, %v1564_v28 }
 0x102   : > { %v1154_v36 = vpop.f32.mrb[15].mxu1  ;;  %vm1434_vm13 = vcmp.ge.f32.partialorder %v1151_v27, 0.0  ;;  %vm1437_vm14 = vcmp.ge.f32.partialorder %v3371_v32, 0.0  ;;  %v1565_v37 = vmul.f32 0.2, %v3371_v32  ;;  %vm1371_vm15 = vcmp.ge.f32.partialorder %v898_v35, 0.0 }
 0x103   : > { %v1629_v38 = vsel %vm1373_vm12, %v3307_v31, %v1501_v34  ;;  %v1499_v39 = vmul.f32 0.2, %v898_v35  ;;  %vm1435_vm0 = vcmp.ge.f32.partialorder %v1154_v36, 0.0  ;;  %v1563_v40 = vmul.f32 0.2, %v1154_v36 }
 0x104   : > { %v1626_v42 = vsel %vm1370_vm11, %v895_v26, %v1498_v29  ;;  %v2874_v43 = vpack.c.bf16 %v1629_v38, %v1628_v33  ;;  %v1693_v44 = vsel %vm1437_vm14, %v3371_v32, %v1565_v37  ;;  %v1690_v45 = vsel %vm1434_vm13, %v1151_v27, %v1562_v30 }
 0x105   : > { %v3034_v46 = vpack.c.bf16 %v1693_v44, %v1692_v41  ;;  %v1627_v47 = vsel %vm1371_vm15, %v898_v35, %v1499_v39  ;;  %v1691_v48 = vsel %vm1435_vm0, %v1154_v36, %v1563_v40  ;;  %v3310_v49 = vpop.f32.mrb[16].mxu0 }
 0x106   : > { %v3374_v50 = vpop.f32.mrb[16].mxu1  ;;  %3162 = vst [vmem:[%s3684_s24 + $0x38] sm:$0xff] %v2874_v43   ;;  %v2869_v51 = vpack.c.bf16 %v1627_v47, %v1626_v42  ;;  %v3029_v52 = vpack.c.bf16 %v1691_v48, %v1690_v45  ;;  %vm1376_vm1 = vcmp.ge.f32.partialorder %v3310_v49, 0.0  ;;  %v1504_v53 = vmul.f32 0.2, %v3310_v49  ;;  %v911_v54 = vpop.f32.mrb[17].mxu0 }
 0x107   : > { %v1167_v55 = vpop.f32.mrb[17].mxu1  ;;  %3194 = vst [vmem:[%s3684_s24 + $0x138] sm:$0xff] %v3034_v46   ;;  %vm1440_vm2 = vcmp.ge.f32.partialorder %v3374_v50, 0.0  ;;  %v1568_v56 = vmul.f32 0.2, %v3374_v50  ;;  %v3311_v59 = vpop.f32.mrb[18].mxu0 }
 0x108   : > { %3161 = vst [vmem:[%s3684_s24 + $0x30] sm:$0xff] %v2869_v51   ;;  %3193 = vst [vmem:[%s3684_s24 + $0x130] sm:$0xff] %v3029_v52   ;;  %v1502_v57 = vmul.f32 0.2, %v911_v54  ;;  %v1566_v58 = vmul.f32 0.2, %v1167_v55  ;;  %v1632_v61 = vsel %vm1376_vm1, %v3310_v49, %v1504_v53 }
 0x109   : > { %v3375_v60 = vpop.f32.mrb[18].mxu1  ;;  %vm1374_vm3 = vcmp.ge.f32.partialorder %v911_v54, 0.0  ;;  %vm1377_vm4 = vcmp.ge.f32.partialorder %v3311_v59, 0.0  ;;  %v1505_v62 = vmul.f32 0.2, %v3311_v59  ;;  %v914_v63 = vpop.f32.mrb[19].mxu0  ;;  %v1696_v5 = vsel %vm1440_vm2, %v3374_v50, %v1568_v56 }
 0x10a   : > { %v1170_v0 = vpop.f32.mrb[19].mxu1  ;;  %vm1438_vm5 = vcmp.ge.f32.partialorder %v1167_v55, 0.0  ;;  %vm1441_vm6 = vcmp.ge.f32.partialorder %v3375_v60, 0.0  ;;  %v1569_v1 = vmul.f32 0.2, %v3375_v60  ;;  %vm1375_vm7 = vcmp.ge.f32.partialorder %v914_v63, 0.0 }
 0x10b   : > { %v1633_v2 = vsel %vm1377_vm4, %v3311_v59, %v1505_v62  ;;  %v1503_v3 = vmul.f32 0.2, %v914_v63  ;;  %vm1439_vm8 = vcmp.ge.f32.partialorder %v1170_v0, 0.0  ;;  %v1567_v4 = vmul.f32 0.2, %v1170_v0 }
 0x10c   : > { %v1630_v6 = vsel %vm1374_vm3, %v911_v54, %v1502_v57  ;;  %v2884_v7 = vpack.c.bf16 %v1633_v2, %v1632_v61  ;;  %v1697_v8 = vsel %vm1441_vm6, %v3375_v60, %v1569_v1  ;;  %v1694_v9 = vsel %vm1438_vm5, %v1167_v55, %v1566_v58 }
 0x10d   : > { %v3044_v10 = vpack.c.bf16 %v1697_v8, %v1696_v5  ;;  %v1631_v11 = vsel %vm1375_vm7, %v914_v63, %v1503_v3  ;;  %v1695_v12 = vsel %vm1439_vm8, %v1170_v0, %v1567_v4  ;;  %v3314_v13 = vpop.f32.mrb[20].mxu0 }
 0x10e   : > { %v3378_v14 = vpop.f32.mrb[20].mxu1  ;;  %3164 = vst [vmem:[%s3684_s24 + $0x48] sm:$0xff] %v2884_v7   ;;  %v2879_v15 = vpack.c.bf16 %v1631_v11, %v1630_v6  ;;  %v3039_v16 = vpack.c.bf16 %v1695_v12, %v1694_v9  ;;  %vm1380_vm9 = vcmp.ge.f32.partialorder %v3314_v13, 0.0  ;;  %v1508_v17 = vmul.f32 0.2, %v3314_v13  ;;  %v927_v18 = vpop.f32.mrb[21].mxu0 }
 0x10f   : > { %v1183_v19 = vpop.f32.mrb[21].mxu1  ;;  %3196 = vst [vmem:[%s3684_s24 + $0x148] sm:$0xff] %v3044_v10   ;;  %vm1444_vm10 = vcmp.ge.f32.partialorder %v3378_v14, 0.0  ;;  %v1572_v20 = vmul.f32 0.2, %v3378_v14  ;;  %v3315_v23 = vpop.f32.mrb[22].mxu0 }
 0x110   : > { %3163 = vst [vmem:[%s3684_s24 + $0x40] sm:$0xff] %v2879_v15   ;;  %3195 = vst [vmem:[%s3684_s24 + $0x140] sm:$0xff] %v3039_v16   ;;  %v1506_v21 = vmul.f32 0.2, %v927_v18  ;;  %v1570_v22 = vmul.f32 0.2, %v1183_v19  ;;  %v1636_v25 = vsel %vm1380_vm9, %v3314_v13, %v1508_v17 }
 0x111   : > { %v3379_v24 = vpop.f32.mrb[22].mxu1  ;;  %vm1378_vm11 = vcmp.ge.f32.partialorder %v927_v18, 0.0  ;;  %vm1381_vm12 = vcmp.ge.f32.partialorder %v3315_v23, 0.0  ;;  %v1509_v26 = vmul.f32 0.2, %v3315_v23  ;;  %v930_v27 = vpop.f32.mrb[23].mxu0  ;;  %v1700_v33 = vsel %vm1444_vm10, %v3378_v14, %v1572_v20 }
 0x112   : > { %v1186_v28 = vpop.f32.mrb[23].mxu1  ;;  %vm1442_vm13 = vcmp.ge.f32.partialorder %v1183_v19, 0.0  ;;  %vm1445_vm14 = vcmp.ge.f32.partialorder %v3379_v24, 0.0  ;;  %v1573_v29 = vmul.f32 0.2, %v3379_v24  ;;  %vm1379_vm15 = vcmp.ge.f32.partialorder %v930_v27, 0.0 }
 0x113   : > { %v1637_v30 = vsel %vm1381_vm12, %v3315_v23, %v1509_v26  ;;  %v1507_v31 = vmul.f32 0.2, %v930_v27  ;;  %vm1443_vm0 = vcmp.ge.f32.partialorder %v1186_v28, 0.0  ;;  %v1571_v32 = vmul.f32 0.2, %v1186_v28 }
 0x114   : > { %v1634_v34 = vsel %vm1378_vm11, %v927_v18, %v1506_v21  ;;  %v2894_v35 = vpack.c.bf16 %v1637_v30, %v1636_v25  ;;  %v1701_v36 = vsel %vm1445_vm14, %v3379_v24, %v1573_v29  ;;  %v1698_v37 = vsel %vm1442_vm13, %v1183_v19, %v1570_v22 }
 0x115   : > { %v3054_v38 = vpack.c.bf16 %v1701_v36, %v1700_v33  ;;  %v1635_v39 = vsel %vm1379_vm15, %v930_v27, %v1507_v31  ;;  %v1699_v40 = vsel %vm1443_vm0, %v1186_v28, %v1571_v32  ;;  %v3318_v41 = vpop.f32.mrb[24].mxu0 }
 0x116   : > { %v3382_v42 = vpop.f32.mrb[24].mxu1  ;;  %3166 = vst [vmem:[%s3684_s24 + $0x58] sm:$0xff] %v2894_v35   ;;  %v2889_v43 = vpack.c.bf16 %v1635_v39, %v1634_v34  ;;  %v3049_v44 = vpack.c.bf16 %v1699_v40, %v1698_v37  ;;  %vm1384_vm1 = vcmp.ge.f32.partialorder %v3318_v41, 0.0  ;;  %v1512_v45 = vmul.f32 0.2, %v3318_v41  ;;  %v943_v46 = vpop.f32.mrb[25].mxu0 }
 0x117   : > { %v1199_v47 = vpop.f32.mrb[25].mxu1  ;;  %3198 = vst [vmem:[%s3684_s24 + $0x158] sm:$0xff] %v3054_v38   ;;  %vm1448_vm2 = vcmp.ge.f32.partialorder %v3382_v42, 0.0  ;;  %v1576_v48 = vmul.f32 0.2, %v3382_v42  ;;  %v3319_v51 = vpop.f32.mrb[26].mxu0 }
 0x118   : > { %3165 = vst [vmem:[%s3684_s24 + $0x50] sm:$0xff] %v2889_v43   ;;  %3197 = vst [vmem:[%s3684_s24 + $0x150] sm:$0xff] %v3049_v44   ;;  %v1510_v49 = vmul.f32 0.2, %v943_v46  ;;  %v1574_v50 = vmul.f32 0.2, %v1199_v47  ;;  %v1640_v53 = vsel %vm1384_vm1, %v3318_v41, %v1512_v45 }
 0x119   : > { %v3383_v52 = vpop.f32.mrb[26].mxu1  ;;  %vm1382_vm3 = vcmp.ge.f32.partialorder %v943_v46, 0.0  ;;  %vm1385_vm4 = vcmp.ge.f32.partialorder %v3319_v51, 0.0  ;;  %v1513_v54 = vmul.f32 0.2, %v3319_v51  ;;  %v946_v55 = vpop.f32.mrb[27].mxu0  ;;  %v1704_v61 = vsel %vm1448_vm2, %v3382_v42, %v1576_v48 }
 0x11a   : > { %v1202_v56 = vpop.f32.mrb[27].mxu1  ;;  %vm1446_vm5 = vcmp.ge.f32.partialorder %v1199_v47, 0.0  ;;  %vm1449_vm6 = vcmp.ge.f32.partialorder %v3383_v52, 0.0  ;;  %v1577_v57 = vmul.f32 0.2, %v3383_v52  ;;  %vm1383_vm7 = vcmp.ge.f32.partialorder %v946_v55, 0.0 }
 0x11b   : > { %v1641_v58 = vsel %vm1385_vm4, %v3319_v51, %v1513_v54  ;;  %v1511_v59 = vmul.f32 0.2, %v946_v55  ;;  %vm1447_vm8 = vcmp.ge.f32.partialorder %v1202_v56, 0.0  ;;  %v1575_v60 = vmul.f32 0.2, %v1202_v56 }
 0x11c   : > { %v1638_v62 = vsel %vm1382_vm3, %v943_v46, %v1510_v49  ;;  %v2904_v63 = vpack.c.bf16 %v1641_v58, %v1640_v53  ;;  %v1705_v0 = vsel %vm1449_vm6, %v3383_v52, %v1577_v57  ;;  %v1702_v1 = vsel %vm1446_vm5, %v1199_v47, %v1574_v50 }
 0x11d   : > { %v3064_v2 = vpack.c.bf16 %v1705_v0, %v1704_v61  ;;  %v1639_v3 = vsel %vm1383_vm7, %v946_v55, %v1511_v59  ;;  %v1703_v4 = vsel %vm1447_vm8, %v1202_v56, %v1575_v60  ;;  %v3322_v5 = vpop.f32.mrb[28].mxu0 }
 0x11e   : > { %v3386_v6 = vpop.f32.mrb[28].mxu1  ;;  %3168 = vst [vmem:[%s3684_s24 + $0x68] sm:$0xff] %v2904_v63   ;;  %v2899_v7 = vpack.c.bf16 %v1639_v3, %v1638_v62  ;;  %v3059_v8 = vpack.c.bf16 %v1703_v4, %v1702_v1  ;;  %vm1388_vm9 = vcmp.ge.f32.partialorder %v3322_v5, 0.0  ;;  %v1516_v9 = vmul.f32 0.2, %v3322_v5  ;;  %v959_v10 = vpop.f32.mrb[29].mxu0 }
 0x11f   : > { %v1215_v11 = vpop.f32.mrb[29].mxu1  ;;  %3200 = vst [vmem:[%s3684_s24 + $0x168] sm:$0xff] %v3064_v2   ;;  %vm1452_vm10 = vcmp.ge.f32.partialorder %v3386_v6, 0.0  ;;  %v1580_v12 = vmul.f32 0.2, %v3386_v6  ;;  %v3323_v15 = vpop.f32.mrb[30].mxu0 }
 0x120   : > { %3167 = vst [vmem:[%s3684_s24 + $0x60] sm:$0xff] %v2899_v7   ;;  %3199 = vst [vmem:[%s3684_s24 + $0x160] sm:$0xff] %v3059_v8   ;;  %v1514_v13 = vmul.f32 0.2, %v959_v10  ;;  %v1578_v14 = vmul.f32 0.2, %v1215_v11  ;;  %v1644_v17 = vsel %vm1388_vm9, %v3322_v5, %v1516_v9 }
 0x121   : > { %v3387_v16 = vpop.f32.mrb[30].mxu1  ;;  %vm1386_vm11 = vcmp.ge.f32.partialorder %v959_v10, 0.0  ;;  %vm1389_vm12 = vcmp.ge.f32.partialorder %v3323_v15, 0.0  ;;  %v1517_v18 = vmul.f32 0.2, %v3323_v15  ;;  %v962_v19 = vpop.f32.mrb[31].mxu0  ;;  %v1708_v25 = vsel %vm1452_vm10, %v3386_v6, %v1580_v12 }
 0x122   : > { %v1218_v20 = vpop.f32.mrb[31].mxu1  ;;  %vm1450_vm13 = vcmp.ge.f32.partialorder %v1215_v11, 0.0  ;;  %vm1453_vm14 = vcmp.ge.f32.partialorder %v3387_v16, 0.0  ;;  %v1581_v21 = vmul.f32 0.2, %v3387_v16  ;;  %vm1387_vm15 = vcmp.ge.f32.partialorder %v962_v19, 0.0 }
 0x123   : > { %v1645_v22 = vsel %vm1389_vm12, %v3323_v15, %v1517_v18  ;;  %v1515_v23 = vmul.f32 0.2, %v962_v19  ;;  %vm1451_vm0 = vcmp.ge.f32.partialorder %v1218_v20, 0.0  ;;  %v1579_v24 = vmul.f32 0.2, %v1218_v20 }
 0x124   : > { %v1642_v26 = vsel %vm1386_vm11, %v959_v10, %v1514_v13  ;;  %v2914_v27 = vpack.c.bf16 %v1645_v22, %v1644_v17  ;;  %v1709_v28 = vsel %vm1453_vm14, %v3387_v16, %v1581_v21  ;;  %v1706_v29 = vsel %vm1450_vm13, %v1215_v11, %v1578_v14 }
 0x125   : > { %v3074_v30 = vpack.c.bf16 %v1709_v28, %v1708_v25  ;;  %v1643_v31 = vsel %vm1387_vm15, %v962_v19, %v1515_v23  ;;  %v1707_v32 = vsel %vm1451_vm0, %v1218_v20, %v1579_v24  ;;  %v3326_v33 = vpop.f32.mrb[32].mxu0 }
 0x126   : > { %v3390_v34 = vpop.f32.mrb[32].mxu1  ;;  %3170 = vst [vmem:[%s3684_s24 + $0x78] sm:$0xff] %v2914_v27   ;;  %v2909_v35 = vpack.c.bf16 %v1643_v31, %v1642_v26  ;;  %v3069_v36 = vpack.c.bf16 %v1707_v32, %v1706_v29  ;;  %vm1392_vm1 = vcmp.ge.f32.partialorder %v3326_v33, 0.0  ;;  %v1520_v37 = vmul.f32 0.2, %v3326_v33  ;;  %v975_v38 = vpop.f32.mrb[33].mxu0 }
 0x127   : > { %v1231_v39 = vpop.f32.mrb[33].mxu1  ;;  %3202 = vst [vmem:[%s3684_s24 + $0x178] sm:$0xff] %v3074_v30   ;;  %vm1456_vm2 = vcmp.ge.f32.partialorder %v3390_v34, 0.0  ;;  %v1584_v40 = vmul.f32 0.2, %v3390_v34  ;;  %v3327_v43 = vpop.f32.mrb[34].mxu0 }
 0x128   : > { %3169 = vst [vmem:[%s3684_s24 + $0x70] sm:$0xff] %v2909_v35   ;;  %3201 = vst [vmem:[%s3684_s24 + $0x170] sm:$0xff] %v3069_v36   ;;  %v1518_v41 = vmul.f32 0.2, %v975_v38  ;;  %v1582_v42 = vmul.f32 0.2, %v1231_v39  ;;  %v1648_v45 = vsel %vm1392_vm1, %v3326_v33, %v1520_v37 }
 0x129   : > { %v3391_v44 = vpop.f32.mrb[34].mxu1  ;;  %vm1390_vm3 = vcmp.ge.f32.partialorder %v975_v38, 0.0  ;;  %vm1393_vm4 = vcmp.ge.f32.partialorder %v3327_v43, 0.0  ;;  %v1521_v46 = vmul.f32 0.2, %v3327_v43  ;;  %v978_v47 = vpop.f32.mrb[35].mxu0  ;;  %v1712_v53 = vsel %vm1456_vm2, %v3390_v34, %v1584_v40 }
 0x12a   : > { %v1234_v48 = vpop.f32.mrb[35].mxu1  ;;  %vm1454_vm5 = vcmp.ge.f32.partialorder %v1231_v39, 0.0  ;;  %vm1457_vm6 = vcmp.ge.f32.partialorder %v3391_v44, 0.0  ;;  %v1585_v49 = vmul.f32 0.2, %v3391_v44  ;;  %vm1391_vm7 = vcmp.ge.f32.partialorder %v978_v47, 0.0 }
 0x12b   : > { %v1649_v50 = vsel %vm1393_vm4, %v3327_v43, %v1521_v46  ;;  %v1519_v51 = vmul.f32 0.2, %v978_v47  ;;  %vm1455_vm8 = vcmp.ge.f32.partialorder %v1234_v48, 0.0  ;;  %v1583_v52 = vmul.f32 0.2, %v1234_v48 }
 0x12c   : > { %v1646_v54 = vsel %vm1390_vm3, %v975_v38, %v1518_v41  ;;  %v2924_v55 = vpack.c.bf16 %v1649_v50, %v1648_v45  ;;  %v1713_v56 = vsel %vm1457_vm6, %v3391_v44, %v1585_v49  ;;  %v1710_v57 = vsel %vm1454_vm5, %v1231_v39, %v1582_v42 }
 0x12d   : > { %v3084_v58 = vpack.c.bf16 %v1713_v56, %v1712_v53  ;;  %v1647_v59 = vsel %vm1391_vm7, %v978_v47, %v1519_v51  ;;  %v1711_v60 = vsel %vm1455_vm8, %v1234_v48, %v1583_v52  ;;  %v3330_v61 = vpop.f32.mrb[36].mxu0 }
 0x12e   : > { %v3394_v62 = vpop.f32.mrb[36].mxu1  ;;  %3172 = vst [vmem:[%s3684_s24 + $0x88] sm:$0xff] %v2924_v55   ;;  %v2919_v63 = vpack.c.bf16 %v1647_v59, %v1646_v54  ;;  %v3079_v0 = vpack.c.bf16 %v1711_v60, %v1710_v57  ;;  %vm1396_vm9 = vcmp.ge.f32.partialorder %v3330_v61, 0.0  ;;  %v1524_v1 = vmul.f32 0.2, %v3330_v61  ;;  %v991_v2 = vpop.f32.mrb[37].mxu0 }
 0x12f   : > { %v1247_v3 = vpop.f32.mrb[37].mxu1  ;;  %3204 = vst [vmem:[%s3684_s24 + $0x188] sm:$0xff] %v3084_v58   ;;  %vm1460_vm10 = vcmp.ge.f32.partialorder %v3394_v62, 0.0  ;;  %v1588_v4 = vmul.f32 0.2, %v3394_v62  ;;  %v3331_v7 = vpop.f32.mrb[38].mxu0 }
 0x130   : > { %3171 = vst [vmem:[%s3684_s24 + $0x80] sm:$0xff] %v2919_v63   ;;  %3203 = vst [vmem:[%s3684_s24 + $0x180] sm:$0xff] %v3079_v0   ;;  %v1522_v5 = vmul.f32 0.2, %v991_v2  ;;  %v1586_v6 = vmul.f32 0.2, %v1247_v3  ;;  %v1652_v9 = vsel %vm1396_vm9, %v3330_v61, %v1524_v1 }
 0x131   : > { %v3395_v8 = vpop.f32.mrb[38].mxu1  ;;  %vm1394_vm11 = vcmp.ge.f32.partialorder %v991_v2, 0.0  ;;  %vm1397_vm12 = vcmp.ge.f32.partialorder %v3331_v7, 0.0  ;;  %v1525_v10 = vmul.f32 0.2, %v3331_v7  ;;  %v994_v11 = vpop.f32.mrb[39].mxu0  ;;  %v1716_v17 = vsel %vm1460_vm10, %v3394_v62, %v1588_v4 }
 0x132   : > { %v1250_v12 = vpop.f32.mrb[39].mxu1  ;;  %vm1458_vm13 = vcmp.ge.f32.partialorder %v1247_v3, 0.0  ;;  %vm1461_vm14 = vcmp.ge.f32.partialorder %v3395_v8, 0.0  ;;  %v1589_v13 = vmul.f32 0.2, %v3395_v8  ;;  %vm1395_vm15 = vcmp.ge.f32.partialorder %v994_v11, 0.0 }
 0x133   : > { %v1653_v14 = vsel %vm1397_vm12, %v3331_v7, %v1525_v10  ;;  %v1523_v15 = vmul.f32 0.2, %v994_v11  ;;  %vm1459_vm0 = vcmp.ge.f32.partialorder %v1250_v12, 0.0  ;;  %v1587_v16 = vmul.f32 0.2, %v1250_v12 }
 0x134   : > { %v1650_v18 = vsel %vm1394_vm11, %v991_v2, %v1522_v5  ;;  %v2934_v19 = vpack.c.bf16 %v1653_v14, %v1652_v9  ;;  %v1717_v20 = vsel %vm1461_vm14, %v3395_v8, %v1589_v13  ;;  %v1714_v21 = vsel %vm1458_vm13, %v1247_v3, %v1586_v6 }
 0x135   : > { %v3094_v22 = vpack.c.bf16 %v1717_v20, %v1716_v17  ;;  %v1651_v23 = vsel %vm1395_vm15, %v994_v11, %v1523_v15  ;;  %v1715_v24 = vsel %vm1459_vm0, %v1250_v12, %v1587_v16  ;;  %v3334_v25 = vpop.f32.mrb[40].mxu0 }
 0x136   : > { %v3398_v26 = vpop.f32.mrb[40].mxu1  ;;  %3174 = vst [vmem:[%s3684_s24 + $0x98] sm:$0xff] %v2934_v19   ;;  %v2929_v27 = vpack.c.bf16 %v1651_v23, %v1650_v18  ;;  %v3089_v28 = vpack.c.bf16 %v1715_v24, %v1714_v21  ;;  %vm1400_vm1 = vcmp.ge.f32.partialorder %v3334_v25, 0.0  ;;  %v1528_v29 = vmul.f32 0.2, %v3334_v25  ;;  %v1007_v30 = vpop.f32.mrb[41].mxu0 }
 0x137   : > { %v1263_v31 = vpop.f32.mrb[41].mxu1  ;;  %3206 = vst [vmem:[%s3684_s24 + $0x198] sm:$0xff] %v3094_v22   ;;  %vm1464_vm2 = vcmp.ge.f32.partialorder %v3398_v26, 0.0  ;;  %v1592_v32 = vmul.f32 0.2, %v3398_v26  ;;  %v3335_v35 = vpop.f32.mrb[42].mxu0 }
 0x138   : > { %3173 = vst [vmem:[%s3684_s24 + $0x90] sm:$0xff] %v2929_v27   ;;  %3205 = vst [vmem:[%s3684_s24 + $0x190] sm:$0xff] %v3089_v28   ;;  %v1526_v33 = vmul.f32 0.2, %v1007_v30  ;;  %v1590_v34 = vmul.f32 0.2, %v1263_v31  ;;  %v1656_v37 = vsel %vm1400_vm1, %v3334_v25, %v1528_v29 }
 0x139   : > { %v3399_v36 = vpop.f32.mrb[42].mxu1  ;;  %vm1398_vm3 = vcmp.ge.f32.partialorder %v1007_v30, 0.0  ;;  %vm1401_vm4 = vcmp.ge.f32.partialorder %v3335_v35, 0.0  ;;  %v1529_v38 = vmul.f32 0.2, %v3335_v35  ;;  %v1010_v39 = vpop.f32.mrb[43].mxu0  ;;  %v1720_v45 = vsel %vm1464_vm2, %v3398_v26, %v1592_v32 }
 0x13a   : > { %v1266_v40 = vpop.f32.mrb[43].mxu1  ;;  %vm1462_vm5 = vcmp.ge.f32.partialorder %v1263_v31, 0.0  ;;  %vm1465_vm6 = vcmp.ge.f32.partialorder %v3399_v36, 0.0  ;;  %v1593_v41 = vmul.f32 0.2, %v3399_v36  ;;  %vm1399_vm7 = vcmp.ge.f32.partialorder %v1010_v39, 0.0 }
 0x13b   : > { %v1657_v42 = vsel %vm1401_vm4, %v3335_v35, %v1529_v38  ;;  %v1527_v43 = vmul.f32 0.2, %v1010_v39  ;;  %vm1463_vm8 = vcmp.ge.f32.partialorder %v1266_v40, 0.0  ;;  %v1591_v44 = vmul.f32 0.2, %v1266_v40 }
 0x13c   : > { %v1654_v46 = vsel %vm1398_vm3, %v1007_v30, %v1526_v33  ;;  %v2944_v47 = vpack.c.bf16 %v1657_v42, %v1656_v37  ;;  %v1721_v48 = vsel %vm1465_vm6, %v3399_v36, %v1593_v41  ;;  %v1718_v49 = vsel %vm1462_vm5, %v1263_v31, %v1590_v34 }
 0x13d   : > { %v3104_v50 = vpack.c.bf16 %v1721_v48, %v1720_v45  ;;  %v1655_v51 = vsel %vm1399_vm7, %v1010_v39, %v1527_v43  ;;  %v1719_v52 = vsel %vm1463_vm8, %v1266_v40, %v1591_v44  ;;  %v3338_v53 = vpop.f32.mrb[44].mxu0 }
 0x13e   : > { %v3402_v54 = vpop.f32.mrb[44].mxu1  ;;  %3176 = vst [vmem:[%s3684_s24 + $0xa8] sm:$0xff] %v2944_v47   ;;  %v2939_v55 = vpack.c.bf16 %v1655_v51, %v1654_v46  ;;  %v3099_v56 = vpack.c.bf16 %v1719_v52, %v1718_v49  ;;  %vm1404_vm9 = vcmp.ge.f32.partialorder %v3338_v53, 0.0  ;;  %v1532_v57 = vmul.f32 0.2, %v3338_v53  ;;  %v1023_v58 = vpop.f32.mrb[45].mxu0 }
 0x13f   : > { %v1279_v59 = vpop.f32.mrb[45].mxu1  ;;  %3208 = vst [vmem:[%s3684_s24 + $0x1a8] sm:$0xff] %v3104_v50   ;;  %vm1468_vm10 = vcmp.ge.f32.partialorder %v3402_v54, 0.0  ;;  %v1596_v60 = vmul.f32 0.2, %v3402_v54  ;;  %v3339_v63 = vpop.f32.mrb[46].mxu0 }
 0x140   : > { %3175 = vst [vmem:[%s3684_s24 + $0xa0] sm:$0xff] %v2939_v55   ;;  %3207 = vst [vmem:[%s3684_s24 + $0x1a0] sm:$0xff] %v3099_v56   ;;  %v1530_v61 = vmul.f32 0.2, %v1023_v58  ;;  %v1594_v62 = vmul.f32 0.2, %v1279_v59  ;;  %v1660_v1 = vsel %vm1404_vm9, %v3338_v53, %v1532_v57 }
 0x141   : > { %v3403_v0 = vpop.f32.mrb[46].mxu1  ;;  %vm1402_vm11 = vcmp.ge.f32.partialorder %v1023_v58, 0.0  ;;  %vm1405_vm12 = vcmp.ge.f32.partialorder %v3339_v63, 0.0  ;;  %v1533_v2 = vmul.f32 0.2, %v3339_v63  ;;  %v1026_v3 = vpop.f32.mrb[47].mxu0  ;;  %v1724_v9 = vsel %vm1468_vm10, %v3402_v54, %v1596_v60 }
 0x142   : > { %v1282_v4 = vpop.f32.mrb[47].mxu1  ;;  %vm1466_vm13 = vcmp.ge.f32.partialorder %v1279_v59, 0.0  ;;  %vm1469_vm14 = vcmp.ge.f32.partialorder %v3403_v0, 0.0  ;;  %v1597_v5 = vmul.f32 0.2, %v3403_v0  ;;  %vm1403_vm15 = vcmp.ge.f32.partialorder %v1026_v3, 0.0 }
 0x143   : > { %v1661_v6 = vsel %vm1405_vm12, %v3339_v63, %v1533_v2  ;;  %v1531_v7 = vmul.f32 0.2, %v1026_v3  ;;  %vm1467_vm0 = vcmp.ge.f32.partialorder %v1282_v4, 0.0  ;;  %v1595_v8 = vmul.f32 0.2, %v1282_v4 }
 0x144   : > { %v1658_v10 = vsel %vm1402_vm11, %v1023_v58, %v1530_v61  ;;  %v2954_v11 = vpack.c.bf16 %v1661_v6, %v1660_v1  ;;  %v1725_v12 = vsel %vm1469_vm14, %v3403_v0, %v1597_v5  ;;  %v1722_v13 = vsel %vm1466_vm13, %v1279_v59, %v1594_v62 }
 0x145   : > { %v3114_v14 = vpack.c.bf16 %v1725_v12, %v1724_v9  ;;  %v1659_v15 = vsel %vm1403_vm15, %v1026_v3, %v1531_v7  ;;  %v1723_v16 = vsel %vm1467_vm0, %v1282_v4, %v1595_v8  ;;  %v3342_v17 = vpop.f32.mrb[48].mxu0 }
 0x146   : > { %v3406_v18 = vpop.f32.mrb[48].mxu1  ;;  %3178 = vst [vmem:[%s3684_s24 + $0xb8] sm:$0xff] %v2954_v11   ;;  %v2949_v19 = vpack.c.bf16 %v1659_v15, %v1658_v10  ;;  %v3109_v20 = vpack.c.bf16 %v1723_v16, %v1722_v13  ;;  %vm1408_vm1 = vcmp.ge.f32.partialorder %v3342_v17, 0.0  ;;  %v1536_v21 = vmul.f32 0.2, %v3342_v17  ;;  %v1039_v22 = vpop.f32.mrb[49].mxu0 }
 0x147   : > { %v1295_v23 = vpop.f32.mrb[49].mxu1  ;;  %3210 = vst [vmem:[%s3684_s24 + $0x1b8] sm:$0xff] %v3114_v14   ;;  %vm1472_vm2 = vcmp.ge.f32.partialorder %v3406_v18, 0.0  ;;  %v1600_v24 = vmul.f32 0.2, %v3406_v18  ;;  %v3343_v27 = vpop.f32.mrb[50].mxu0 }
 0x148   : > { %3177 = vst [vmem:[%s3684_s24 + $0xb0] sm:$0xff] %v2949_v19   ;;  %3209 = vst [vmem:[%s3684_s24 + $0x1b0] sm:$0xff] %v3109_v20   ;;  %v1534_v25 = vmul.f32 0.2, %v1039_v22  ;;  %v1598_v26 = vmul.f32 0.2, %v1295_v23  ;;  %v1664_v29 = vsel %vm1408_vm1, %v3342_v17, %v1536_v21 }
 0x149   : > { %v3407_v28 = vpop.f32.mrb[50].mxu1  ;;  %vm1406_vm3 = vcmp.ge.f32.partialorder %v1039_v22, 0.0  ;;  %vm1409_vm4 = vcmp.ge.f32.partialorder %v3343_v27, 0.0  ;;  %v1537_v30 = vmul.f32 0.2, %v3343_v27  ;;  %v1042_v31 = vpop.f32.mrb[51].mxu0  ;;  %v1728_v37 = vsel %vm1472_vm2, %v3406_v18, %v1600_v24 }
 0x14a   : > { %v1298_v32 = vpop.f32.mrb[51].mxu1  ;;  %vm1470_vm5 = vcmp.ge.f32.partialorder %v1295_v23, 0.0  ;;  %vm1473_vm6 = vcmp.ge.f32.partialorder %v3407_v28, 0.0  ;;  %v1601_v33 = vmul.f32 0.2, %v3407_v28  ;;  %vm1407_vm7 = vcmp.ge.f32.partialorder %v1042_v31, 0.0 }
 0x14b   : > { %v1665_v34 = vsel %vm1409_vm4, %v3343_v27, %v1537_v30  ;;  %v1535_v35 = vmul.f32 0.2, %v1042_v31  ;;  %vm1471_vm8 = vcmp.ge.f32.partialorder %v1298_v32, 0.0  ;;  %v1599_v36 = vmul.f32 0.2, %v1298_v32 }
 0x14c   : > { %v1662_v38 = vsel %vm1406_vm3, %v1039_v22, %v1534_v25  ;;  %v2964_v39 = vpack.c.bf16 %v1665_v34, %v1664_v29  ;;  %v1729_v40 = vsel %vm1473_vm6, %v3407_v28, %v1601_v33  ;;  %v1726_v41 = vsel %vm1470_vm5, %v1295_v23, %v1598_v26 }
 0x14d   : > { %v3124_v42 = vpack.c.bf16 %v1729_v40, %v1728_v37  ;;  %v1663_v43 = vsel %vm1407_vm7, %v1042_v31, %v1535_v35  ;;  %v1727_v44 = vsel %vm1471_vm8, %v1298_v32, %v1599_v36  ;;  %v3346_v45 = vpop.f32.mrb[52].mxu0 }
 0x14e   : > { %v3410_v46 = vpop.f32.mrb[52].mxu1  ;;  %3180 = vst [vmem:[%s3684_s24 + $0xc8] sm:$0xff] %v2964_v39   ;;  %v2959_v47 = vpack.c.bf16 %v1663_v43, %v1662_v38  ;;  %v3119_v48 = vpack.c.bf16 %v1727_v44, %v1726_v41  ;;  %vm1412_vm9 = vcmp.ge.f32.partialorder %v3346_v45, 0.0  ;;  %v1540_v49 = vmul.f32 0.2, %v3346_v45  ;;  %v1055_v50 = vpop.f32.mrb[53].mxu0 }
 0x14f   : > { %v1311_v51 = vpop.f32.mrb[53].mxu1  ;;  %3212 = vst [vmem:[%s3684_s24 + $0x1c8] sm:$0xff] %v3124_v42   ;;  %vm1476_vm10 = vcmp.ge.f32.partialorder %v3410_v46, 0.0  ;;  %v1604_v52 = vmul.f32 0.2, %v3410_v46  ;;  %v3347_v55 = vpop.f32.mrb[54].mxu0 }
 0x150   : > { %3179 = vst [vmem:[%s3684_s24 + $0xc0] sm:$0xff] %v2959_v47   ;;  %3211 = vst [vmem:[%s3684_s24 + $0x1c0] sm:$0xff] %v3119_v48   ;;  %v1538_v53 = vmul.f32 0.2, %v1055_v50  ;;  %v1602_v54 = vmul.f32 0.2, %v1311_v51  ;;  %v1668_v57 = vsel %vm1412_vm9, %v3346_v45, %v1540_v49 }
 0x151   : > { %v3411_v56 = vpop.f32.mrb[54].mxu1  ;;  %vm1410_vm11 = vcmp.ge.f32.partialorder %v1055_v50, 0.0  ;;  %vm1413_vm12 = vcmp.ge.f32.partialorder %v3347_v55, 0.0  ;;  %v1541_v58 = vmul.f32 0.2, %v3347_v55  ;;  %v1058_v59 = vpop.f32.mrb[55].mxu0  ;;  %v1732_v1 = vsel %vm1476_vm10, %v3410_v46, %v1604_v52 }
 0x152   : > { %v1314_v60 = vpop.f32.mrb[55].mxu1  ;;  %vm1474_vm13 = vcmp.ge.f32.partialorder %v1311_v51, 0.0  ;;  %vm1477_vm14 = vcmp.ge.f32.partialorder %v3411_v56, 0.0  ;;  %v1605_v61 = vmul.f32 0.2, %v3411_v56  ;;  %vm1411_vm15 = vcmp.ge.f32.partialorder %v1058_v59, 0.0 }
 0x153   : > { %v1669_v62 = vsel %vm1413_vm12, %v3347_v55, %v1541_v58  ;;  %v1539_v63 = vmul.f32 0.2, %v1058_v59  ;;  %vm1475_vm0 = vcmp.ge.f32.partialorder %v1314_v60, 0.0  ;;  %v1603_v0 = vmul.f32 0.2, %v1314_v60 }
 0x154   : > { %v1666_v2 = vsel %vm1410_vm11, %v1055_v50, %v1538_v53  ;;  %v2974_v3 = vpack.c.bf16 %v1669_v62, %v1668_v57  ;;  %v1733_v4 = vsel %vm1477_vm14, %v3411_v56, %v1605_v61  ;;  %v1730_v5 = vsel %vm1474_vm13, %v1311_v51, %v1602_v54 }
 0x155   : > { %v3134_v6 = vpack.c.bf16 %v1733_v4, %v1732_v1  ;;  %v1667_v7 = vsel %vm1411_vm15, %v1058_v59, %v1539_v63  ;;  %v1731_v8 = vsel %vm1475_vm0, %v1314_v60, %v1603_v0  ;;  %v3350_v9 = vpop.f32.mrb[56].mxu0 }
 0x156   : > { %v3414_v10 = vpop.f32.mrb[56].mxu1  ;;  %3182 = vst [vmem:[%s3684_s24 + $0xd8] sm:$0xff] %v2974_v3   ;;  %v2969_v11 = vpack.c.bf16 %v1667_v7, %v1666_v2  ;;  %v3129_v12 = vpack.c.bf16 %v1731_v8, %v1730_v5  ;;  %vm1416_vm1 = vcmp.ge.f32.partialorder %v3350_v9, 0.0  ;;  %v1544_v13 = vmul.f32 0.2, %v3350_v9  ;;  %v1071_v14 = vpop.f32.mrb[57].mxu0 }
 0x157   : > { %v1327_v15 = vpop.f32.mrb[57].mxu1  ;;  %3214 = vst [vmem:[%s3684_s24 + $0x1d8] sm:$0xff] %v3134_v6   ;;  %vm1480_vm2 = vcmp.ge.f32.partialorder %v3414_v10, 0.0  ;;  %v1608_v16 = vmul.f32 0.2, %v3414_v10  ;;  %v3351_v19 = vpop.f32.mrb[58].mxu0 }
 0x158   : > { %3181 = vst [vmem:[%s3684_s24 + $0xd0] sm:$0xff] %v2969_v11   ;;  %3213 = vst [vmem:[%s3684_s24 + $0x1d0] sm:$0xff] %v3129_v12   ;;  %v1542_v17 = vmul.f32 0.2, %v1071_v14  ;;  %v1606_v18 = vmul.f32 0.2, %v1327_v15  ;;  %v1672_v21 = vsel %vm1416_vm1, %v3350_v9, %v1544_v13 }
 0x159   : > { %v3415_v20 = vpop.f32.mrb[58].mxu1  ;;  %vm1414_vm3 = vcmp.ge.f32.partialorder %v1071_v14, 0.0  ;;  %vm1417_vm4 = vcmp.ge.f32.partialorder %v3351_v19, 0.0  ;;  %v1545_v22 = vmul.f32 0.2, %v3351_v19  ;;  %v1074_v23 = vpop.f32.mrb[59].mxu0  ;;  %v1736_v29 = vsel %vm1480_vm2, %v3414_v10, %v1608_v16 }
 0x15a   : > { %v1330_v24 = vpop.f32.mrb[59].mxu1  ;;  %vm1478_vm5 = vcmp.ge.f32.partialorder %v1327_v15, 0.0  ;;  %vm1481_vm6 = vcmp.ge.f32.partialorder %v3415_v20, 0.0  ;;  %v1609_v25 = vmul.f32 0.2, %v3415_v20  ;;  %vm1415_vm7 = vcmp.ge.f32.partialorder %v1074_v23, 0.0 }
 0x15b   : > { %v1673_v26 = vsel %vm1417_vm4, %v3351_v19, %v1545_v22  ;;  %v1543_v27 = vmul.f32 0.2, %v1074_v23  ;;  %vm1479_vm8 = vcmp.ge.f32.partialorder %v1330_v24, 0.0  ;;  %v1607_v28 = vmul.f32 0.2, %v1330_v24 }
 0x15c   : > { %v1670_v30 = vsel %vm1414_vm3, %v1071_v14, %v1542_v17  ;;  %v2984_v31 = vpack.c.bf16 %v1673_v26, %v1672_v21  ;;  %v1737_v32 = vsel %vm1481_vm6, %v3415_v20, %v1609_v25  ;;  %v1734_v33 = vsel %vm1478_vm5, %v1327_v15, %v1606_v18 }
 0x15d   : > { %v3144_v34 = vpack.c.bf16 %v1737_v32, %v1736_v29  ;;  %v1671_v35 = vsel %vm1415_vm7, %v1074_v23, %v1543_v27  ;;  %v1735_v36 = vsel %vm1479_vm8, %v1330_v24, %v1607_v28  ;;  %v3354_v37 = vpop.f32.mrb[60].mxu0 }
 0x15e   : > { %v3418_v38 = vpop.f32.mrb[60].mxu1  ;;  %3184 = vst [vmem:[%s3684_s24 + $0xe8] sm:$0xff] %v2984_v31   ;;  %v2979_v39 = vpack.c.bf16 %v1671_v35, %v1670_v30  ;;  %v3139_v40 = vpack.c.bf16 %v1735_v36, %v1734_v33  ;;  %vm1420_vm9 = vcmp.ge.f32.partialorder %v3354_v37, 0.0  ;;  %v1548_v41 = vmul.f32 0.2, %v3354_v37  ;;  %v1087_v42 = vpop.f32.mrb[61].mxu0 }
 0x15f   : > { %v1343_v43 = vpop.f32.mrb[61].mxu1  ;;  %3216 = vst [vmem:[%s3684_s24 + $0x1e8] sm:$0xff] %v3144_v34   ;;  %vm1484_vm10 = vcmp.ge.f32.partialorder %v3418_v38, 0.0  ;;  %v1612_v44 = vmul.f32 0.2, %v3418_v38  ;;  %v3355_v47 = vpop.f32.mrb[62].mxu0 }
 0x160   : > { %3183 = vst [vmem:[%s3684_s24 + $0xe0] sm:$0xff] %v2979_v39   ;;  %3215 = vst [vmem:[%s3684_s24 + $0x1e0] sm:$0xff] %v3139_v40   ;;  %v1546_v45 = vmul.f32 0.2, %v1087_v42  ;;  %v1610_v46 = vmul.f32 0.2, %v1343_v43  ;;  %v1676_v49 = vsel %vm1420_vm9, %v3354_v37, %v1548_v41 }
 0x161   : > { %v3419_v48 = vpop.f32.mrb[62].mxu1  ;;  %vm1418_vm11 = vcmp.ge.f32.partialorder %v1087_v42, 0.0  ;;  %vm1421_vm12 = vcmp.ge.f32.partialorder %v3355_v47, 0.0  ;;  %v1549_v50 = vmul.f32 0.2, %v3355_v47  ;;  %v1090_v51 = vpop.f32.mrb[63].mxu0  ;;  %v1740_v57 = vsel %vm1484_vm10, %v3418_v38, %v1612_v44 }
 0x162   : > { %v1346_v52 = vpop.f32.mrb[63].mxu1  ;;  %vm1482_vm13 = vcmp.ge.f32.partialorder %v1343_v43, 0.0  ;;  %vm1485_vm14 = vcmp.ge.f32.partialorder %v3419_v48, 0.0  ;;  %v1613_v53 = vmul.f32 0.2, %v3419_v48  ;;  %vm1419_vm15 = vcmp.ge.f32.partialorder %v1090_v51, 0.0 }
 0x163   : > { %v1677_v54 = vsel %vm1421_vm12, %v3355_v47, %v1549_v50  ;;  %v1547_v55 = vmul.f32 0.2, %v1090_v51  ;;  %vm1483_vm0 = vcmp.ge.f32.partialorder %v1346_v52, 0.0  ;;  %v1611_v56 = vmul.f32 0.2, %v1346_v52 }
 0x164   : > { %v1674_v58 = vsel %vm1418_vm11, %v1087_v42, %v1546_v45  ;;  %v2994_v59 = vpack.c.bf16 %v1677_v54, %v1676_v49  ;;  %v1741_v60 = vsel %vm1485_vm14, %v3419_v48, %v1613_v53  ;;  %v1738_v61 = vsel %vm1482_vm13, %v1343_v43, %v1610_v46 }
 0x165   : > { %v3154_v62 = vpack.c.bf16 %v1741_v60, %v1740_v57  ;;  %v1675_v63 = vsel %vm1419_vm15, %v1090_v51, %v1547_v55  ;;  %v1739_v0 = vsel %vm1483_vm0, %v1346_v52, %v1611_v56 }
 0x166   : > { %3186 = vst [vmem:[%s3684_s24 + $0xf8] sm:$0xff] %v2994_v59   ;;  %v2989_v1 = vpack.c.bf16 %v1675_v63, %v1674_v58  ;;  %v3149_v2 = vpack.c.bf16 %v1739_v0, %v1738_v61 }
 0x167   : > { %3218 = vst [vmem:[%s3684_s24 + $0x1f8] sm:$0xff] %v3154_v62  }
 0x168   : > { %3185 = vst [vmem:[%s3684_s24 + $0xf0] sm:$0xff] %v2989_v1   ;;  %3217 = vst [vmem:[%s3684_s24 + $0x1f0] sm:$0xff] %v3149_v2  }
 0x169 PF: > { %s12_s9 = sadd.s32 1, %s3507_s9  }
 0x16a   : > { %p9_p4 = scmp.ge.s32.totalorder %s12_s9, 4  }
 0x16c   :  { %11 = sbr.rel (!%p9_p4) target bundleno = 1 (0x1), region = 58 }

// kernel: _forward_impl.6
= control target key start
LH: loop header
LB: loop body
LE: loop exit
PB: predicated region body
PF: predicated region fallthrough
CT: control target
= control target key end

     0   :  { %s3918_s1 = inlined_call_operand.vmem [shape: bf16[128,128], index: 1, kind: input, shape index: {}]   ;;  %s3919_s0 = inlined_call_operand.vmem [shape: bf16[512,128], index: 0, kind: input, shape index: {}]   ;;  %s3920_s2 = inlined_call_operand.vmem [shape: f32[1,128], index: 2, kind: input, shape index: {}]   ;;  %s3921_s3 = inlined_call_operand.vmem [shape: f32[1,128], index: 3, kind: input, shape index: {}]   ;;  %s3922_s4 = inlined_call_operand.vmem [shape: bf16[512,128], index: 4, kind: output, shape index: {}]  }
   0x1   :  { %v2050_v0 = vld [vmem:[%s3918_s1] sm:$0xff]   ;;  %v2051_v1 = vld [vmem:[%s3918_s1 + $0x8] sm:$0xff]   ;;  %v2052_v2 = vld [vmem:[%s3918_s1 + $0x10] sm:$0xff]  }
   0x2   :  { %1954 = vmatprep.subr.bf16.mxu0 %v2050_v0  ;;  %2034 = vmatprep.subr.bf16.mxu1 %v2050_v0  ;;  %v2053_v3 = vld [vmem:[%s3918_s1 + $0x18] sm:$0xff]   ;;  %v2058_v4 = vld [vmem:[%s3919_s0] sm:$0xff]   ;;  %v2055_v6 = vld [vmem:[%s3918_s1 + $0x28] sm:$0xff]  }
   0x3   :  { %1955 = vmatpush3.bf16.msra.mxu0 %v2050_v0  ;;  %2042 = vmatpush3.bf16.msra.mxu1 %v2050_v0  ;;  %v2054_v5 = vld [vmem:[%s3918_s1 + $0x20] sm:$0xff]   ;;  %v2056_v7 = vld [vmem:[%s3918_s1 + $0x30] sm:$0xff]   ;;  %v2057_v8 = vld [vmem:[%s3918_s1 + $0x38] sm:$0xff]  }
   0x4   :  { %1956 = vmatprep.subr.bf16.mxu0 %v2051_v1  ;;  %2035 = vmatprep.subr.bf16.mxu1 %v2051_v1  ;;  %v2074_v9 = vld [vmem:[%s3919_s0 + $0x80] sm:$0xff]   ;;  %v2059_v10 = vld [vmem:[%s3919_s0 + $0x8] sm:$0xff]   ;;  %v2060_v11 = vld [vmem:[%s3919_s0 + $0x10] sm:$0xff]  }
   0x5   :  { %1970 = vmatprep.mubr.bf16.mxu0 %v2058_v4  ;;  %2002 = vmatprep.mubr.bf16.mxu1 %v2074_v9  ;;  %v2075_v12 = vld [vmem:[%s3919_s0 + $0x88] sm:$0xff]   ;;  %v2076_v13 = vld [vmem:[%s3919_s0 + $0x90] sm:$0xff]   ;;  %v2061_v14 = vld [vmem:[%s3919_s0 + $0x18] sm:$0xff]  }
   0x6   :  { %v2062_v15 = vld [vmem:[%s3919_s0 + $0x20] sm:$0xff]   ;;  %v2077_v16 = vld [vmem:[%s3919_s0 + $0x98] sm:$0xff]   ;;  %v2063_v18 = vld [vmem:[%s3919_s0 + $0x28] sm:$0xff]  }
   0x7   :  { %1957 = vmatpush3.bf16.msra.mxu0 %v2051_v1  ;;  %2043 = vmatpush3.bf16.msra.mxu1 %v2051_v1  ;;  %v2078_v17 = vld [vmem:[%s3919_s0 + $0xa0] sm:$0xff]   ;;  %v2079_v19 = vld [vmem:[%s3919_s0 + $0xa8] sm:$0xff]   ;;  %v2064_v20 = vld [vmem:[%s3919_s0 + $0x30] sm:$0xff]  }
   0x8   :  { %1958 = vmatprep.subr.bf16.mxu0 %v2052_v2  ;;  %2036 = vmatprep.subr.bf16.mxu1 %v2052_v2  ;;  %v2080_v21 = vld [vmem:[%s3919_s0 + $0xb0] sm:$0xff]   ;;  %v2065_v22 = vld [vmem:[%s3919_s0 + $0x38] sm:$0xff]   ;;  %v2066_v24 = vld [vmem:[%s3919_s0 + $0x40] sm:$0xff]  }
   0x9   :  { %v2081_v23 = vld [vmem:[%s3919_s0 + $0xb8] sm:$0xff]   ;;  %v2082_v25 = vld [vmem:[%s3919_s0 + $0xc0] sm:$0xff]   ;;  %v2067_v26 = vld [vmem:[%s3919_s0 + $0x48] sm:$0xff]  }
   0xa   :  { %v2083_v27 = vld [vmem:[%s3919_s0 + $0xc8] sm:$0xff]   ;;  %v2068_v28 = vld [vmem:[%s3919_s0 + $0x50] sm:$0xff]   ;;  %v2069_v30 = vld [vmem:[%s3919_s0 + $0x58] sm:$0xff]  }
   0xb   :  { %1959 = vmatpush3.bf16.msra.mxu0 %v2052_v2  ;;  %2044 = vmatpush3.bf16.msra.mxu1 %v2052_v2  ;;  %v2084_v29 = vld [vmem:[%s3919_s0 + $0xd0] sm:$0xff]   ;;  %v2085_v31 = vld [vmem:[%s3919_s0 + $0xd8] sm:$0xff]   ;;  %v2070_v32 = vld [vmem:[%s3919_s0 + $0x60] sm:$0xff]  }
   0xc   :  { %1960 = vmatprep.subr.bf16.mxu0 %v2053_v3  ;;  %2037 = vmatprep.subr.bf16.mxu1 %v2053_v3  ;;  %v2086_v33 = vld [vmem:[%s3919_s0 + $0xe0] sm:$0xff]   ;;  %v2071_v34 = vld [vmem:[%s3919_s0 + $0x68] sm:$0xff]   ;;  %v2072_v36 = vld [vmem:[%s3919_s0 + $0x70] sm:$0xff]  }
   0xd   :  { %v2087_v35 = vld [vmem:[%s3919_s0 + $0xe8] sm:$0xff]   ;;  %v2088_v37 = vld [vmem:[%s3919_s0 + $0xf0] sm:$0xff]   ;;  %v2073_v38 = vld [vmem:[%s3919_s0 + $0x78] sm:$0xff]  }
   0xe   :  { %v2089_v39 = vld [vmem:[%s3919_s0 + $0xf8] sm:$0xff]  }
   0xf   :  { %1961 = vmatpush3.bf16.msra.mxu0 %v2053_v3  ;;  %2045 = vmatpush3.bf16.msra.mxu1 %v2053_v3 }
  0x10   :  { %1962 = vmatprep.subr.bf16.mxu0 %v2054_v5  ;;  %2038 = vmatprep.subr.bf16.mxu1 %v2054_v5 }
  0x13   :  { %1963 = vmatpush3.bf16.msra.mxu0 %v2054_v5  ;;  %2046 = vmatpush3.bf16.msra.mxu1 %v2054_v5 }
  0x14   :  { %1964 = vmatprep.subr.bf16.mxu0 %v2055_v6  ;;  %2039 = vmatprep.subr.bf16.mxu1 %v2055_v6 }
  0x17   :  { %1965 = vmatpush3.bf16.msra.mxu0 %v2055_v6  ;;  %2047 = vmatpush3.bf16.msra.mxu1 %v2055_v6 }
  0x18   :  { %1966 = vmatprep.subr.bf16.mxu0 %v2056_v7  ;;  %2040 = vmatprep.subr.bf16.mxu1 %v2056_v7 }
  0x1b   :  { %1967 = vmatpush3.bf16.msra.mxu0 %v2056_v7  ;;  %2048 = vmatpush3.bf16.msra.mxu1 %v2056_v7 }
  0x1c   :  { %1968 = vmatprep.subr.bf16.mxu0 %v2057_v8  ;;  %2041 = vmatprep.subr.bf16.mxu1 %v2057_v8 }
  0x1f   :  { %1969 = vmatpush3.bf16.msra.mxu0 %v2057_v8  ;;  %2049 = vmatpush3.bf16.msra.mxu1 %v2057_v8 }
  0x22   :  { %1971 = vmatmul.mubr.bf16.vlgmr.msra.gmra.mrb[0].mxu0 %v2059_v10  ;;  %2003 = vmatmul.mubr.bf16.vlgmr.msra.gmra.mrb[0].mxu1 %v2075_v12 }
  0x23   :  { %1974 = vmatprep.mubr.bf16.mxu0 %v2060_v11  ;;  %2006 = vmatprep.mubr.bf16.mxu1 %v2076_v13 }
  0x2a   :  { %1975 = vmatmul.mubr.bf16.gmra.mrb[4].mxu0 %v2061_v14  ;;  %2007 = vmatmul.mubr.bf16.gmra.mrb[4].mxu1 %v2077_v16 }
  0x2b   :  { %1978 = vmatprep.mubr.bf16.mxu0 %v2062_v15  ;;  %2010 = vmatprep.mubr.bf16.mxu1 %v2078_v17 }
  0x32   :  { %1979 = vmatmul.mubr.bf16.gmra.mrb[8].mxu0 %v2063_v18  ;;  %2011 = vmatmul.mubr.bf16.gmra.mrb[8].mxu1 %v2079_v19 }
  0x33   :  { %1982 = vmatprep.mubr.bf16.mxu0 %v2064_v20  ;;  %2014 = vmatprep.mubr.bf16.mxu1 %v2080_v21 }
  0x3a   :  { %1983 = vmatmul.mubr.bf16.gmra.mrb[12].mxu0 %v2065_v22  ;;  %2015 = vmatmul.mubr.bf16.gmra.mrb[12].mxu1 %v2081_v23 }
  0x3b   :  { %1986 = vmatprep.mubr.bf16.mxu0 %v2066_v24  ;;  %2018 = vmatprep.mubr.bf16.mxu1 %v2082_v25 }
  0x42   :  { %1987 = vmatmul.mubr.bf16.gmra.mrb[16].mxu0 %v2067_v26  ;;  %2019 = vmatmul.mubr.bf16.gmra.mrb[16].mxu1 %v2083_v27 }
  0x43   :  { %1990 = vmatprep.mubr.bf16.mxu0 %v2068_v28  ;;  %2022 = vmatprep.mubr.bf16.mxu1 %v2084_v29 }
  0x4a   :  { %1991 = vmatmul.mubr.bf16.gmra.mrb[20].mxu0 %v2069_v30  ;;  %2023 = vmatmul.mubr.bf16.gmra.mrb[20].mxu1 %v2085_v31 }
  0x4b   :  { %1994 = vmatprep.mubr.bf16.mxu0 %v2070_v32  ;;  %2026 = vmatprep.mubr.bf16.mxu1 %v2086_v33 }
  0x52   :  { %1995 = vmatmul.mubr.bf16.gmra.mrb[24].mxu0 %v2071_v34  ;;  %2027 = vmatmul.mubr.bf16.gmra.mrb[24].mxu1 %v2087_v35 }
  0x53   :  { %1998 = vmatprep.mubr.bf16.mxu0 %v2072_v36  ;;  %2030 = vmatprep.mubr.bf16.mxu1 %v2088_v37 }
  0x5a   :  { %1999 = vmatmul.mubr.bf16.gmra.mrb[28].mxu0 %v2073_v38  ;;  %2031 = vmatmul.mubr.bf16.gmra.mrb[28].mxu1 %v2089_v39 }
  0xf5   :  { %v2237_v40 = vpop.f32.mrb[0].mxu0  ;;  %v2239_v41 = vpop.f32.mrb[0].mxu1 }
  0xf6   :  { %v2241_v42 = vpop.f32.mrb[1].mxu0  ;;  %v2243_v43 = vpop.f32.mrb[1].mxu1 }
  0xf7   :  { %v2245_v44 = vpop.f32.mrb[2].mxu0  ;;  %v2247_v45 = vpop.f32.mrb[2].mxu1 }
  0xf8   :  { %v2249_v46 = vpop.f32.mrb[3].mxu0  ;;  %v2251_v47 = vpop.f32.mrb[3].mxu1 }
  0xf9   :  { %v627_v48 = vadd.f32 %v2249_v46, %v2241_v42 }
  0xfb   :  { %v628_v49 = vadd.f32 %v2237_v40, %v627_v48 }
  0xfd   :  { %v2256_v50 = vpop.f32.mrb[4].mxu0  ;;  %v629_v51 = vadd.f32 %v2245_v44, %v628_v49  ;;  %v2259_v52 = vpop.f32.mrb[4].mxu1 }
  0xfe   :  { %v2261_v53 = vpop.f32.mrb[5].mxu0  ;;  %v2263_v54 = vpop.f32.mrb[5].mxu1 }
  0xff   :  { %v630_v55 = vadd.f32 %v629_v51, %v2261_v53  ;;  %v2266_v56 = vpop.f32.mrb[6].mxu0  ;;  %v2268_v57 = vpop.f32.mrb[6].mxu1 }
 0x100   :  { %v2270_v58 = vpop.f32.mrb[7].mxu0  ;;  %v2272_v59 = vpop.f32.mrb[7].mxu1 }
 0x101   :  { %v631_v60 = vadd.f32 %v630_v55, %v2270_v58 }
 0x103   :  { %v632_v61 = vadd.f32 %v2256_v50, %v631_v60 }
 0x105   :  { %v2276_v62 = vpop.f32.mrb[8].mxu0  ;;  %v633_v63 = vadd.f32 %v2266_v56, %v632_v61  ;;  %v2279_v0 = vpop.f32.mrb[8].mxu1 }
 0x106   :  { %v2281_v1 = vpop.f32.mrb[9].mxu0  ;;  %v2283_v2 = vpop.f32.mrb[9].mxu1 }
 0x107   :  { %v634_v3 = vadd.f32 %v633_v63, %v2281_v1  ;;  %v2286_v4 = vpop.f32.mrb[10].mxu0  ;;  %v2288_v5 = vpop.f32.mrb[10].mxu1 }
 0x108   :  { %v2290_v6 = vpop.f32.mrb[11].mxu0  ;;  %v2292_v7 = vpop.f32.mrb[11].mxu1 }
 0x109   :  { %v635_v8 = vadd.f32 %v634_v3, %v2290_v6 }
 0x10b   :  { %v636_v9 = vadd.f32 %v2276_v62, %v635_v8 }
 0x10d   :  { %v2296_v10 = vpop.f32.mrb[12].mxu0  ;;  %v637_v11 = vadd.f32 %v2286_v4, %v636_v9  ;;  %v2299_v12 = vpop.f32.mrb[12].mxu1 }
 0x10e   :  { %v2301_v13 = vpop.f32.mrb[13].mxu0  ;;  %v2303_v14 = vpop.f32.mrb[13].mxu1 }
 0x10f   :  { %v638_v15 = vadd.f32 %v637_v11, %v2301_v13  ;;  %v2306_v16 = vpop.f32.mrb[14].mxu0  ;;  %v2308_v17 = vpop.f32.mrb[14].mxu1 }
 0x110   :  { %v2310_v18 = vpop.f32.mrb[15].mxu0  ;;  %v2312_v19 = vpop.f32.mrb[15].mxu1 }
 0x111   :  { %v639_v20 = vadd.f32 %v638_v15, %v2310_v18 }
 0x113   :  { %v640_v21 = vadd.f32 %v2296_v10, %v639_v20 }
 0x115   :  { %v2316_v22 = vpop.f32.mrb[16].mxu0  ;;  %v641_v23 = vadd.f32 %v2306_v16, %v640_v21  ;;  %v2319_v24 = vpop.f32.mrb[16].mxu1 }
 0x116   :  { %3994 = vst [vmem:[#allocation2_spill] sm:$0xff] %v2316_v22  ;;  %v2321_v25 = vpop.f32.mrb[17].mxu0  ;;  %v2323_v26 = vpop.f32.mrb[17].mxu1 }
 0x117   :  { %v642_v27 = vadd.f32 %v641_v23, %v2321_v25  ;;  %v2326_v28 = vpop.f32.mrb[18].mxu0  ;;  %v2328_v29 = vpop.f32.mrb[18].mxu1 }
 0x118   :  { %3995 = vst [vmem:[#allocation3_spill] sm:$0xff] %v2326_v28  ;;  %v2330_v30 = vpop.f32.mrb[19].mxu0  ;;  %v2332_v31 = vpop.f32.mrb[19].mxu1 }
 0x119   :  { %v643_v32 = vadd.f32 %v642_v27, %v2330_v30 }
 0x11b   :  { %v644_v33 = vadd.f32 %v2316_v22, %v643_v32 }
 0x11d   :  { %v2336_v34 = vpop.f32.mrb[20].mxu0  ;;  %v645_v35 = vadd.f32 %v2326_v28, %v644_v33  ;;  %v2339_v36 = vpop.f32.mrb[20].mxu1 }
 0x11e   :  { %3996 = vst [vmem:[#allocation4_spill] sm:$0xff] %v2336_v34  ;;  %3997 = vst [vmem:[#allocation5_spill] sm:$0xff] %v2339_v36  ;;  %v2341_v37 = vpop.f32.mrb[21].mxu0  ;;  %v2343_v38 = vpop.f32.mrb[21].mxu1 }
 0x11f   :  { %3998 = vst [vmem:[#allocation6_spill] sm:$0xff] %v2341_v37  ;;  %v646_v39 = vadd.f32 %v645_v35, %v2341_v37  ;;  %v2346_v48 = vpop.f32.mrb[22].mxu0  ;;  %v2348_v49 = vpop.f32.mrb[22].mxu1 }
 0x120   :  { %3999 = vst [vmem:[#allocation7_spill] sm:$0xff] %v2346_v48  ;;  %4000 = vst [vmem:[#allocation8_spill] sm:$0xff] %v2348_v49  ;;  %v2350_v51 = vpop.f32.mrb[23].mxu0  ;;  %v2352_v55 = vpop.f32.mrb[23].mxu1 }
 0x121   :  { %4001 = vst [vmem:[#allocation9_spill] sm:$0xff] %v2350_v51  ;;  %4002 = vst [vmem:[#allocation10_spill] sm:$0xff] %v2352_v55  ;;  %v647_v60 = vadd.f32 %v646_v39, %v2350_v51 }
 0x123   :  { %v648_v61 = vadd.f32 %v2336_v34, %v647_v60 }
 0x125   :  { %v2356_v63 = vpop.f32.mrb[24].mxu0  ;;  %v649_v3 = vadd.f32 %v2346_v48, %v648_v61  ;;  %v2359_v8 = vpop.f32.mrb[24].mxu1 }
 0x126   :  { %4003 = vst [vmem:[#allocation11_spill] sm:$0xff] %v2356_v63  ;;  %v2361_v9 = vpop.f32.mrb[25].mxu0  ;;  %v2363_v11 = vpop.f32.mrb[25].mxu1 }
 0x127   :  { %4004 = vst [vmem:[#allocation12_spill] sm:$0xff] %v2361_v9  ;;  %4005 = vst [vmem:[#allocation13_spill] sm:$0xff] %v2363_v11  ;;  %v650_v15 = vadd.f32 %v649_v3, %v2361_v9  ;;  %v2366_v20 = vpop.f32.mrb[26].mxu0  ;;  %v2368_v21 = vpop.f32.mrb[26].mxu1 }
 0x128   :  { %4006 = vst [vmem:[#allocation14_spill] sm:$0xff] %v2366_v20  ;;  %v2370_v23 = vpop.f32.mrb[27].mxu0  ;;  %v2372_v27 = vpop.f32.mrb[27].mxu1 }
 0x129   :  { %4007 = vst [vmem:[#allocation15_spill] sm:$0xff] %v2370_v23  ;;  %v651_v32 = vadd.f32 %v650_v15, %v2370_v23 }
 0x12b   :  { %v652_v33 = vadd.f32 %v2356_v63, %v651_v32 }
 0x12d   :  { %v2376_v35 = vpop.f32.mrb[28].mxu0  ;;  %v653_v39 = vadd.f32 %v2366_v20, %v652_v33  ;;  %v2379_v60 = vpop.f32.mrb[28].mxu1 }
 0x12e   :  { %v2381_v61 = vpop.f32.mrb[29].mxu0  ;;  %v2383_v3 = vpop.f32.mrb[29].mxu1 }
 0x12f   :  { %4008 = vst [vmem:[#allocation16_spill] sm:$0xff] %v2381_v61  ;;  %v654_v9 = vadd.f32 %v653_v39, %v2381_v61  ;;  %v2386_v48 = vpop.f32.mrb[30].mxu0  ;;  %v2388_v34 = vpop.f32.mrb[30].mxu1 }
 0x130   :  { %v2390_v51 = vpop.f32.mrb[31].mxu0  ;;  %v2392_v15 = vpop.f32.mrb[31].mxu1 }
 0x131   :  { %v655_v32 = vadd.f32 %v654_v9, %v2390_v51 }
 0x133   :  { %v656_v33 = vadd.f32 %v2376_v35, %v655_v32 }
 0x135   :  { %v657_v20 = vadd.f32 %v2386_v48, %v656_v33 }
 0x137   :  { %v658_v63 = vadd.f32 %v657_v20, %v2243_v43 }
 0x139   :  { %v659_v23 = vadd.f32 %v658_v63, %v2251_v47 }
 0x13b   :  { %v660_v39 = vadd.f32 %v2239_v41, %v659_v23 }
 0x13d   :  { %v661_v61 = vadd.f32 %v2247_v45, %v660_v39 }
 0x13f   :  { %v662_v37 = vadd.f32 %v661_v61, %v2263_v54 }
 0x141   :  { %v663_v28 = vadd.f32 %v662_v37, %v2272_v59 }
 0x143   :  { %v664_v22 = vadd.f32 %v2259_v52, %v663_v28 }
 0x145   :  { %v665_v9 = vadd.f32 %v2268_v57, %v664_v22 }
 0x147   :  { %v666_v32 = vadd.f32 %v665_v9, %v2283_v2 }
 0x149   :  { %v667_v33 = vadd.f32 %v666_v32, %v2292_v7 }
 0x14b   :  { %v668_v20 = vadd.f32 %v2279_v0, %v667_v33 }
 0x14d   :  { %v669_v63 = vadd.f32 %v2288_v5, %v668_v20 }
 0x14f   :  { %v670_v23 = vadd.f32 %v669_v63, %v2303_v14 }
 0x151   :  { %v671_v39 = vadd.f32 %v670_v23, %v2312_v19 }
 0x153   :  { %v672_v61 = vadd.f32 %v2299_v12, %v671_v39 }
 0x155   :  { %v673_v37 = vadd.f32 %v2308_v17, %v672_v61 }
 0x157   :  { %v674_v28 = vadd.f32 %v673_v37, %v2323_v26 }
 0x159   :  { %v675_v22 = vadd.f32 %v674_v28, %v2332_v31 }
 0x15b   :  { %v676_v9 = vadd.f32 %v2319_v24, %v675_v22 }
 0x15d   :  { %v677_v32 = vadd.f32 %v2328_v29, %v676_v9 }
 0x15f   :  { %v678_v33 = vadd.f32 %v677_v32, %v2343_v38 }
 0x161   :  { %v679_v20 = vadd.f32 %v678_v33, %v2352_v55 }
 0x163   :  { %v680_v63 = vadd.f32 %v2339_v36, %v679_v20 }
 0x165   :  { %v681_v23 = vadd.f32 %v2348_v49, %v680_v63 }
 0x167   :  { %v682_v39 = vadd.f32 %v681_v23, %v2363_v11 }
 0x169   :  { %v683_v61 = vadd.f32 %v682_v39, %v2372_v27 }
 0x16b   :  { %v684_v37 = vadd.f32 %v2359_v8, %v683_v61 }
 0x16d   :  { %v685_v28 = vadd.f32 %v2368_v21, %v684_v37 }
 0x16f   :  { %v686_v22 = vadd.f32 %v685_v28, %v2383_v3  ;;  %v4015_v28 = vld [vmem:[#allocation3_spill] sm:$0xff] }
 0x171   :  { %v687_v9 = vadd.f32 %v686_v22, %v2392_v15  ;;  %v4016_v22 = vld [vmem:[#allocation6_spill] sm:$0xff] }
 0x173   :  { %v688_v32 = vadd.f32 %v2379_v60, %v687_v9  ;;  %v4017_v9 = vld [vmem:[#allocation9_spill] sm:$0xff] }
 0x175   :  { %v689_v33 = vadd.f32 %v2388_v34, %v688_v32  ;;  %v4019_v32 = vld [vmem:[#allocation4_spill] sm:$0xff] }
 0x177   :  { %v690_v55 = vrot.slane %v689_v33, 4 }
 0x179   :  { %v691_v20 = vadd.f32 %v690_v55, %v689_v33  ;;  %v4021_v33 = vld [vmem:[#allocation7_spill] sm:$0xff] }
 0x17b   :  { %v692_v36 = vrot.slane %v691_v20, 2 }
 0x17d   :  { %v693_v63 = vadd.f32 %v692_v36, %v691_v20 }
 0x17f   :  { %v694_v49 = vrot.slane %v693_v63, 1 }
 0x181   :  { %v695_v23 = vadd.f32 %v694_v49, %v693_v63  ;;  %v4014_v49 = vld [vmem:[#allocation2_spill] sm:$0xff]  ;;  %v4022_v63 = vld [vmem:[#allocation12_spill] sm:$0xff] }
 0x183   :  { %v2429_v11 = vmul.f32 0.001953125, %v695_v23 }
 0x185   :  { %v2433_v39 = vsub.f32 %v2241_v42, %v2429_v11  ;;  %v2437_v61 = vsub.f32 %v2249_v46, %v2429_v11  ;;  %v2441_v37 = vsub.f32 %v2237_v40, %v2429_v11  ;;  %v2445_v55 = vsub.f32 %v2245_v44, %v2429_v11 }
 0x186   :  { %v2449_v36 = vsub.f32 %v2261_v53, %v2429_v11  ;;  %v2453_v42 = vsub.f32 %v2270_v58, %v2429_v11  ;;  %v2457_v46 = vsub.f32 %v2256_v50, %v2429_v11  ;;  %v2461_v40 = vsub.f32 %v2266_v56, %v2429_v11 }
 0x187   :  { %4009 = vst [vmem:[#allocation17_spill] sm:$0xff] %v2433_v39  ;;  %4010 = vst [vmem:[#allocation18_spill] sm:$0xff] %v2437_v61  ;;  %v2465_v44 = vsub.f32 %v2281_v1, %v2429_v11  ;;  %v2469_v53 = vsub.f32 %v2290_v6, %v2429_v11  ;;  %v2473_v58 = vsub.f32 %v2276_v62, %v2429_v11 }
 0x188   :  { %4011 = vst [vmem:[#allocation19_spill] sm:$0xff] %v2441_v37  ;;  %v2477_v50 = vsub.f32 %v2286_v4, %v2429_v11  ;;  %v2481_v56 = vsub.f32 %v2301_v13, %v2429_v11  ;;  %v2485_v1 = vsub.f32 %v2310_v18, %v2429_v11  ;;  %v2489_v6 = vsub.f32 %v2296_v10, %v2429_v11 }
 0x189   :  { %v2493_v62 = vsub.f32 %v2306_v16, %v2429_v11  ;;  %v2497_v4 = vsub.f32 %v2321_v25, %v2429_v11  ;;  %v2501_v13 = vsub.f32 %v2330_v30, %v2429_v11  ;;  %v2505_v18 = vsub.f32 %v4014_v49, %v2429_v11  ;;  %v4023_v49 = vld [vmem:[#allocation15_spill] sm:$0xff] }
 0x18a   :  { %v2509_v10 = vsub.f32 %v4015_v28, %v2429_v11  ;;  %v2513_v16 = vsub.f32 %v4016_v22, %v2429_v11  ;;  %v2517_v25 = vsub.f32 %v4017_v9, %v2429_v11  ;;  %v2521_v30 = vsub.f32 %v4019_v32, %v2429_v11  ;;  %v4024_v22 = vld [vmem:[#allocation11_spill] sm:$0xff] }
 0x18b   :  { %4012 = vst [vmem:[#allocation20_spill] sm:$0xff] %v2497_v4  ;;  %4013 = vst [vmem:[#allocation21_spill] sm:$0xff] %v2501_v13  ;;  %v2525_v20 = vsub.f32 %v4021_v33, %v2429_v11  ;;  %v2529_v23 = vsub.f32 %v4022_v63, %v2429_v11  ;;  %v2533_v28 = vsub.f32 %v4023_v49, %v2429_v11 }
 0x18c   :  { %4018 = vst [vmem:[#allocation2_spill] sm:$0xff] %v2517_v25  ;;  %4020 = vst [vmem:[#allocation3_spill] sm:$0xff] %v2521_v30  ;;  %v2537_v9 = vsub.f32 %v4024_v22, %v2429_v11  ;;  %v4025_v25 = vld [vmem:[#allocation14_spill] sm:$0xff]  ;;  %v4026_v30 = vld [vmem:[#allocation16_spill] sm:$0xff]  ;;  %v2549_v63 = vsub.f32 %v2390_v51, %v2429_v11  ;;  %v2553_v49 = vsub.f32 %v2376_v35, %v2429_v11 }
 0x18d   :  { %v2541_v32 = vsub.f32 %v4025_v25, %v2429_v11  ;;  %v2545_v33 = vsub.f32 %v4026_v30, %v2429_v11  ;;  %v2557_v22 = vsub.f32 %v2386_v48, %v2429_v11  ;;  %v2561_v25 = vsub.f32 %v2243_v43, %v2429_v11 }
 0x18e   :  { %v2565_v30 = vsub.f32 %v2251_v47, %v2429_v11  ;;  %v2569_v51 = vsub.f32 %v2239_v41, %v2429_v11  ;;  %v2573_v35 = vsub.f32 %v2247_v45, %v2429_v11  ;;  %v2577_v48 = vsub.f32 %v2263_v54, %v2429_v11 }
 0x18f   :  { %v2581_v43 = vsub.f32 %v2272_v59, %v2429_v11  ;;  %v2585_v47 = vsub.f32 %v2259_v52, %v2429_v11  ;;  %v2589_v41 = vsub.f32 %v2268_v57, %v2429_v11  ;;  %v2593_v45 = vsub.f32 %v2283_v2, %v2429_v11 }
 0x190   :  { %v2597_v54 = vsub.f32 %v2292_v7, %v2429_v11  ;;  %v2601_v59 = vsub.f32 %v2279_v0, %v2429_v11  ;;  %v2605_v52 = vsub.f32 %v2288_v5, %v2429_v11  ;;  %v2609_v57 = vsub.f32 %v2303_v14, %v2429_v11 }
 0x191   :  { %4027 = vst [vmem:[#allocation6_spill] sm:$0xff] %v2585_v47  ;;  %4028 = vst [vmem:[#allocation9_spill] sm:$0xff] %v2589_v41  ;;  %v2613_v2 = vsub.f32 %v2312_v19, %v2429_v11  ;;  %v2617_v7 = vsub.f32 %v2299_v12, %v2429_v11  ;;  %v2621_v0 = vsub.f32 %v2308_v17, %v2429_v11 }
 0x192   :  { %4029 = vst [vmem:[#allocation4_spill] sm:$0xff] %v2593_v45  ;;  %4030 = vst [vmem:[#allocation7_spill] sm:$0xff] %v2597_v54  ;;  %v2625_v5 = vsub.f32 %v2323_v26, %v2429_v11  ;;  %v2629_v14 = vsub.f32 %v2332_v31, %v2429_v11  ;;  %v2633_v19 = vsub.f32 %v2319_v24, %v2429_v11 }
 0x193   :  { %4031 = vst [vmem:[#allocation12_spill] sm:$0xff] %v2601_v59  ;;  %4032 = vst [vmem:[#allocation15_spill] sm:$0xff] %v2605_v52  ;;  %v2637_v12 = vsub.f32 %v2328_v29, %v2429_v11  ;;  %v2641_v17 = vsub.f32 %v2343_v38, %v2429_v11  ;;  %v2661_v38 = vsub.f32 %v2372_v27, %v2429_v11 }
 0x194   :  { %4033 = vst [vmem:[#allocation11_spill] sm:$0xff] %v2609_v57  ;;  %4034 = vst [vmem:[#allocation14_spill] sm:$0xff] %v2613_v2  ;;  %v2681_v27 = vsub.f32 %v2379_v60, %v2429_v11  ;;  %v765_v60 = vmul.f32 %v2449_v36, %v2449_v36 }
 0x195   :  { %4035 = vst [vmem:[#allocation16_spill] sm:$0xff] %v2617_v7  ;;  %4036 = vst [vmem:[#allocation22_spill] sm:$0xff] %v2621_v0  ;;  %v4041_v0 = vld [vmem:[#allocation10_spill] sm:$0xff] }
 0x196   :  { %4037 = vst [vmem:[#allocation23_spill] sm:$0xff] %v2625_v5  ;;  %4038 = vst [vmem:[#allocation24_spill] sm:$0xff] %v2629_v14  ;;  %v2645_v26 = vsub.f32 %v4041_v0, %v2429_v11  ;;  %v4042_v5 = vld [vmem:[#allocation5_spill] sm:$0xff]  ;;  %v4043_v14 = vld [vmem:[#allocation8_spill] sm:$0xff]  ;;  %v2665_v0 = vsub.f32 %v2359_v8, %v2429_v11  ;;  %v2685_v8 = vsub.f32 %v2388_v34, %v2429_v11 }
 0x197   :  { %4039 = vst [vmem:[#allocation25_spill] sm:$0xff] %v2633_v19  ;;  %4040 = vst [vmem:[#allocation26_spill] sm:$0xff] %v2637_v12  ;;  %v2649_v31 = vsub.f32 %v4042_v5, %v2429_v11  ;;  %v2653_v24 = vsub.f32 %v4043_v14, %v2429_v11  ;;  %v4044_v19 = vld [vmem:[#allocation13_spill] sm:$0xff]  ;;  %v2669_v5 = vsub.f32 %v2368_v21, %v2429_v11 }
 0x198   :  { %v2657_v29 = vsub.f32 %v4044_v19, %v2429_v11  ;;  %v2673_v14 = vsub.f32 %v2383_v3, %v2429_v11  ;;  %v2677_v19 = vsub.f32 %v2392_v15, %v2429_v11  ;;  %4048 = vst [vmem:[#allocation13_spill] sm:$0xff] %v2681_v27  ;;  %v761_v21 = vmul.f32 %v2433_v39, %v2433_v39 }
 0x199   :  { %4045 = vst [vmem:[#allocation10_spill] sm:$0xff] %v2669_v5  ;;  %v762_v5 = vmul.f32 %v2437_v61, %v2437_v61  ;;  %v763_v3 = vmul.f32 %v2441_v37, %v2441_v37  ;;  %v764_v15 = vmul.f32 %v2445_v55, %v2445_v55  ;;  %v766_v34 = vmul.f32 %v2453_v42, %v2453_v42 }
 0x19a   :  { %4046 = vst [vmem:[#allocation5_spill] sm:$0xff] %v2673_v14  ;;  %4047 = vst [vmem:[#allocation8_spill] sm:$0xff] %v2677_v19  ;;  %v767_v39 = vmul.f32 %v2457_v46, %v2457_v46  ;;  %v768_v37 = vmul.f32 %v2461_v40, %v2461_v40 }
 0x19b   :  { %v825_v14 = vadd.f32 %v762_v5, %v761_v21  ;;  %v769_v21 = vmul.f32 %v2465_v44, %v2465_v44 }
 0x19d   :  { %v826_v19 = vadd.f32 %v825_v14, %v763_v3  ;;  %v770_v3 = vmul.f32 %v2469_v53, %v2469_v53 }
 0x19f   :  { %v827_v27 = vadd.f32 %v826_v19, %v764_v15  ;;  %v771_v15 = vmul.f32 %v2473_v58, %v2473_v58 }
 0x1a1   :  { %v828_v11 = vadd.f32 %v827_v27, %v765_v60  ;;  %v772_v60 = vmul.f32 %v2477_v50, %v2477_v50 }
 0x1a3   :  { %v829_v61 = vadd.f32 %v828_v11, %v766_v34  ;;  %v773_v11 = vmul.f32 %v2481_v56, %v2481_v56 }
 0x1a5   :  { %v830_v5 = vadd.f32 %v829_v61, %v767_v39  ;;  %v774_v61 = vmul.f32 %v2485_v1, %v2485_v1 }
 0x1a7   :  { %v831_v14 = vadd.f32 %v830_v5, %v768_v37  ;;  %v775_v5 = vmul.f32 %v2489_v6, %v2489_v6 }
 0x1a9   :  { %v832_v19 = vadd.f32 %v831_v14, %v769_v21  ;;  %v776_v14 = vmul.f32 %v2493_v62, %v2493_v62 }
 0x1ab   :  { %v833_v27 = vadd.f32 %v832_v19, %v770_v3  ;;  %v777_v19 = vmul.f32 %v2497_v4, %v2497_v4 }
 0x1ad   :  { %v834_v34 = vadd.f32 %v833_v27, %v771_v15  ;;  %v778_v27 = vmul.f32 %v2501_v13, %v2501_v13 }
 0x1af   :  { %v835_v39 = vadd.f32 %v834_v34, %v772_v60  ;;  %v779_v34 = vmul.f32 %v2505_v18, %v2505_v18 }
 0x1b1   :  { %v836_v37 = vadd.f32 %v835_v39, %v773_v11  ;;  %v780_v39 = vmul.f32 %v2509_v10, %v2509_v10 }
 0x1b3   :  { %v837_v21 = vadd.f32 %v836_v37, %v774_v61  ;;  %v781_v37 = vmul.f32 %v2513_v16, %v2513_v16 }
 0x1b5   :  { %v838_v3 = vadd.f32 %v837_v21, %v775_v5  ;;  %v4049_v21 = vld [vmem:[#allocation2_spill] sm:$0xff] }
 0x1b6   :  { %v782_v4 = vmul.f32 %v4049_v21, %v4049_v21 }
 0x1b7   :  { %v839_v15 = vadd.f32 %v838_v3, %v776_v14  ;;  %v4050_v3 = vld [vmem:[#allocation3_spill] sm:$0xff] }
 0x1b8   :  { %v783_v13 = vmul.f32 %v4050_v3, %v4050_v3 }
 0x1b9   :  { %v840_v60 = vadd.f32 %v839_v15, %v777_v19  ;;  %v784_v15 = vmul.f32 %v2525_v20, %v2525_v20 }
 0x1bb   :  { %v841_v11 = vadd.f32 %v840_v60, %v778_v27  ;;  %v785_v60 = vmul.f32 %v2529_v23, %v2529_v23 }
 0x1bd   :  { %v842_v61 = vadd.f32 %v841_v11, %v779_v34  ;;  %v786_v11 = vmul.f32 %v2533_v28, %v2533_v28 }
 0x1bf   :  { %v843_v5 = vadd.f32 %v842_v61, %v780_v39  ;;  %v787_v61 = vmul.f32 %v2537_v9, %v2537_v9 }
 0x1c1   :  { %v844_v14 = vadd.f32 %v843_v5, %v781_v37  ;;  %v788_v5 = vmul.f32 %v2541_v32, %v2541_v32 }
 0x1c3   :  { %v845_v19 = vadd.f32 %v844_v14, %v782_v4  ;;  %v789_v14 = vmul.f32 %v2545_v33, %v2545_v33 }
 0x1c5   :  { %v846_v27 = vadd.f32 %v845_v19, %v783_v13  ;;  %v790_v19 = vmul.f32 %v2549_v63, %v2549_v63 }
 0x1c7   :  { %v847_v34 = vadd.f32 %v846_v27, %v784_v15  ;;  %v791_v27 = vmul.f32 %v2553_v49, %v2553_v49 }
 0x1c9   :  { %v848_v39 = vadd.f32 %v847_v34, %v785_v60  ;;  %v792_v34 = vmul.f32 %v2557_v22, %v2557_v22 }
 0x1cb   :  { %v849_v37 = vadd.f32 %v848_v39, %v786_v11  ;;  %v793_v39 = vmul.f32 %v2561_v25, %v2561_v25 }
 0x1cd   :  { %v850_v4 = vadd.f32 %v849_v37, %v787_v61  ;;  %v794_v37 = vmul.f32 %v2565_v30, %v2565_v30 }
 0x1cf   :  { %v851_v13 = vadd.f32 %v850_v4, %v788_v5  ;;  %v795_v4 = vmul.f32 %v2569_v51, %v2569_v51 }
 0x1d1   :  { %v852_v15 = vadd.f32 %v851_v13, %v789_v14  ;;  %v796_v13 = vmul.f32 %v2573_v35, %v2573_v35 }
 0x1d3   :  { %v853_v60 = vadd.f32 %v852_v15, %v790_v19  ;;  %v797_v15 = vmul.f32 %v2577_v48, %v2577_v48 }
 0x1d5   :  { %v854_v11 = vadd.f32 %v853_v60, %v791_v27  ;;  %v798_v60 = vmul.f32 %v2581_v43, %v2581_v43 }
 0x1d7   :  { %v855_v61 = vadd.f32 %v854_v11, %v792_v34  ;;  %v799_v11 = vmul.f32 %v2585_v47, %v2585_v47 }
 0x1d9   :  { %v856_v5 = vadd.f32 %v855_v61, %v793_v39  ;;  %v800_v61 = vmul.f32 %v2589_v41, %v2589_v41  ;;  %v899_v41 = vlaneseq }
 0x1db   :  { %v857_v14 = vadd.f32 %v856_v5, %v794_v37  ;;  %v801_v5 = vmul.f32 %v2593_v45, %v2593_v45 }
 0x1dd   :  { %v858_v19 = vadd.f32 %v857_v14, %v795_v4  ;;  %v802_v14 = vmul.f32 %v2597_v54, %v2597_v54 }
 0x1df   :  { %v859_v27 = vadd.f32 %v858_v19, %v796_v13  ;;  %v803_v19 = vmul.f32 %v2601_v59, %v2601_v59 }
 0x1e1   :  { %v860_v34 = vadd.f32 %v859_v27, %v797_v15  ;;  %v804_v27 = vmul.f32 %v2605_v52, %v2605_v52 }
 0x1e3   :  { %v861_v39 = vadd.f32 %v860_v34, %v798_v60  ;;  %v805_v34 = vmul.f32 %v2609_v57, %v2609_v57 }
 0x1e5   :  { %v862_v37 = vadd.f32 %v861_v39, %v799_v11  ;;  %v806_v39 = vmul.f32 %v2613_v2, %v2613_v2 }
 0x1e7   :  { %v863_v4 = vadd.f32 %v862_v37, %v800_v61  ;;  %v807_v37 = vmul.f32 %v2617_v7, %v2617_v7 }
 0x1e9   :  { %v864_v13 = vadd.f32 %v863_v4, %v801_v5  ;;  %v4051_v4 = vld [vmem:[#allocation22_spill] sm:$0xff] }
 0x1ea   :  { %v808_v59 = vmul.f32 %v4051_v4, %v4051_v4 }
 0x1eb   :  { %v865_v15 = vadd.f32 %v864_v13, %v802_v14  ;;  %v4052_v13 = vld [vmem:[#allocation23_spill] sm:$0xff] }
 0x1ec   :  { %v809_v52 = vmul.f32 %v4052_v13, %v4052_v13 }
 0x1ed   :  { %v866_v60 = vadd.f32 %v865_v15, %v803_v19  ;;  %v4053_v15 = vld [vmem:[#allocation24_spill] sm:$0xff] }
 0x1ee   :  { %v810_v57 = vmul.f32 %v4053_v15, %v4053_v15 }
 0x1ef   :  { %v867_v11 = vadd.f32 %v866_v60, %v804_v27  ;;  %v4054_v60 = vld [vmem:[#allocation25_spill] sm:$0xff] }
 0x1f0   :  { %v811_v2 = vmul.f32 %v4054_v60, %v4054_v60 }
 0x1f1   :  { %v868_v61 = vadd.f32 %v867_v11, %v805_v34  ;;  %v812_v11 = vmul.f32 %v2637_v12, %v2637_v12 }
 0x1f3   :  { %v869_v5 = vadd.f32 %v868_v61, %v806_v39  ;;  %v813_v61 = vmul.f32 %v2641_v17, %v2641_v17 }
 0x1f5   :  { %v870_v14 = vadd.f32 %v869_v5, %v807_v37  ;;  %v814_v5 = vmul.f32 %v2645_v26, %v2645_v26 }
 0x1f7   :  { %v871_v19 = vadd.f32 %v870_v14, %v808_v59  ;;  %v815_v14 = vmul.f32 %v2649_v31, %v2649_v31 }
 0x1f9   :  { %v872_v27 = vadd.f32 %v871_v19, %v809_v52  ;;  %v816_v19 = vmul.f32 %v2653_v24, %v2653_v24 }
 0x1fb   :  { %v873_v34 = vadd.f32 %v872_v27, %v810_v57  ;;  %v817_v27 = vmul.f32 %v2657_v29, %v2657_v29 }
 0x1fd   :  { %v874_v39 = vadd.f32 %v873_v34, %v811_v2  ;;  %v818_v34 = vmul.f32 %v2661_v38, %v2661_v38 }
 0x1ff   :  { %v875_v37 = vadd.f32 %v874_v39, %v812_v11  ;;  %v819_v39 = vmul.f32 %v2665_v0, %v2665_v0 }
 0x201   :  { %v876_v59 = vadd.f32 %v875_v37, %v813_v61  ;;  %v4055_v37 = vld [vmem:[#allocation10_spill] sm:$0xff] }
 0x202   :  { %v820_v12 = vmul.f32 %v4055_v37, %v4055_v37 }
 0x203   :  { %v877_v52 = vadd.f32 %v876_v59, %v814_v5  ;;  %v4056_v59 = vld [vmem:[#allocation5_spill] sm:$0xff] }
 0x204   :  { %v821_v60 = vmul.f32 %v4056_v59, %v4056_v59 }
 0x205   :  { %v878_v57 = vadd.f32 %v877_v52, %v815_v14  ;;  %v4057_v52 = vld [vmem:[#allocation8_spill] sm:$0xff] }
 0x206   :  { %v822_v15 = vmul.f32 %v4057_v52, %v4057_v52 }
 0x207   :  { %v879_v2 = vadd.f32 %v878_v57, %v816_v19  ;;  %v4058_v57 = vld [vmem:[#allocation13_spill] sm:$0xff] }
 0x208   :  { %v823_v13 = vmul.f32 %v4058_v57, %v4058_v57 }
 0x209   :  { %v880_v11 = vadd.f32 %v879_v2, %v817_v27  ;;  %v824_v2 = vmul.f32 %v2685_v8, %v2685_v8 }
 0x20b   :  { %v881_v61 = vadd.f32 %v880_v11, %v818_v34 }
 0x20d   :  { %v882_v5 = vadd.f32 %v881_v61, %v819_v39 }
 0x20f   :  { %v883_v14 = vadd.f32 %v882_v5, %v820_v12 }
 0x211   :  { %v884_v19 = vadd.f32 %v883_v14, %v821_v60  ;;  %v900_v60 = vshrl.u32 %v899_v41, 7 }
 0x213   :  { %v885_v27 = vadd.f32 %v884_v19, %v822_v15  ;;  %v897_v15 = vld [vmem:[%s3920_s2] sm:$0x1]  ;;  %v901_v47 = vsub.s32 0, %v900_v60  ;;  %v4072_v60 = vld [vmem:[#allocation21_spill] sm:$0xff] }
 0x215   :  { %v886_v34 = vadd.f32 %v885_v27, %v823_v13  ;;  %v4069_v27 = vld [vmem:[#allocation18_spill] sm:$0xff] }
 0x217   :  { %v887_v11 = vadd.f32 %v886_v34, %v824_v2 }
 0x219   :  { %v888_v4 = vrot.slane %v887_v11, 4 }
 0x21b   :  { %v889_v7 = vadd.f32 %v888_v4, %v887_v11 }
 0x21d   :  { %v890_v39 = vrot.slane %v889_v7, 2 }
 0x21f   :  { %v891_v61 = vadd.f32 %v890_v39, %v889_v7 }
 0x221   :  { %v892_v54 = vrot.slane %v891_v61, 1 }
 0x223   :  { %v893_v45 = vadd.f32 %v892_v54, %v891_v61 }
 0x225   :  { %v894_v12 = vmul.f32 0.001953125, %v893_v45 }
 0x227   :  { %v895_v5 = vadd.f32 1e-05, %v894_v12 }
 0x229   :  { %2090 = vrsqrt.f32 %v895_v5  ;;  %v4071_v5 = vld [vmem:[#allocation20_spill] sm:$0xff] }
 0x233   :  { %v2091_v14 = vpop.eup %2090 }
 0x234   :  { %v898_v19 = vmul.f32 %v2091_v14, %v897_v15 }
 0x236   :  { %v2818_v13 = vrot.slane %v898_v19, %v901_v47  ;;  %v4073_v19 = vld [vmem:[#allocation6_spill] sm:$0xff] }
 0x238   :  { %v2822_v4 = vmul.f32 %v2818_v13, %v2641_v17  ;;  %v2826_v45 = vmul.f32 %v2818_v13, %v2645_v26  ;;  %v2830_v41 = vmul.f32 %v2818_v13, %v2649_v31  ;;  %v2834_v54 = vmul.f32 %v2818_v13, %v2653_v24 }
 0x239   :  { %v2838_v47 = vmul.f32 %v2818_v13, %v2657_v29  ;;  %v2842_v7 = vmul.f32 %v2818_v13, %v2661_v38  ;;  %v2846_v17 = vmul.f32 %v2818_v13, %v2665_v0  ;;  %v2850_v26 = vmul.f32 %v2818_v13, %v4055_v37  ;;  %v4068_v0 = vld [vmem:[#allocation17_spill] sm:$0xff] }
 0x23a   :  { %4059 = vst [vmem:[#allocation2_spill] sm:$0xff] %v2834_v54  ;;  %v2854_v31 = vmul.f32 %v2818_v13, %v4056_v59  ;;  %v2858_v24 = vmul.f32 %v2818_v13, %v4057_v52  ;;  %v2862_v29 = vmul.f32 %v2818_v13, %v4058_v57  ;;  %v2866_v38 = vmul.f32 %v2818_v13, %v2685_v8  ;;  %v4070_v59 = vld [vmem:[#allocation19_spill] sm:$0xff]  ;;  %v4086_v54 = vld [vmem:[#allocation26_spill] sm:$0xff] }
 0x23b   :  { %4060 = vst [vmem:[#allocation3_spill] sm:$0xff] %v2838_v47  ;;  %4061 = vst [vmem:[#allocation10_spill] sm:$0xff] %v2842_v7  ;;  %v903_v37 = vmul.f32 %v2818_v13, %v4068_v0  ;;  %v904_v2 = vmul.f32 %v2818_v13, %v4069_v27  ;;  %v905_v34 = vmul.f32 %v2818_v13, %v4070_v59  ;;  %v4074_v0 = vld [vmem:[#allocation9_spill] sm:$0xff]  ;;  %v4075_v27 = vld [vmem:[#allocation4_spill] sm:$0xff] }
 0x23c   :  { %4062 = vst [vmem:[#allocation5_spill] sm:$0xff] %v2846_v17  ;;  %4063 = vst [vmem:[#allocation8_spill] sm:$0xff] %v2850_v26  ;;  %v906_v52 = vmul.f32 %v2818_v13, %v2445_v55  ;;  %v907_v57 = vmul.f32 %v2818_v13, %v2449_v36  ;;  %v908_v11 = vmul.f32 %v2818_v13, %v2453_v42  ;;  %v4076_v59 = vld [vmem:[#allocation7_spill] sm:$0xff]  ;;  %v4084_v17 = vld [vmem:[#allocation24_spill] sm:$0xff] }
 0x23d   :  { %4064 = vst [vmem:[#allocation13_spill] sm:$0xff] %v2854_v31  ;;  %4065 = vst [vmem:[#allocation27_spill] sm:$0xff] %v2858_v24  ;;  %v909_v8 = vmul.f32 %v2818_v13, %v2457_v46  ;;  %v910_v39 = vmul.f32 %v2818_v13, %v2461_v40  ;;  %v911_v61 = vmul.f32 %v2818_v13, %v2465_v44  ;;  %v4082_v24 = vld [vmem:[#allocation22_spill] sm:$0xff]  ;;  %v4083_v31 = vld [vmem:[#allocation23_spill] sm:$0xff] }
 0x23e   :  { %4066 = vst [vmem:[#allocation28_spill] sm:$0xff] %v2862_v29  ;;  %4067 = vst [vmem:[#allocation29_spill] sm:$0xff] %v2866_v38  ;;  %v912_v12 = vmul.f32 %v2818_v13, %v2469_v53  ;;  %v913_v55 = vmul.f32 %v2818_v13, %v2473_v58  ;;  %v914_v36 = vmul.f32 %v2818_v13, %v2477_v50  ;;  %v4080_v38 = vld [vmem:[#allocation14_spill] sm:$0xff]  ;;  %v4081_v29 = vld [vmem:[#allocation16_spill] sm:$0xff] }
 0x23f   :  { %v915_v42 = vmul.f32 %v2818_v13, %v2481_v56  ;;  %v916_v46 = vmul.f32 %v2818_v13, %v2485_v1  ;;  %v917_v40 = vmul.f32 %v2818_v13, %v2489_v6  ;;  %v918_v44 = vmul.f32 %v2818_v13, %v2493_v62  ;;  %v4085_v47 = vld [vmem:[#allocation25_spill] sm:$0xff] }
 0x240   :  { %v919_v53 = vmul.f32 %v2818_v13, %v4071_v5  ;;  %v920_v58 = vmul.f32 %v2818_v13, %v4072_v60  ;;  %v921_v50 = vmul.f32 %v2818_v13, %v2505_v18  ;;  %v922_v56 = vmul.f32 %v2818_v13, %v2509_v10  ;;  %v4077_v5 = vld [vmem:[#allocation12_spill] sm:$0xff] }
 0x241   :  { %v923_v1 = vmul.f32 %v2818_v13, %v2513_v16  ;;  %v924_v6 = vmul.f32 %v2818_v13, %v4049_v21  ;;  %v925_v62 = vmul.f32 %v2818_v13, %v4050_v3  ;;  %v926_v14 = vmul.f32 %v2818_v13, %v2525_v20 }
 0x242   :  { %v927_v15 = vmul.f32 %v2818_v13, %v2529_v23  ;;  %v928_v18 = vmul.f32 %v2818_v13, %v2533_v28  ;;  %v929_v10 = vmul.f32 %v2818_v13, %v2537_v9  ;;  %v930_v16 = vmul.f32 %v2818_v13, %v2541_v32 }
 0x243   :  { %v931_v21 = vmul.f32 %v2818_v13, %v2545_v33  ;;  %v932_v3 = vmul.f32 %v2818_v13, %v2549_v63  ;;  %v933_v20 = vmul.f32 %v2818_v13, %v2553_v49  ;;  %v934_v23 = vmul.f32 %v2818_v13, %v2557_v22 }
 0x244   :  { %v935_v28 = vmul.f32 %v2818_v13, %v2561_v25  ;;  %v936_v9 = vmul.f32 %v2818_v13, %v2565_v30  ;;  %v937_v32 = vmul.f32 %v2818_v13, %v2569_v51  ;;  %v938_v33 = vmul.f32 %v2818_v13, %v2573_v35 }
 0x245   :  { %v939_v63 = vmul.f32 %v2818_v13, %v2577_v48  ;;  %v940_v49 = vmul.f32 %v2818_v13, %v2581_v43  ;;  %v941_v22 = vmul.f32 %v2818_v13, %v4073_v19  ;;  %v942_v25 = vmul.f32 %v2818_v13, %v4074_v0  ;;  %v2957_v48 = vld [vmem:[%s3921_s3] ss:$0 sm:$0xff]  ;;  %v4078_v43 = vld [vmem:[#allocation15_spill] sm:$0xff] }
 0x246   :  { %v943_v30 = vmul.f32 %v2818_v13, %v4075_v27  ;;  %v944_v51 = vmul.f32 %v2818_v13, %v4076_v59  ;;  %v945_v35 = vmul.f32 %v2818_v13, %v4077_v5  ;;  %v946_v60 = vmul.f32 %v2818_v13, %v4078_v43  ;;  %v4079_v19 = vld [vmem:[#allocation11_spill] sm:$0xff] }
 0x247   :  { %v947_v0 = vmul.f32 %v2818_v13, %v4079_v19  ;;  %v948_v27 = vmul.f32 %v2818_v13, %v4080_v38  ;;  %v949_v59 = vmul.f32 %v2818_v13, %v4081_v29  ;;  %v950_v5 = vmul.f32 %v2818_v13, %v4082_v24 }
 0x248   :  { %v951_v26 = vmul.f32 %v2818_v13, %v4083_v31  ;;  %v952_v7 = vmul.f32 %v2818_v13, %v4084_v17  ;;  %v953_v43 = vmul.f32 %v2818_v13, %v4085_v47  ;;  %v954_v19 = vmul.f32 %v2818_v13, %v4086_v54 }
 0x249   :  { %v2978_v38 = vadd.f32 %v2957_v48, %v903_v37  ;;  %v2981_v29 = vadd.f32 %v2957_v48, %v904_v2  ;;  %v2984_v24 = vadd.f32 %v2957_v48, %v905_v34  ;;  %v2987_v31 = vadd.f32 %v2957_v48, %v906_v52 }
 0x24a   :  { %v2990_v17 = vadd.f32 %v2957_v48, %v907_v57  ;;  %v2993_v47 = vadd.f32 %v2957_v48, %v908_v11  ;;  %v2996_v13 = vadd.f32 %v2957_v48, %v909_v8  ;;  %v2999_v54 = vadd.f32 %v2957_v48, %v910_v39 }
 0x24b   :  { %v3002_v37 = vadd.f32 %v2957_v48, %v911_v61  ;;  %v3005_v2 = vadd.f32 %v2957_v48, %v912_v12  ;;  %v3008_v34 = vadd.f32 %v2957_v48, %v913_v55  ;;  %v3011_v52 = vadd.f32 %v2957_v48, %v914_v36 }
 0x24c   :  { %v3014_v57 = vadd.f32 %v2957_v48, %v915_v42  ;;  %v3017_v11 = vadd.f32 %v2957_v48, %v916_v46  ;;  %v3020_v8 = vadd.f32 %v2957_v48, %v917_v40  ;;  %v3023_v39 = vadd.f32 %v2957_v48, %v918_v44 }
 0x24d   :  { %v3026_v61 = vadd.f32 %v2957_v48, %v919_v53  ;;  %v3029_v12 = vadd.f32 %v2957_v48, %v920_v58  ;;  %v3032_v55 = vadd.f32 %v2957_v48, %v921_v50  ;;  %v3035_v36 = vadd.f32 %v2957_v48, %v922_v56 }
 0x24e   :  { %v3038_v42 = vadd.f32 %v2957_v48, %v923_v1  ;;  %v3041_v46 = vadd.f32 %v2957_v48, %v924_v6  ;;  %v3044_v40 = vadd.f32 %v2957_v48, %v925_v62  ;;  %v3047_v44 = vadd.f32 %v2957_v48, %v926_v14 }
 0x24f   :  { %v3050_v53 = vadd.f32 %v2957_v48, %v927_v15  ;;  %v3053_v58 = vadd.f32 %v2957_v48, %v928_v18  ;;  %v3056_v50 = vadd.f32 %v2957_v48, %v929_v10  ;;  %v3059_v56 = vadd.f32 %v2957_v48, %v930_v16 }
 0x250   :  { %v3062_v1 = vadd.f32 %v2957_v48, %v931_v21  ;;  %v3065_v6 = vadd.f32 %v2957_v48, %v932_v3  ;;  %v3068_v62 = vadd.f32 %v2957_v48, %v933_v20  ;;  %v3071_v14 = vadd.f32 %v2957_v48, %v934_v23 }
 0x251   :  { %v3074_v15 = vadd.f32 %v2957_v48, %v935_v28  ;;  %v3077_v18 = vadd.f32 %v2957_v48, %v936_v9  ;;  %v3080_v10 = vadd.f32 %v2957_v48, %v937_v32  ;;  %v3083_v16 = vadd.f32 %v2957_v48, %v938_v33 }
 0x252   :  { %v3086_v21 = vadd.f32 %v2957_v48, %v939_v63  ;;  %v3089_v3 = vadd.f32 %v2957_v48, %v940_v49  ;;  %v3092_v20 = vadd.f32 %v2957_v48, %v941_v22  ;;  %v3095_v23 = vadd.f32 %v2957_v48, %v942_v25 }
 0x253   :  { %v3098_v28 = vadd.f32 %v2957_v48, %v943_v30  ;;  %v3101_v9 = vadd.f32 %v2957_v48, %v944_v51  ;;  %v3104_v32 = vadd.f32 %v2957_v48, %v945_v35  ;;  %v3107_v33 = vadd.f32 %v2957_v48, %v946_v60 }
 0x254   :  { %v3110_v63 = vadd.f32 %v2957_v48, %v947_v0  ;;  %v3113_v49 = vadd.f32 %v2957_v48, %v948_v27  ;;  %v3116_v22 = vadd.f32 %v2957_v48, %v949_v59  ;;  %v3119_v25 = vadd.f32 %v2957_v48, %v950_v5  ;;  %v4097_v5 = vld [vmem:[#allocation3_spill] sm:$0xff] }
 0x255   :  { %v3122_v30 = vadd.f32 %v2957_v48, %v951_v26  ;;  %v3125_v51 = vadd.f32 %v2957_v48, %v952_v7  ;;  %v3128_v35 = vadd.f32 %v2957_v48, %v953_v43  ;;  %v3131_v60 = vadd.f32 %v2957_v48, %v954_v19  ;;  %v4095_v7 = vld [vmem:[#allocation2_spill] sm:$0xff] }
 0x256   :  { %4087 = vst [vmem:[#allocation17_spill] sm:$0xff] %v3113_v49  ;;  %v3135_v0 = vadd.f32 %v2957_v48, %v2822_v4  ;;  %v3139_v27 = vadd.f32 %v2957_v48, %v2826_v45  ;;  %v3143_v26 = vadd.f32 %v2957_v48, %v2830_v41  ;;  %v3147_v59 = vadd.f32 %v2957_v48, %v4095_v7  ;;  %v4099_v19 = vld [vmem:[#allocation10_spill] sm:$0xff] }
 0x257   :  { %4088 = vst [vmem:[#allocation18_spill] sm:$0xff] %v3122_v30  ;;  %4089 = vst [vmem:[#allocation19_spill] sm:$0xff] %v3125_v51  ;;  %v3151_v43 = vadd.f32 %v2957_v48, %v4097_v5  ;;  %v3155_v4 = vadd.f32 %v2957_v48, %v4099_v19  ;;  %vm1038_vm0 = vcmp.ge.f32.partialorder %v2978_v38, 0.0  ;;  %vm1039_vm1 = vcmp.ge.f32.partialorder %v2981_v29, 0.0 }
 0x258   :  { %4090 = vst [vmem:[#allocation20_spill] sm:$0xff] %v3128_v35  ;;  %4091 = vst [vmem:[#allocation21_spill] sm:$0xff] %v3131_v60  ;;  %vm1040_vm2 = vcmp.ge.f32.partialorder %v2984_v24, 0.0  ;;  %vm1041_vm3 = vcmp.ge.f32.partialorder %v2987_v31, 0.0  ;;  %vm1042_vm4 = vcmp.ge.f32.partialorder %v2990_v17, 0.0  ;;  %vm1043_vm5 = vcmp.ge.f32.partialorder %v2993_v47, 0.0 }
 0x259   :  { %4092 = vst [vmem:[#allocation6_spill] sm:$0xff] %v3135_v0  ;;  %4093 = vst [vmem:[#allocation9_spill] sm:$0xff] %v3139_v27  ;;  %v4101_v0 = vld [vmem:[#allocation5_spill] sm:$0xff]  ;;  %v4103_v27 = vld [vmem:[#allocation8_spill] sm:$0xff]  ;;  %vm1044_vm6 = vcmp.ge.f32.partialorder %v2996_v13, 0.0  ;;  %vm1045_vm7 = vcmp.ge.f32.partialorder %v2999_v54, 0.0 }
 0x25a   :  { %4094 = vst [vmem:[#allocation4_spill] sm:$0xff] %v3143_v26  ;;  %4096 = vst [vmem:[#allocation7_spill] sm:$0xff] %v3147_v59  ;;  %v3159_v45 = vadd.f32 %v2957_v48, %v4101_v0  ;;  %v3163_v41 = vadd.f32 %v2957_v48, %v4103_v27  ;;  %v4105_v26 = vld [vmem:[#allocation13_spill] sm:$0xff]  ;;  %v4107_v59 = vld [vmem:[#allocation27_spill] sm:$0xff]  ;;  %vm1046_vm8 = vcmp.ge.f32.partialorder %v3002_v37, 0.0  ;;  %vm1047_vm9 = vcmp.ge.f32.partialorder %v3005_v2, 0.0 }
 0x25b   :  { %4098 = vst [vmem:[#allocation12_spill] sm:$0xff] %v3151_v43  ;;  %4100 = vst [vmem:[#allocation15_spill] sm:$0xff] %v3155_v4  ;;  %v3167_v7 = vadd.f32 %v2957_v48, %v4105_v26  ;;  %v3171_v5 = vadd.f32 %v2957_v48, %v4107_v59  ;;  %v4109_v0 = vld [vmem:[#allocation28_spill] sm:$0xff]  ;;  %v1102_v26 = vmul.f32 0.2, %v2978_v38  ;;  %vm1048_vm10 = vcmp.ge.f32.partialorder %v3008_v34, 0.0 }
 0x25c   :  { %4102 = vst [vmem:[#allocation11_spill] sm:$0xff] %v3159_v45  ;;  %4104 = vst [vmem:[#allocation14_spill] sm:$0xff] %v3163_v41  ;;  %v3184_v27 = vadd.f32 %v2957_v48, %v4109_v0  ;;  %v1103_v59 = vmul.f32 0.2, %v2981_v29  ;;  %v1104_v19 = vmul.f32 0.2, %v2984_v24 }
 0x25d   :  { %4106 = vst [vmem:[#allocation16_spill] sm:$0xff] %v3167_v7  ;;  %4108 = vst [vmem:[#allocation22_spill] sm:$0xff] %v3171_v5  ;;  %v4111_v5 = vld [vmem:[#allocation29_spill] sm:$0xff]  ;;  %v1105_v41 = vmul.f32 0.2, %v2987_v31  ;;  %vm1049_vm11 = vcmp.ge.f32.partialorder %v3011_v52, 0.0 }
 0x25e   :  { %4110 = vst [vmem:[#allocation23_spill] sm:$0xff] %v3184_v27  ;;  %v3192_v7 = vadd.f32 %v2957_v48, %v4111_v5  ;;  %v1106_v45 = vmul.f32 0.2, %v2990_v17  ;;  %v1107_v0 = vmul.f32 0.2, %v2993_v47  ;;  %v3205_v48 = vsel %vm1038_vm0, %v2978_v38, %v1102_v26 }
 0x25f   :  { %v1108_v27 = vmul.f32 0.2, %v2996_v13  ;;  %v1109_v4 = vmul.f32 0.2, %v2999_v54  ;;  %v1110_v43 = vmul.f32 0.2, %v3002_v37  ;;  %v3216_v35 = vsel %vm1039_vm1, %v2981_v29, %v1103_v59 }
 0x260   :  { %4112 = vst [vmem:[#allocation24_spill] sm:$0xff] %v3192_v7  ;;  %4113 = vst [vmem:[#allocation25_spill] sm:$0xff] %v3205_v48  ;;  %vm1050_vm12 = vcmp.ge.f32.partialorder %v3014_v57, 0.0  ;;  %v1111_v5 = vmul.f32 0.2, %v3005_v2  ;;  %vm1051_vm13 = vcmp.ge.f32.partialorder %v3017_v11, 0.0  ;;  %v3231_v48 = vsel %vm1040_vm2, %v2984_v24, %v1104_v19 }
 0x261   :  { %v1112_v7 = vmul.f32 0.2, %v3008_v34  ;;  %v3211_v60 = vmul.f32 0.2, %v3011_v52  ;;  %4114 = vst [vmem:[#allocation26_spill] sm:$0xff] %v3216_v35  ;;  %4116 = vst [vmem:[#allocation3_spill] sm:$0xff] %v3231_v48 }
 0x262   :  { %v3220_v51 = vmul.f32 0.2, %v3014_v57  ;;  %v3223_v38 = vmul.f32 0.2, %v3017_v11  ;;  %v3226_v26 = vmul.f32 0.2, %v3020_v8 }
 0x263   :  { %vm1052_vm14 = vcmp.ge.f32.partialorder %v3020_v8, 0.0  ;;  %v3235_v29 = vmul.f32 0.2, %v3023_v39  ;;  %v3238_v59 = vmul.f32 0.2, %v3026_v61  ;;  %vm1053_vm15 = vcmp.ge.f32.partialorder %v3023_v39, 0.0 }
 0x264   :  { %4115 = vst [vmem:[#allocation2_spill] sm:$0xff] %v3226_v26  ;;  %v3241_v35 = vmul.f32 0.2, %v3029_v12  ;;  %v3246_v26 = vsel %vm1041_vm3, %v2987_v31, %v1105_v41  ;;  %v3250_v24 = vmul.f32 0.2, %v3032_v55  ;;  %vm1054_vm0 = vcmp.ge.f32.partialorder %v3026_v61, 0.0 }
 0x265   :  { %4118 = vst [vmem:[#allocation5_spill] sm:$0xff] %v3246_v26  ;;  %v3253_v19 = vmul.f32 0.2, %v3035_v36  ;;  %v3256_v48 = vmul.f32 0.2, %v3038_v42  ;;  %vm1055_vm1 = vcmp.ge.f32.partialorder %v3029_v12, 0.0 }
 0x266   :  { %4117 = vst [vmem:[#allocation10_spill] sm:$0xff] %v3241_v35  ;;  %v3261_v35 = vsel %vm1042_vm4, %v2990_v17, %v1106_v45  ;;  %v3265_v31 = vmul.f32 0.2, %v3041_v46  ;;  %v3268_v41 = vmul.f32 0.2, %v3044_v40  ;;  %vm1056_vm2 = vcmp.ge.f32.partialorder %v3032_v55, 0.0 }
 0x267   :  { %4119 = vst [vmem:[#allocation8_spill] sm:$0xff] %v3256_v48  ;;  %4120 = vst [vmem:[#allocation13_spill] sm:$0xff] %v3261_v35  ;;  %v3271_v26 = vmul.f32 0.2, %v3047_v44  ;;  %v3276_v48 = vsel %vm1043_vm5, %v2993_v47, %v1107_v0  ;;  %v3280_v17 = vmul.f32 0.2, %v3050_v53 }
 0x268   :  { %4122 = vst [vmem:[#allocation28_spill] sm:$0xff] %v3276_v48  ;;  %v3283_v45 = vmul.f32 0.2, %v3053_v58  ;;  %v3286_v35 = vmul.f32 0.2, %v3056_v50  ;;  %vm1057_vm3 = vcmp.ge.f32.partialorder %v3035_v36, 0.0 }
 0x269   :  { %4121 = vst [vmem:[#allocation27_spill] sm:$0xff] %v3271_v26  ;;  %v3291_v26 = vsel %vm1044_vm6, %v2996_v13, %v1108_v27  ;;  %v3295_v47 = vmul.f32 0.2, %v3059_v56  ;;  %v3298_v0 = vmul.f32 0.2, %v3062_v1  ;;  %vm1060_vm6 = vcmp.ge.f32.partialorder %v3044_v40, 0.0 }
 0x26a   :  { %4123 = vst [vmem:[#allocation29_spill] sm:$0xff] %v3286_v35  ;;  %4124 = vst [vmem:[#allocation30_spill] sm:$0xff] %v3291_v26  ;;  %v3301_v48 = vmul.f32 0.2, %v3065_v6  ;;  %v3306_v35 = vsel %vm1045_vm7, %v2999_v54, %v1109_v4  ;;  %v3312_v13 = vmul.f32 0.2, %v3068_v62  ;;  %v3323_v54 = vsel %vm1046_vm8, %v3002_v37, %v1110_v43 }
 0x26b   :  { %4125 = vst [vmem:[#allocation31_spill] sm:$0xff] %v3306_v35  ;;  %v3315_v27 = vmul.f32 0.2, %v3071_v14  ;;  %v3318_v26 = vmul.f32 0.2, %v3074_v15  ;;  %4127 = vst [vmem:[#allocation33_spill] sm:$0xff] %v3323_v54  ;;  %v3341_v37 = vsel %vm1047_vm9, %v3005_v2, %v1111_v5  ;;  %v3359_v2 = vsel %vm1048_vm10, %v3008_v34, %v1112_v7 }
 0x26c   :  { %v3330_v4 = vmul.f32 0.2, %v3077_v18  ;;  %v3333_v35 = vmul.f32 0.2, %v3080_v10  ;;  %4129 = vst [vmem:[#allocation35_spill] sm:$0xff] %v3341_v37  ;;  %vm1064_vm8 = vcmp.ge.f32.partialorder %v3056_v50, 0.0  ;;  %v3378_v34 = vsel %vm1049_vm11, %v3011_v52, %v3211_v60 }
 0x26d   :  { %4126 = vst [vmem:[#allocation32_spill] sm:$0xff] %v3318_v26  ;;  %v3336_v26 = vmul.f32 0.2, %v3083_v16  ;;  %v3348_v43 = vmul.f32 0.2, %v3086_v21  ;;  %4131 = vst [vmem:[#allocation37_spill] sm:$0xff] %v3359_v2  ;;  %v3397_v52 = vsel %vm1050_vm12, %v3014_v57, %v3220_v51  ;;  %v3416_v57 = vsel %vm1051_vm13, %v3017_v11, %v3223_v38 }
 0x26e   :  { %v3351_v54 = vmul.f32 0.2, %v3089_v3  ;;  %vm1068_vm9 = vcmp.ge.f32.partialorder %v3068_v62, 0.0  ;;  %v3366_v5 = vmul.f32 0.2, %v3095_v23  ;;  %4133 = vst [vmem:[#allocation39_spill] sm:$0xff] %v3378_v34 }
 0x26f   :  { %4128 = vst [vmem:[#allocation34_spill] sm:$0xff] %v3336_v26  ;;  %v3354_v26 = vmul.f32 0.2, %v3092_v20  ;;  %v3369_v37 = vmul.f32 0.2, %v3098_v28  ;;  %vm1072_vm10 = vcmp.ge.f32.partialorder %v3080_v10, 0.0 }
 0x270   :  { %v3385_v7 = vmul.f32 0.2, %v3104_v32  ;;  %v3388_v2 = vmul.f32 0.2, %v3107_v33  ;;  %4136 = vst [vmem:[#allocation42_spill] sm:$0xff] %v3397_v52  ;;  %vm1076_vm11 = vcmp.ge.f32.partialorder %v3092_v20, 0.0 }
 0x271   :  { %4130 = vst [vmem:[#allocation36_spill] sm:$0xff] %v3354_v26  ;;  %v3372_v26 = vmul.f32 0.2, %v3101_v9  ;;  %v3404_v60 = vmul.f32 0.2, %v3113_v49  ;;  %4140 = vst [vmem:[#allocation46_spill] sm:$0xff] %v3416_v57 }
 0x272   :  { %4134 = vst [vmem:[#allocation40_spill] sm:$0xff] %v3388_v2  ;;  %v3407_v34 = vmul.f32 0.2, %v3116_v22  ;;  %vm1080_vm12 = vcmp.ge.f32.partialorder %v3104_v32, 0.0  ;;  %v3423_v51 = vmul.f32 0.2, %v3122_v30 }
 0x273   :  { %4132 = vst [vmem:[#allocation38_spill] sm:$0xff] %v3372_v26  ;;  %v3391_v26 = vmul.f32 0.2, %v3110_v63  ;;  %4137 = vst [vmem:[#allocation43_spill] sm:$0xff] %v3404_v60  ;;  %v4142_v52 = vld [vmem:[#allocation19_spill] sm:$0xff]  ;;  %v4146_v2 = vld [vmem:[#allocation2_spill] sm:$0xff] }
 0x274   :  { %4138 = vst [vmem:[#allocation44_spill] sm:$0xff] %v3407_v34  ;;  %4141 = vst [vmem:[#allocation47_spill] sm:$0xff] %v3423_v51  ;;  %v3426_v34 = vmul.f32 0.2, %v4142_v52  ;;  %v3435_v11 = vsel %vm1052_vm14, %v3020_v8, %v4146_v2  ;;  %vm1084_vm13 = vcmp.ge.f32.partialorder %v3116_v22, 0.0  ;;  %v4148_v38 = vld [vmem:[#allocation21_spill] sm:$0xff]  ;;  %v3454_v8 = vsel %vm1053_vm15, %v3023_v39, %v3235_v29 }
 0x275   :  { %4135 = vst [vmem:[#allocation41_spill] sm:$0xff] %v3391_v26  ;;  %v3410_v26 = vmul.f32 0.2, %v3119_v25  ;;  %4147 = vst [vmem:[#allocation2_spill] sm:$0xff] %v3435_v11  ;;  %v3442_v57 = vmul.f32 0.2, %v4148_v38  ;;  %v3467_v39 = vsel %vm1054_vm0, %v3026_v61, %v3238_v59 }
 0x276   :  { %4143 = vst [vmem:[#allocation48_spill] sm:$0xff] %v3426_v34  ;;  %v4150_v34 = vld [vmem:[#allocation6_spill] sm:$0xff]  ;;  %4154 = vst [vmem:[#allocation53_spill] sm:$0xff] %v3454_v8  ;;  %v4155_v2 = vld [vmem:[#allocation4_spill] sm:$0xff]  ;;  %vm4169_vm7 = vcmp.ge.f32.partialorder %v3038_v42, 0.0 }
 0x277   :  { %4139 = vst [vmem:[#allocation45_spill] sm:$0xff] %v3410_v26  ;;  %v4144_v26 = vld [vmem:[#allocation20_spill] sm:$0xff]  ;;  %4149 = vst [vmem:[#allocation50_spill] sm:$0xff] %v3442_v57  ;;  %v3445_v51 = vmul.f32 0.2, %v4150_v34  ;;  %vm1092_vm15 = vcmp.ge.f32.partialorder %v4155_v2, 0.0 }
 0x278   :  { %v3429_v60 = vmul.f32 0.2, %v4144_v26  ;;  %vm1088_vm14 = vcmp.ge.f32.partialorder %v4144_v26, 0.0  ;;  %v1156_v11 = vmul.f32 0.2, %v4155_v2  ;;  %v4157_v52 = vld [vmem:[#allocation12_spill] sm:$0xff] }
 0x279   :  { %4151 = vst [vmem:[#allocation51_spill] sm:$0xff] %v3445_v51  ;;  %v4156_v51 = vld [vmem:[#allocation7_spill] sm:$0xff]  ;;  %4158 = vst [vmem:[#allocation54_spill] sm:$0xff] %v3467_v39  ;;  %v4161_v38 = vld [vmem:[#allocation14_spill] sm:$0xff] }
 0x27a   :  { %4145 = vst [vmem:[#allocation49_spill] sm:$0xff] %v3429_v60  ;;  %v4152_v60 = vld [vmem:[#allocation9_spill] sm:$0xff]  ;;  %v1157_v57 = vmul.f32 0.2, %v4156_v51  ;;  %v4159_v29 = vld [vmem:[#allocation15_spill] sm:$0xff]  ;;  %v4162_v30 = vld [vmem:[#allocation10_spill] sm:$0xff] }
 0x27b   :  { %v3448_v49 = vmul.f32 0.2, %v4152_v60  ;;  %v1159_v8 = vmul.f32 0.2, %v4159_v29  ;;  %v4160_v60 = vld [vmem:[#allocation11_spill] sm:$0xff]  ;;  %v3480_v61 = vsel %vm1055_vm1, %v3029_v12, %v4162_v30  ;;  %v4164_v59 = vld [vmem:[#allocation16_spill] sm:$0xff]  ;;  %v3493_v12 = vsel %vm1056_vm2, %v3032_v55, %v3250_v24 }
 0x27c   :  { %v1160_v34 = vmul.f32 0.2, %v4160_v60  ;;  %v1161_v26 = vmul.f32 0.2, %v4161_v38  ;;  %4163 = vst [vmem:[#allocation11_spill] sm:$0xff] %v3480_v61  ;;  %vm1096_vm0 = vcmp.ge.f32.partialorder %v4160_v60, 0.0  ;;  %v3520_v24 = vsel %vm1060_vm6, %v3044_v40, %v3268_v41 }
 0x27d   :  { %4153 = vst [vmem:[#allocation52_spill] sm:$0xff] %v3448_v49  ;;  %v1158_v49 = vmul.f32 0.2, %v4157_v52  ;;  %vm1098_vm4 = vcmp.ge.f32.partialorder %v4164_v59, 0.0  ;;  %v4165_v39 = vld [vmem:[#allocation22_spill] sm:$0xff]  ;;  %v4166_v51 = vld [vmem:[#allocation23_spill] sm:$0xff] }
 0x27e   :  { %v1162_v29 = vmul.f32 0.2, %v4164_v59  ;;  %v1163_v52 = vmul.f32 0.2, %v4165_v39  ;;  %v1164_v2 = vmul.f32 0.2, %v4166_v51  ;;  %v3502_v59 = vsel %vm1057_vm3, %v3035_v36, %v3253_v19 }
 0x27f   :  { %vm1100_vm1 = vcmp.ge.f32.partialorder %v4166_v51, 0.0  ;;  %v4167_v30 = vld [vmem:[#allocation24_spill] sm:$0xff]  ;;  %vm4170_vm2 = vcmp.ge.f32.partialorder %v3041_v46, 0.0  ;;  %v4171_v36 = vld [vmem:[#allocation27_spill] sm:$0xff]  ;;  %vm4172_vm3 = vcmp.ge.f32.partialorder %v3047_v44, 0.0  ;;  %v4175_v40 = vld [vmem:[#allocation29_spill] sm:$0xff] }
 0x280   :  { %vm1101_vm5 = vcmp.ge.f32.partialorder %v4167_v30, 0.0  ;;  %v1165_v61 = vmul.f32 0.2, %v4167_v30  ;;  %v4168_v39 = vld [vmem:[#allocation8_spill] sm:$0xff]  ;;  %v3514_v55 = vsel %vm4170_vm2, %v3041_v46, %v3265_v31  ;;  %v3526_v19 = vsel %vm4172_vm3, %v3047_v44, %v4171_v36 }
 0x281   :  { %v3508_v38 = vsel %vm4169_vm7, %v3038_v42, %v4168_v39  ;;  %vm4173_vm7 = vcmp.ge.f32.partialorder %v3050_v53, 0.0  ;;  %vm4174_vm2 = vcmp.ge.f32.partialorder %v3053_v58, 0.0  ;;  %v3544_v31 = vsel %vm1064_vm8, %v3056_v50, %v4175_v40  ;;  %v4209_v39 = vld [vmem:[#allocation20_spill] sm:$0xff]  ;;  %v4211_v40 = vld [vmem:[#allocation21_spill] sm:$0xff] }
 0x282   :  { %v3532_v42 = vsel %vm4173_vm7, %v3050_v53, %v3280_v17  ;;  %v3538_v46 = vsel %vm4174_vm2, %v3053_v58, %v3283_v45  ;;  %vm4176_vm6 = vcmp.ge.f32.partialorder %v3059_v56, 0.0  ;;  %vm4177_vm3 = vcmp.ge.f32.partialorder %v3062_v1, 0.0 }
 0x283   :  { %v3550_v44 = vsel %vm4176_vm6, %v3059_v56, %v3295_v47  ;;  %v3556_v53 = vsel %vm4177_vm3, %v3062_v1, %v3298_v0  ;;  %vm4178_vm7 = vcmp.ge.f32.partialorder %v3065_v6, 0.0  ;;  %v3568_v50 = vsel %vm1068_vm9, %v3068_v62, %v3312_v13  ;;  %v4180_v1 = vld [vmem:[#allocation32_spill] sm:$0xff]  ;;  %v4197_v0 = vld [vmem:[#allocation17_spill] sm:$0xff] }
 0x284   :  { %v3562_v58 = vsel %vm4178_vm7, %v3065_v6, %v3301_v48  ;;  %vm4179_vm8 = vcmp.ge.f32.partialorder %v3071_v14, 0.0  ;;  %vm4181_vm2 = vcmp.ge.f32.partialorder %v3074_v15, 0.0  ;;  %vm4182_vm6 = vcmp.ge.f32.partialorder %v3077_v18, 0.0 }
 0x285   :  { %v3574_v56 = vsel %vm4179_vm8, %v3071_v14, %v3315_v27  ;;  %v3580_v41 = vsel %vm4181_vm2, %v3074_v15, %v4180_v1  ;;  %v3586_v6 = vsel %vm4182_vm6, %v3077_v18, %v3330_v4  ;;  %v3592_v62 = vsel %vm1072_vm10, %v3080_v10, %v3333_v35  ;;  %v4183_v14 = vld [vmem:[#allocation34_spill] sm:$0xff]  ;;  %v4187_v10 = vld [vmem:[#allocation36_spill] sm:$0xff] }
 0x286   :  { %vm4184_vm9 = vcmp.ge.f32.partialorder %v3083_v16, 0.0  ;;  %vm4185_vm3 = vcmp.ge.f32.partialorder %v3086_v21, 0.0  ;;  %vm4186_vm7 = vcmp.ge.f32.partialorder %v3089_v3, 0.0  ;;  %v3616_v35 = vsel %vm1076_vm11, %v3092_v20, %v4187_v10  ;;  %v4203_v4 = vld [vmem:[#allocation18_spill] sm:$0xff] }
 0x287   :  { %v3598_v48 = vsel %vm4184_vm9, %v3083_v16, %v4183_v14  ;;  %v3604_v15 = vsel %vm4185_vm3, %v3086_v21, %v3348_v43  ;;  %v3610_v18 = vsel %vm4186_vm7, %v3089_v3, %v3351_v54  ;;  %vm4188_vm10 = vcmp.ge.f32.partialorder %v3095_v23, 0.0  ;;  %v4190_v3 = vld [vmem:[#allocation38_spill] sm:$0xff]  ;;  %v4205_v43 = vld [vmem:[#allocation48_spill] sm:$0xff]  ;;  %v4213_v14 = vld [vmem:[#allocation51_spill] sm:$0xff] }
 0x288   :  { %v3622_v16 = vsel %vm4188_vm10, %v3095_v23, %v3366_v5  ;;  %vm4189_vm8 = vcmp.ge.f32.partialorder %v3098_v28, 0.0  ;;  %vm4191_vm2 = vcmp.ge.f32.partialorder %v3101_v9, 0.0  ;;  %v3640_v20 = vsel %vm1080_vm12, %v3104_v32, %v3385_v7  ;;  %v4192_v23 = vld [vmem:[#allocation40_spill] sm:$0xff]  ;;  %v4206_v5 = vld [vmem:[#allocation19_spill] sm:$0xff]  ;;  %v4214_v10 = vld [vmem:[#allocation6_spill] sm:$0xff] }
 0x289   :  { %v3628_v21 = vsel %vm4189_vm8, %v3098_v28, %v3369_v37  ;;  %v3634_v17 = vsel %vm4191_vm2, %v3101_v9, %v4190_v3  ;;  %vm4193_vm11 = vcmp.ge.f32.partialorder %v3107_v33, 0.0  ;;  %v4194_v28 = vld [vmem:[#allocation41_spill] sm:$0xff]  ;;  %vm4195_vm6 = vcmp.ge.f32.partialorder %v3110_v63, 0.0  ;;  %v4196_v9 = vld [vmem:[#allocation43_spill] sm:$0xff]  ;;  %v4199_v32 = vld [vmem:[#allocation44_spill] sm:$0xff] }
 0x28a   :  { %v3646_v45 = vsel %vm4193_vm11, %v3107_v33, %v4192_v23  ;;  %v3652_v47 = vsel %vm4195_vm6, %v3110_v63, %v4194_v28  ;;  %vm4198_vm9 = vcmp.ge.f32.partialorder %v4197_v0, 0.0  ;;  %v3664_v27 = vsel %vm1084_vm13, %v3116_v22, %v4199_v32  ;;  %v4200_v33 = vld [vmem:[#allocation45_spill] sm:$0xff]  ;;  %v4202_v63 = vld [vmem:[#allocation47_spill] sm:$0xff]  ;;  %v4216_v23 = vld [vmem:[#allocation52_spill] sm:$0xff] }
 0x28b   :  { %v3658_v13 = vsel %vm4198_vm9, %v4197_v0, %v4196_v9  ;;  %vm4201_vm12 = vcmp.ge.f32.partialorder %v3119_v25, 0.0  ;;  %vm4204_vm3 = vcmp.ge.f32.partialorder %v4203_v4, 0.0  ;;  %vm4207_vm7 = vcmp.ge.f32.partialorder %v4206_v5, 0.0  ;;  %v4208_v22 = vld [vmem:[#allocation49_spill] sm:$0xff]  ;;  %v4219_v0 = vld [vmem:[#allocation4_spill] sm:$0xff] }
 0x28c   :  { %v3670_v54 = vsel %vm4201_vm12, %v3119_v25, %v4200_v33  ;;  %v3676_v37 = vsel %vm4204_vm3, %v4203_v4, %v4202_v63  ;;  %v3682_v7 = vsel %vm4207_vm7, %v4206_v5, %v4205_v43  ;;  %v3688_v36 = vsel %vm1088_vm14, %v4209_v39, %v4208_v22  ;;  %v4210_v25 = vld [vmem:[#allocation50_spill] sm:$0xff]  ;;  %v4217_v28 = vld [vmem:[#allocation9_spill] sm:$0xff]  ;;  %v4220_v33 = vld [vmem:[#allocation7_spill] sm:$0xff] }
 0x28d   :  { %vm4212_vm13 = vcmp.ge.f32.partialorder %v4211_v40, 0.0  ;;  %vm4215_vm10 = vcmp.ge.f32.partialorder %v4214_v10, 0.0  ;;  %vm4218_vm8 = vcmp.ge.f32.partialorder %v4217_v28, 0.0  ;;  %v3711_v32 = vsel %vm1092_vm15, %v4219_v0, %v1156_v11  ;;  %v4222_v4 = vld [vmem:[#allocation12_spill] sm:$0xff]  ;;  %v4224_v5 = vld [vmem:[#allocation15_spill] sm:$0xff]  ;;  %v4226_v39 = vld [vmem:[#allocation14_spill] sm:$0xff] }
 0x28e   :  { %v3694_v1 = vsel %vm4212_vm13, %v4211_v40, %v4210_v25  ;;  %v3700_v3 = vsel %vm4215_vm10, %v4214_v10, %v4213_v14  ;;  %v3706_v9 = vsel %vm4218_vm8, %v4217_v28, %v4216_v23  ;;  %vm4221_vm14 = vcmp.ge.f32.partialorder %v4220_v33, 0.0  ;;  %v4228_v25 = vld [vmem:[#allocation16_spill] sm:$0xff]  ;;  %v4229_v40 = vld [vmem:[#allocation22_spill] sm:$0xff]  ;;  %v4236_v23 = vld [vmem:[#allocation5_spill] sm:$0xff] }
 0x28f   :  { %v3716_v63 = vsel %vm4221_vm14, %v4220_v33, %v1157_v57  ;;  %vm4223_vm2 = vcmp.ge.f32.partialorder %v4222_v4, 0.0  ;;  %vm4225_vm11 = vcmp.ge.f32.partialorder %v4224_v5, 0.0  ;;  %v3731_v11 = vsel %vm1096_vm0, %v4160_v60, %v1160_v34  ;;  %v4233_v60 = vld [vmem:[#allocation25_spill] sm:$0xff]  ;;  %v4234_v14 = vld [vmem:[#allocation26_spill] sm:$0xff]  ;;  %v4238_v33 = vld [vmem:[#allocation28_spill] sm:$0xff] }
 0x290   :  { %v3721_v43 = vsel %vm4223_vm2, %v4222_v4, %v1158_v49  ;;  %v3726_v22 = vsel %vm4225_vm11, %v4224_v5, %v1159_v8  ;;  %vm4227_vm15 = vcmp.ge.f32.partialorder %v4226_v39, 0.0  ;;  %v3741_v49 = vsel %vm1098_vm4, %v4228_v25, %v1162_v29  ;;  %v4235_v29 = vld [vmem:[#allocation3_spill] sm:$0xff]  ;;  %v4237_v0 = vld [vmem:[#allocation13_spill] sm:$0xff]  ;;  %v4239_v4 = vld [vmem:[#allocation30_spill] sm:$0xff] }
 0x291   :  { %v3736_v57 = vsel %vm4227_vm15, %v4226_v39, %v1161_v26  ;;  %vm4230_vm6 = vcmp.ge.f32.partialorder %v4229_v40, 0.0  ;;  %v3751_v34 = vsel %vm1100_vm1, %v4166_v51, %v1164_v2  ;;  %v3756_v26 = vsel %vm1101_vm5, %v4167_v30, %v1165_v61  ;;  %v4240_v5 = vld [vmem:[#allocation31_spill] sm:$0xff]  ;;  %v4241_v25 = vld [vmem:[#allocation33_spill] sm:$0xff]  ;;  %v4245_v61 = vld [vmem:[#allocation42_spill] sm:$0xff] }
 0x292   :  { %v3746_v8 = vsel %vm4230_vm6, %v4229_v40, %v1163_v52  ;;  %4232 = vst [vmem:[#allocation23_spill] sm:$0xff] %v3751_v34  ;;  %v1726_v10 = vpack.c.bf16 %v4234_v14, %v4233_v60  ;;  %v1731_v28 = vpack.c.bf16 %v4236_v23, %v4235_v29  ;;  %v1736_v52 = vpack.c.bf16 %v4238_v33, %v4237_v0  ;;  %v4242_v51 = vld [vmem:[#allocation35_spill] sm:$0xff]  ;;  %v4243_v40 = vld [vmem:[#allocation37_spill] sm:$0xff]  ;;  %v4246_v30 = vld [vmem:[#allocation46_spill] sm:$0xff] }
 0x293   :  { %4231 = vst [vmem:[#allocation10_spill] sm:$0xff] %v3746_v8  ;;  %v1741_v39 = vpack.c.bf16 %v4240_v5, %v4239_v4  ;;  %v1746_v2 = vpack.c.bf16 %v4242_v51, %v4241_v25  ;;  %v4244_v34 = vld [vmem:[#allocation39_spill] sm:$0xff]  ;;  %v1756_v60 = vpack.c.bf16 %v4246_v30, %v4245_v61  ;;  %v4247_v14 = vld [vmem:[#allocation2_spill] sm:$0xff]  ;;  %v4248_v29 = vld [vmem:[#allocation53_spill] sm:$0xff] }
 0x294   :  { %v1751_v8 = vpack.c.bf16 %v4244_v34, %v4243_v40  ;;  %1727 = vst [vmem:[%s3922_s4] sm:$0xff] %v1726_v10   ;;  %1883 = vst [vmem:[%s3922_s4 + $0x8] sm:$0xff] %v1731_v28   ;;  %v1761_v23 = vpack.c.bf16 %v4248_v29, %v4247_v14  ;;  %v4249_v0 = vld [vmem:[#allocation54_spill] sm:$0xff]  ;;  %v4250_v33 = vld [vmem:[#allocation11_spill] sm:$0xff]  ;;  %v1771_v34 = vpack.c.bf16 %v3502_v59, %v3493_v12 }
 0x295   :  { %v1766_v4 = vpack.c.bf16 %v4250_v33, %v4249_v0  ;;  %1884 = vst [vmem:[%s3922_s4 + $0x10] sm:$0xff] %v1736_v52   ;;  %1885 = vst [vmem:[%s3922_s4 + $0x18] sm:$0xff] %v1741_v39   ;;  %v1776_v10 = vpack.c.bf16 %v3514_v55, %v3508_v38  ;;  %v1781_v59 = vpack.c.bf16 %v3526_v19, %v3520_v24 }
 0x296   :  { %1886 = vst [vmem:[%s3922_s4 + $0x20] sm:$0xff] %v1746_v2   ;;  %1887 = vst [vmem:[%s3922_s4 + $0x28] sm:$0xff] %v1751_v8   ;;  %v1786_v12 = vpack.c.bf16 %v3538_v46, %v3532_v42  ;;  %v1791_v28 = vpack.c.bf16 %v3550_v44, %v3544_v31  ;;  %v1796_v38 = vpack.c.bf16 %v3562_v58, %v3556_v53 }
 0x297   :  { %1888 = vst [vmem:[%s3922_s4 + $0x30] sm:$0xff] %v1756_v60   ;;  %1889 = vst [vmem:[%s3922_s4 + $0x38] sm:$0xff] %v1761_v23   ;;  %v1801_v55 = vpack.c.bf16 %v3574_v56, %v3568_v50  ;;  %v1806_v24 = vpack.c.bf16 %v3586_v6, %v3580_v41  ;;  %v1811_v19 = vpack.c.bf16 %v3598_v48, %v3592_v62 }
 0x298   :  { %1890 = vst [vmem:[%s3922_s4 + $0x40] sm:$0xff] %v1766_v4   ;;  %1891 = vst [vmem:[%s3922_s4 + $0x48] sm:$0xff] %v1771_v34   ;;  %v1816_v42 = vpack.c.bf16 %v3610_v18, %v3604_v15  ;;  %v1821_v46 = vpack.c.bf16 %v3622_v16, %v3616_v35  ;;  %v1826_v31 = vpack.c.bf16 %v3634_v17, %v3628_v21 }
 0x299   :  { %1892 = vst [vmem:[%s3922_s4 + $0x50] sm:$0xff] %v1776_v10   ;;  %1893 = vst [vmem:[%s3922_s4 + $0x58] sm:$0xff] %v1781_v59   ;;  %v1831_v44 = vpack.c.bf16 %v3646_v45, %v3640_v20  ;;  %v1836_v53 = vpack.c.bf16 %v3658_v13, %v3652_v47  ;;  %v1841_v58 = vpack.c.bf16 %v3670_v54, %v3664_v27  ;;  %v4252_v35 = vld [vmem:[#allocation23_spill] sm:$0xff] }
 0x29a   :  { %1894 = vst [vmem:[%s3922_s4 + $0x60] sm:$0xff] %v1786_v12   ;;  %1895 = vst [vmem:[%s3922_s4 + $0x68] sm:$0xff] %v1791_v28   ;;  %v1846_v50 = vpack.c.bf16 %v3682_v7, %v3676_v37  ;;  %v1851_v56 = vpack.c.bf16 %v3694_v1, %v3688_v36  ;;  %v1856_v41 = vpack.c.bf16 %v3706_v9, %v3700_v3  ;;  %v4251_v15 = vld [vmem:[#allocation10_spill] sm:$0xff] }
 0x29b   :  { %1896 = vst [vmem:[%s3922_s4 + $0x70] sm:$0xff] %v1796_v38   ;;  %1897 = vst [vmem:[%s3922_s4 + $0x78] sm:$0xff] %v1801_v55   ;;  %v1861_v6 = vpack.c.bf16 %v3716_v63, %v3711_v32  ;;  %v1866_v62 = vpack.c.bf16 %v3726_v22, %v3721_v43  ;;  %v1871_v48 = vpack.c.bf16 %v3736_v57, %v3731_v11 }
 0x29c   :  { %1898 = vst [vmem:[%s3922_s4 + $0x80] sm:$0xff] %v1806_v24   ;;  %1899 = vst [vmem:[%s3922_s4 + $0x88] sm:$0xff] %v1811_v19   ;;  %v1876_v18 = vpack.c.bf16 %v4251_v15, %v3741_v49  ;;  %v1881_v16 = vpack.c.bf16 %v3756_v26, %v4252_v35 }
 0x29d   :  { %1900 = vst [vmem:[%s3922_s4 + $0x90] sm:$0xff] %v1816_v42   ;;  %1901 = vst [vmem:[%s3922_s4 + $0x98] sm:$0xff] %v1821_v46  }
 0x29e   :  { %1902 = vst [vmem:[%s3922_s4 + $0xa0] sm:$0xff] %v1826_v31   ;;  %1903 = vst [vmem:[%s3922_s4 + $0xa8] sm:$0xff] %v1831_v44  }
 0x29f   :  { %1904 = vst [vmem:[%s3922_s4 + $0xb0] sm:$0xff] %v1836_v53   ;;  %1905 = vst [vmem:[%s3922_s4 + $0xb8] sm:$0xff] %v1841_v58  }
 0x2a0   :  { %1906 = vst [vmem:[%s3922_s4 + $0xc0] sm:$0xff] %v1846_v50   ;;  %1907 = vst [vmem:[%s3922_s4 + $0xc8] sm:$0xff] %v1851_v56  }
 0x2a1   :  { %1908 = vst [vmem:[%s3922_s4 + $0xd0] sm:$0xff] %v1856_v41   ;;  %1909 = vst [vmem:[%s3922_s4 + $0xd8] sm:$0xff] %v1861_v6  }
 0x2a2   :  { %1910 = vst [vmem:[%s3922_s4 + $0xe0] sm:$0xff] %v1866_v62   ;;  %1911 = vst [vmem:[%s3922_s4 + $0xe8] sm:$0xff] %v1871_v48  }
 0x2a3   :  { %1912 = vst [vmem:[%s3922_s4 + $0xf0] sm:$0xff] %v1876_v18   ;;  %1913 = vst [vmem:[%s3922_s4 + $0xf8] sm:$0xff] %v1881_v16  }

// kernel: _forward_impl.7
= control target key start
LH: loop header
LB: loop body
LE: loop exit
PB: predicated region body
PF: predicated region fallthrough
CT: control target
= control target key end

     0   :  { %s1087_s1 = inlined_call_operand.vmem [shape: bf16[256,128], index: 1, kind: input, shape index: {}]   ;;  %s1088_s0 = inlined_call_operand.vmem [shape: bf16[128,256], index: 0, kind: input, shape index: {}]   ;;  %s1089_s2 = inlined_call_operand.vmem [shape: f32[1,128], index: 2, kind: input, shape index: {}]   ;;  %s1090_s3 = inlined_call_operand.vmem [shape: f32[1,128], index: 3, kind: input, shape index: {}]   ;;  %s1091_s4 = inlined_call_operand.vmem [shape: bf16[128,128], index: 4, kind: output, shape index: {}]  }
   0x1   :  { %v786_v0 = vld [vmem:[%s1087_s1 + $0x40] sm:$0xff]   ;;  %v788_v2 = vld [vmem:[%s1087_s1 + $0x48] sm:$0xff]   ;;  %v790_v4 = vld [vmem:[%s1087_s1 + $0x50] sm:$0xff]  }
   0x2   :  { %v787_v1 = vld [vmem:[%s1087_s1] sm:$0xff]   ;;  %706 = vmatprep.subr.bf16.mxu0 %v786_v0  ;;  %770 = vmatprep.subr.bf16.mxu1 %v786_v0  ;;  %v789_v3 = vld [vmem:[%s1087_s1 + $0x8] sm:$0xff]   ;;  %v791_v5 = vld [vmem:[%s1087_s1 + $0x10] sm:$0xff]  }
   0x3   :  { %707 = vmatpush3.bf16.msra.mxu0 %v787_v1  ;;  %778 = vmatpush3.bf16.msra.mxu1 %v787_v1  ;;  %v792_v6 = vld [vmem:[%s1087_s1 + $0x58] sm:$0xff]   ;;  %v794_v8 = vld [vmem:[%s1087_s1 + $0x60] sm:$0xff]   ;;  %v796_v10 = vld [vmem:[%s1087_s1 + $0x68] sm:$0xff]  }
   0x4   :  { %708 = vmatprep.subr.bf16.mxu0 %v788_v2  ;;  %771 = vmatprep.subr.bf16.mxu1 %v788_v2  ;;  %v793_v7 = vld [vmem:[%s1087_s1 + $0x18] sm:$0xff]   ;;  %v795_v9 = vld [vmem:[%s1087_s1 + $0x20] sm:$0xff]   ;;  %v797_v12 = vld [vmem:[%s1087_s1 + $0x28] sm:$0xff]  }
   0x5   :  { %v804_v11 = vld [vmem:[%s1088_s0 + $0x4] ss:$8 sps:$4 sm:$0xff]   ;;  %v798_v14 = vld [vmem:[%s1087_s1 + $0x70] sm:$0xff]   ;;  %v800_v16 = vld [vmem:[%s1087_s1 + $0x78] sm:$0xff]  }
   0x6   :  { %v810_v13 = vld [vmem:[%s1088_s0 + $0x44] ss:$8 sps:$4 sm:$0xff]   ;;  %274 = vmatprep.mubr.bf16.mxu0 %v804_v11  ;;  %v799_v15 = vld [vmem:[%s1087_s1 + $0x30] sm:$0xff]   ;;  %v801_v17 = vld [vmem:[%s1087_s1 + $0x38] sm:$0xff]  }
   0x7   :  { %709 = vmatpush3.bf16.msra.mxu0 %v789_v3  ;;  %779 = vmatpush3.bf16.msra.mxu1 %v789_v3  ;;  %v802_v18 = vld [vmem:[%s1088_s0] ss:$8 sps:$4 sm:$0xff]   ;;  %v805_v20 = vld [vmem:[%s1088_s0 + $0x14] ss:$8 sps:$4 sm:$0xff]   ;;  %v807_v22 = vld [vmem:[%s1088_s0 + $0x10] ss:$8 sps:$4 sm:$0xff]  }
   0x8   :  { %710 = vmatprep.subr.bf16.mxu0 %v790_v4  ;;  %772 = vmatprep.subr.bf16.mxu1 %v790_v4  ;;  %v808_v19 = vld [vmem:[%s1088_s0 + $0x40] ss:$8 sps:$4 sm:$0xff]   ;;  %v814_v21 = vld [vmem:[%s1088_s0 + $0x54] ss:$8 sps:$4 sm:$0xff]   ;;  %v816_v23 = vld [vmem:[%s1088_s0 + $0x50] ss:$8 sps:$4 sm:$0xff]  }
   0x9   :  { %306 = vmatprep.mubr.bf16.mxu1 %v810_v13  ;;  %v811_v24 = vld [vmem:[%s1088_s0 + $0x24] ss:$8 sps:$4 sm:$0xff]   ;;  %v813_v26 = vld [vmem:[%s1088_s0 + $0x20] ss:$8 sps:$4 sm:$0xff]   ;;  %v817_v28 = vld [vmem:[%s1088_s0 + $0x34] ss:$8 sps:$4 sm:$0xff]  }
   0xa   :  { %v820_v25 = vld [vmem:[%s1088_s0 + $0x64] ss:$8 sps:$4 sm:$0xff]   ;;  %v822_v27 = vld [vmem:[%s1088_s0 + $0x60] ss:$8 sps:$4 sm:$0xff]   ;;  %v823_v29 = vld [vmem:[%s1088_s0 + $0x74] ss:$8 sps:$4 sm:$0xff]  }
   0xb   :  { %711 = vmatpush3.bf16.msra.mxu0 %v791_v5  ;;  %780 = vmatpush3.bf16.msra.mxu1 %v791_v5  ;;  %v819_v30 = vld [vmem:[%s1088_s0 + $0x30] ss:$8 sps:$4 sm:$0xff]  }
   0xc   :  { %712 = vmatprep.subr.bf16.mxu0 %v792_v6  ;;  %773 = vmatprep.subr.bf16.mxu1 %v792_v6  ;;  %v825_v31 = vld [vmem:[%s1088_s0 + $0x70] ss:$8 sps:$4 sm:$0xff]  }
   0xf   :  { %713 = vmatpush3.bf16.msra.mxu0 %v793_v7  ;;  %781 = vmatpush3.bf16.msra.mxu1 %v793_v7 }
  0x10   :  { %714 = vmatprep.subr.bf16.mxu0 %v794_v8  ;;  %774 = vmatprep.subr.bf16.mxu1 %v794_v8 }
  0x13   :  { %715 = vmatpush3.bf16.msra.mxu0 %v795_v9  ;;  %782 = vmatpush3.bf16.msra.mxu1 %v795_v9 }
  0x14   :  { %716 = vmatprep.subr.bf16.mxu0 %v796_v10  ;;  %775 = vmatprep.subr.bf16.mxu1 %v796_v10 }
  0x17   :  { %717 = vmatpush3.bf16.msra.mxu0 %v797_v12  ;;  %783 = vmatpush3.bf16.msra.mxu1 %v797_v12 }
  0x18   :  { %718 = vmatprep.subr.bf16.mxu0 %v798_v14  ;;  %776 = vmatprep.subr.bf16.mxu1 %v798_v14 }
  0x1b   :  { %719 = vmatpush3.bf16.msra.mxu0 %v799_v15  ;;  %784 = vmatpush3.bf16.msra.mxu1 %v799_v15 }
  0x1c   :  { %720 = vmatprep.subr.bf16.mxu0 %v800_v16  ;;  %777 = vmatprep.subr.bf16.mxu1 %v800_v16 }
  0x1f   :  { %721 = vmatpush3.bf16.msra.mxu0 %v801_v17  ;;  %785 = vmatpush3.bf16.msra.mxu1 %v801_v17 }
  0x22   :  { %275 = vmatmul.mubr.bf16.vlgmr.msra.gmra.mrb[0].mxu0 %v802_v18  ;;  %307 = vmatmul.mubr.bf16.vlgmr.msra.gmra.mrb[0].mxu1 %v808_v19 }
  0x23   :  { %282 = vmatprep.mubr.bf16.mxu0 %v805_v20  ;;  %314 = vmatprep.mubr.bf16.mxu1 %v814_v21 }
  0x2a   :  { %283 = vmatmul.mubr.bf16.gmra.mrb[4].mxu0 %v807_v22  ;;  %315 = vmatmul.mubr.bf16.gmra.mrb[4].mxu1 %v816_v23 }
  0x2b   :  { %290 = vmatprep.mubr.bf16.mxu0 %v811_v24  ;;  %322 = vmatprep.mubr.bf16.mxu1 %v820_v25 }
  0x32   :  { %291 = vmatmul.mubr.bf16.gmra.mrb[8].mxu0 %v813_v26  ;;  %323 = vmatmul.mubr.bf16.gmra.mrb[8].mxu1 %v822_v27 }
  0x33   :  { %298 = vmatprep.mubr.bf16.mxu0 %v817_v28  ;;  %330 = vmatprep.mubr.bf16.mxu1 %v823_v29 }
  0x3a   :  { %299 = vmatmul.mubr.bf16.gmra.mrb[12].mxu0 %v819_v30  ;;  %331 = vmatmul.mubr.bf16.gmra.mrb[12].mxu1 %v825_v31 }
  0xf5   :  { %v722_v32 = vpop.f32.mrb[0].mxu0  ;;  %v746_v33 = vpop.f32.mrb[0].mxu1 }
  0xf6   :  { %v723_v34 = vpop.f32.mrb[1].mxu0  ;;  %v747_v35 = vpop.f32.mrb[1].mxu1 }
  0xf7   :  { %v949_v36 = vadd.f32 %v723_v34, %v722_v32  ;;  %v725_v37 = vpop.f32.mrb[2].mxu0  ;;  %v951_v38 = vadd.f32 %v747_v35, %v746_v33  ;;  %v749_v39 = vpop.f32.mrb[2].mxu1 }
  0xf8   :  { %v726_v40 = vpop.f32.mrb[3].mxu0  ;;  %v750_v41 = vpop.f32.mrb[3].mxu1 }
  0xf9   :  { %v727_v42 = vadd.f32 %v726_v40, %v725_v37  ;;  %v953_v43 = vadd.f32 %v750_v41, %v749_v39 }
  0xfb   :  { %v339_v44 = vadd.f32 %v727_v42, %v949_v36 }
  0xfd   :  { %v728_v45 = vpop.f32.mrb[4].mxu0  ;;  %v752_v46 = vpop.f32.mrb[4].mxu1 }
  0xfe   :  { %v729_v47 = vpop.f32.mrb[5].mxu0  ;;  %v753_v48 = vpop.f32.mrb[5].mxu1 }
  0xff   :  { %v730_v49 = vadd.f32 %v729_v47, %v728_v45  ;;  %v731_v50 = vpop.f32.mrb[6].mxu0  ;;  %v754_v51 = vadd.f32 %v753_v48, %v752_v46  ;;  %v755_v52 = vpop.f32.mrb[6].mxu1 }
 0x100   :  { %v732_v53 = vpop.f32.mrb[7].mxu0  ;;  %v756_v54 = vpop.f32.mrb[7].mxu1 }
 0x101   :  { %v340_v55 = vadd.f32 %v730_v49, %v339_v44  ;;  %v733_v56 = vadd.f32 %v732_v53, %v731_v50  ;;  %v757_v57 = vadd.f32 %v756_v54, %v755_v52 }
 0x103   :  { %v341_v58 = vadd.f32 %v733_v56, %v340_v55 }
 0x105   :  { %v734_v59 = vpop.f32.mrb[8].mxu0  ;;  %v758_v60 = vpop.f32.mrb[8].mxu1 }
 0x106   :  { %v735_v61 = vpop.f32.mrb[9].mxu0  ;;  %v759_v62 = vpop.f32.mrb[9].mxu1 }
 0x107   :  { %v736_v63 = vadd.f32 %v735_v61, %v734_v59  ;;  %v737_v0 = vpop.f32.mrb[10].mxu0  ;;  %v760_v1 = vadd.f32 %v759_v62, %v758_v60  ;;  %v761_v2 = vpop.f32.mrb[10].mxu1 }
 0x108   :  { %v738_v3 = vpop.f32.mrb[11].mxu0  ;;  %v762_v4 = vpop.f32.mrb[11].mxu1 }
 0x109   :  { %v342_v5 = vadd.f32 %v736_v63, %v341_v58  ;;  %v739_v6 = vadd.f32 %v738_v3, %v737_v0  ;;  %v763_v7 = vadd.f32 %v762_v4, %v761_v2 }
 0x10b   :  { %v343_v8 = vadd.f32 %v739_v6, %v342_v5 }
 0x10d   :  { %v740_v9 = vpop.f32.mrb[12].mxu0  ;;  %v764_v10 = vpop.f32.mrb[12].mxu1 }
 0x10e   :  { %v741_v11 = vpop.f32.mrb[13].mxu0  ;;  %v765_v12 = vpop.f32.mrb[13].mxu1 }
 0x10f   :  { %v742_v13 = vadd.f32 %v741_v11, %v740_v9  ;;  %v743_v14 = vpop.f32.mrb[14].mxu0  ;;  %v766_v15 = vadd.f32 %v765_v12, %v764_v10  ;;  %v767_v16 = vpop.f32.mrb[14].mxu1 }
 0x110   :  { %v744_v17 = vpop.f32.mrb[15].mxu0  ;;  %v768_v18 = vpop.f32.mrb[15].mxu1 }
 0x111   :  { %v344_v19 = vadd.f32 %v742_v13, %v343_v8  ;;  %v745_v20 = vadd.f32 %v744_v17, %v743_v14  ;;  %v769_v21 = vadd.f32 %v768_v18, %v767_v16 }
 0x113   :  { %v345_v22 = vadd.f32 %v745_v20, %v344_v19 }
 0x115   :  { %v346_v23 = vadd.f32 %v951_v38, %v345_v22 }
 0x117   :  { %v347_v24 = vadd.f32 %v953_v43, %v346_v23 }
 0x119   :  { %v348_v25 = vadd.f32 %v754_v51, %v347_v24 }
 0x11b   :  { %v349_v26 = vadd.f32 %v757_v57, %v348_v25 }
 0x11d   :  { %v350_v27 = vadd.f32 %v760_v1, %v349_v26 }
 0x11f   :  { %v351_v28 = vadd.f32 %v763_v7, %v350_v27 }
 0x121   :  { %v352_v29 = vadd.f32 %v766_v15, %v351_v28 }
 0x123   :  { %v353_v30 = vadd.f32 %v769_v21, %v352_v29  ;;  %v419_v29 = vlaneseq }
 0x125   :  { %v354_v31 = vrot.slane %v353_v30, 4 }
 0x127   :  { %v355_v32 = vadd.f32 %v354_v31, %v353_v30  ;;  %v420_v30 = vshrl.u32 %v419_v29, 7  ;;  %v417_v31 = vld [vmem:[%s1089_s2] sm:$0x1] }
 0x129   :  { %v356_v33 = vrot.slane %v355_v32, 2 }
 0x12b   :  { %v357_v34 = vadd.f32 %v356_v33, %v355_v32  ;;  %v421_v32 = vsub.s32 0, %v420_v30 }
 0x12d   :  { %v358_v35 = vrot.slane %v357_v34, 1 }
 0x12f   :  { %v359_v37 = vadd.f32 %v358_v35, %v357_v34 }
 0x131   :  { %v360_v39 = vmul.f32 0.0078125, %v359_v37 }
 0x133   :  { %v959_v40 = vsub.f32 %v949_v36, %v360_v39  ;;  %v961_v41 = vsub.f32 %v727_v42, %v360_v39  ;;  %v963_v44 = vsub.f32 %v730_v49, %v360_v39  ;;  %v965_v45 = vsub.f32 %v733_v56, %v360_v39 }
 0x134   :  { %v967_v46 = vsub.f32 %v736_v63, %v360_v39  ;;  %v969_v47 = vsub.f32 %v739_v6, %v360_v39  ;;  %v971_v48 = vsub.f32 %v742_v13, %v360_v39  ;;  %v973_v50 = vsub.f32 %v745_v20, %v360_v39 }
 0x135   :  { %v976_v52 = vsub.f32 %v951_v38, %v360_v39  ;;  %v979_v36 = vsub.f32 %v953_v43, %v360_v39  ;;  %v981_v42 = vsub.f32 %v754_v51, %v360_v39  ;;  %v983_v49 = vsub.f32 %v757_v57, %v360_v39 }
 0x136   :  { %v985_v53 = vsub.f32 %v760_v1, %v360_v39  ;;  %v987_v54 = vsub.f32 %v763_v7, %v360_v39  ;;  %v989_v55 = vsub.f32 %v766_v15, %v360_v39  ;;  %v991_v56 = vsub.f32 %v769_v21, %v360_v39 }
 0x137   :  { %v377_v58 = vmul.f32 %v959_v40, %v959_v40  ;;  %v378_v38 = vmul.f32 %v961_v41, %v961_v41  ;;  %v379_v43 = vmul.f32 %v963_v44, %v963_v44  ;;  %v380_v57 = vmul.f32 %v965_v45, %v965_v45 }
 0x138   :  { %v381_v60 = vmul.f32 %v967_v46, %v967_v46  ;;  %v382_v62 = vmul.f32 %v969_v47, %v969_v47  ;;  %v383_v0 = vmul.f32 %v971_v48, %v971_v48  ;;  %v384_v2 = vmul.f32 %v973_v50, %v973_v50 }
 0x139   :  { %v393_v51 = vadd.f32 %v378_v38, %v377_v58  ;;  %v385_v4 = vmul.f32 %v976_v52, %v976_v52  ;;  %v386_v6 = vmul.f32 %v979_v36, %v979_v36  ;;  %v387_v8 = vmul.f32 %v981_v42, %v981_v42 }
 0x13a   :  { %v388_v10 = vmul.f32 %v983_v49, %v983_v49  ;;  %v389_v12 = vmul.f32 %v985_v53, %v985_v53  ;;  %v390_v14 = vmul.f32 %v987_v54, %v987_v54  ;;  %v391_v16 = vmul.f32 %v989_v55, %v989_v55 }
 0x13b   :  { %v394_v59 = vadd.f32 %v393_v51, %v379_v43  ;;  %v392_v18 = vmul.f32 %v991_v56, %v991_v56 }
 0x13d   :  { %v395_v61 = vadd.f32 %v394_v59, %v380_v57 }
 0x13f   :  { %v396_v63 = vadd.f32 %v395_v61, %v381_v60  ;;  %v626_v60 = vld [vmem:[%s1090_s3] ss:$0 sm:$0xff] }
 0x141   :  { %v397_v1 = vadd.f32 %v396_v63, %v382_v62 }
 0x143   :  { %v398_v3 = vadd.f32 %v397_v1, %v383_v0 }
 0x145   :  { %v399_v5 = vadd.f32 %v398_v3, %v384_v2 }
 0x147   :  { %v400_v7 = vadd.f32 %v399_v5, %v385_v4 }
 0x149   :  { %v401_v9 = vadd.f32 %v400_v7, %v386_v6 }
 0x14b   :  { %v402_v11 = vadd.f32 %v401_v9, %v387_v8 }
 0x14d   :  { %v403_v13 = vadd.f32 %v402_v11, %v388_v10 }
 0x14f   :  { %v404_v15 = vadd.f32 %v403_v13, %v389_v12 }
 0x151   :  { %v405_v17 = vadd.f32 %v404_v15, %v390_v14 }
 0x153   :  { %v406_v19 = vadd.f32 %v405_v17, %v391_v16 }
 0x155   :  { %v407_v20 = vadd.f32 %v406_v19, %v392_v18 }
 0x157   :  { %v408_v21 = vrot.slane %v407_v20, 4 }
 0x159   :  { %v409_v22 = vadd.f32 %v408_v21, %v407_v20 }
 0x15b   :  { %v410_v23 = vrot.slane %v409_v22, 2 }
 0x15d   :  { %v411_v24 = vadd.f32 %v410_v23, %v409_v22 }
 0x15f   :  { %v412_v25 = vrot.slane %v411_v24, 1 }
 0x161   :  { %v413_v26 = vadd.f32 %v412_v25, %v411_v24 }
 0x163   :  { %v414_v27 = vmul.f32 0.0078125, %v413_v26 }
 0x165   :  { %v415_v28 = vadd.f32 1e-05, %v414_v27 }
 0x167   :  { %826 = vrsqrt.f32 %v415_v28 }
 0x171   :  { %v827_v33 = vpop.eup %826 }
 0x172   :  { %v418_v34 = vmul.f32 %v827_v33, %v417_v31 }
 0x174   :  { %v422_v35 = vrot.slane %v418_v34, %v421_v32 }
 0x176   :  { %v423_v37 = vmul.f32 %v422_v35, %v959_v40  ;;  %v424_v39 = vmul.f32 %v422_v35, %v961_v41  ;;  %v425_v58 = vmul.f32 %v422_v35, %v963_v44  ;;  %v426_v38 = vmul.f32 %v422_v35, %v965_v45 }
 0x177   :  { %v427_v43 = vmul.f32 %v422_v35, %v967_v46  ;;  %v428_v51 = vmul.f32 %v422_v35, %v969_v47  ;;  %v429_v57 = vmul.f32 %v422_v35, %v971_v48  ;;  %v430_v59 = vmul.f32 %v422_v35, %v973_v50 }
 0x178   :  { %v431_v40 = vmul.f32 %v422_v35, %v976_v52  ;;  %v432_v41 = vmul.f32 %v422_v35, %v979_v36  ;;  %v433_v44 = vmul.f32 %v422_v35, %v981_v42  ;;  %v434_v45 = vmul.f32 %v422_v35, %v983_v49 }
 0x179   :  { %v435_v46 = vmul.f32 %v422_v35, %v985_v53  ;;  %v436_v47 = vmul.f32 %v422_v35, %v987_v54  ;;  %v437_v48 = vmul.f32 %v422_v35, %v989_v55  ;;  %v438_v50 = vmul.f32 %v422_v35, %v991_v56 }
 0x17a   :  { %v446_v61 = vadd.f32 %v626_v60, %v423_v37  ;;  %v447_v62 = vadd.f32 %v626_v60, %v424_v39  ;;  %v448_v63 = vadd.f32 %v626_v60, %v425_v58  ;;  %v449_v0 = vadd.f32 %v626_v60, %v426_v38 }
 0x17b   :  { %v450_v1 = vadd.f32 %v626_v60, %v427_v43  ;;  %v451_v52 = vadd.f32 %v626_v60, %v428_v51  ;;  %v452_v2 = vadd.f32 %v626_v60, %v429_v57  ;;  %v453_v36 = vadd.f32 %v626_v60, %v430_v59 }
 0x17c   :  { %v454_v3 = vadd.f32 %v626_v60, %v431_v40  ;;  %v455_v42 = vadd.f32 %v626_v60, %v432_v41  ;;  %v456_v4 = vadd.f32 %v626_v60, %v433_v44  ;;  %v457_v49 = vadd.f32 %v626_v60, %v434_v45 }
 0x17d   :  { %v458_v5 = vadd.f32 %v626_v60, %v435_v46  ;;  %v459_v53 = vadd.f32 %v626_v60, %v436_v47  ;;  %v460_v6 = vadd.f32 %v626_v60, %v437_v48  ;;  %v461_v54 = vadd.f32 %v626_v60, %v438_v50 }
 0x17e   :  { %vm462_vm0 = vcmp.ge.f32.partialorder %v446_v61, 0.0  ;;  %vm463_vm1 = vcmp.ge.f32.partialorder %v447_v62, 0.0  ;;  %vm464_vm2 = vcmp.ge.f32.partialorder %v448_v63, 0.0  ;;  %vm465_vm3 = vcmp.ge.f32.partialorder %v449_v0, 0.0 }
 0x17f   :  { %vm466_vm4 = vcmp.ge.f32.partialorder %v450_v1, 0.0  ;;  %vm467_vm5 = vcmp.ge.f32.partialorder %v451_v52, 0.0  ;;  %vm468_vm6 = vcmp.ge.f32.partialorder %v452_v2, 0.0  ;;  %vm469_vm7 = vcmp.ge.f32.partialorder %v453_v36, 0.0 }
 0x180   :  { %vm470_vm8 = vcmp.ge.f32.partialorder %v454_v3, 0.0  ;;  %vm471_vm9 = vcmp.ge.f32.partialorder %v455_v42, 0.0  ;;  %vm472_vm10 = vcmp.ge.f32.partialorder %v456_v4, 0.0  ;;  %vm473_vm11 = vcmp.ge.f32.partialorder %v457_v49, 0.0 }
 0x181   :  { %vm474_vm12 = vcmp.ge.f32.partialorder %v458_v5, 0.0  ;;  %vm475_vm13 = vcmp.ge.f32.partialorder %v459_v53, 0.0  ;;  %vm476_vm14 = vcmp.ge.f32.partialorder %v460_v6, 0.0  ;;  %vm477_vm15 = vcmp.ge.f32.partialorder %v461_v54, 0.0 }
 0x182   :  { %v478_v55 = vmul.f32 0.2, %v446_v61  ;;  %v479_v56 = vmul.f32 0.2, %v447_v62  ;;  %v480_v7 = vmul.f32 0.2, %v448_v63 }
 0x183   :  { %v481_v8 = vmul.f32 0.2, %v449_v0  ;;  %v482_v9 = vmul.f32 0.2, %v450_v1  ;;  %v483_v10 = vmul.f32 0.2, %v451_v52 }
 0x184   :  { %v484_v11 = vmul.f32 0.2, %v452_v2  ;;  %v485_v12 = vmul.f32 0.2, %v453_v36  ;;  %v486_v13 = vmul.f32 0.2, %v454_v3  ;;  %v494_v14 = vsel %vm462_vm0, %v446_v61, %v478_v55 }
 0x185   :  { %v487_v15 = vmul.f32 0.2, %v455_v42  ;;  %v488_v16 = vmul.f32 0.2, %v456_v4  ;;  %v489_v17 = vmul.f32 0.2, %v457_v49  ;;  %v495_v18 = vsel %vm463_vm1, %v447_v62, %v479_v56 }
 0x186   :  { %v490_v19 = vmul.f32 0.2, %v458_v5  ;;  %v491_v20 = vmul.f32 0.2, %v459_v53  ;;  %v492_v21 = vmul.f32 0.2, %v460_v6  ;;  %v496_v22 = vsel %vm464_vm2, %v448_v63, %v480_v7 }
 0x187   :  { %v493_v23 = vmul.f32 0.2, %v461_v54  ;;  %v497_v24 = vsel %vm465_vm3, %v449_v0, %v481_v8  ;;  %v498_v25 = vsel %vm466_vm4, %v450_v1, %v482_v9  ;;  %v499_v26 = vsel %vm467_vm5, %v451_v52, %v483_v10 }
 0x188   :  { %v500_v27 = vsel %vm468_vm6, %v452_v2, %v484_v11  ;;  %v501_v28 = vsel %vm469_vm7, %v453_v36, %v485_v12  ;;  %v502_v29 = vsel %vm470_vm8, %v454_v3, %v486_v13  ;;  %v503_v30 = vsel %vm471_vm9, %v455_v42, %v487_v15 }
 0x189   :  { %v504_v31 = vsel %vm472_vm10, %v456_v4, %v488_v16  ;;  %v505_v32 = vsel %vm473_vm11, %v457_v49, %v489_v17  ;;  %v506_v33 = vsel %vm474_vm12, %v458_v5, %v490_v19  ;;  %v507_v34 = vsel %vm475_vm13, %v459_v53, %v491_v20 }
 0x18a   :  { %v508_v35 = vsel %vm476_vm14, %v460_v6, %v492_v21  ;;  %v509_v37 = vsel %vm477_vm15, %v461_v54, %v493_v23  ;;  %v662_v39 = vpack.c.bf16 %v495_v18, %v494_v14  ;;  %v667_v58 = vpack.c.bf16 %v497_v24, %v496_v22 }
 0x18b   :  { %v672_v38 = vpack.c.bf16 %v499_v26, %v498_v25  ;;  %v677_v43 = vpack.c.bf16 %v501_v28, %v500_v27  ;;  %v682_v51 = vpack.c.bf16 %v503_v30, %v502_v29  ;;  %v687_v57 = vpack.c.bf16 %v505_v32, %v504_v31 }
 0x18c   :  { %663 = vst [vmem:[%s1091_s4] sm:$0xff] %v662_v39   ;;  %699 = vst [vmem:[%s1091_s4 + $0x8] sm:$0xff] %v667_v58   ;;  %v692_v59 = vpack.c.bf16 %v507_v34, %v506_v33  ;;  %v697_v60 = vpack.c.bf16 %v509_v37, %v508_v35 }
 0x18d   :  { %700 = vst [vmem:[%s1091_s4 + $0x10] sm:$0xff] %v672_v38   ;;  %701 = vst [vmem:[%s1091_s4 + $0x18] sm:$0xff] %v677_v43  }
 0x18e   :  { %702 = vst [vmem:[%s1091_s4 + $0x20] sm:$0xff] %v682_v51   ;;  %703 = vst [vmem:[%s1091_s4 + $0x28] sm:$0xff] %v687_v57  }
 0x18f   :  { %704 = vst [vmem:[%s1091_s4 + $0x30] sm:$0xff] %v692_v59   ;;  %705 = vst [vmem:[%s1091_s4 + $0x38] sm:$0xff] %v697_v60  }

// kernel: _forward_impl.8
= control target key start
LH: loop header
LB: loop body
LE: loop exit
PB: predicated region body
PF: predicated region fallthrough
CT: control target
= control target key end

     0   :  { %s826_s1 = inlined_call_operand.vmem [shape: bf16[512,128], index: 1, kind: input, shape index: {}]   ;;  %s827_s0 = inlined_call_operand.vmem [shape: bf16[32,512], index: 0, kind: input, shape index: {}]   ;;  %s828_s2 = inlined_call_operand.vmem [shape: f32[1,128], index: 2, kind: input, shape index: {}]   ;;  %s829_s3 = inlined_call_operand.vmem [shape: f32[1,128], index: 3, kind: input, shape index: {}]   ;;  %s830_s4 = inlined_call_operand.vmem [shape: bf16[32,128], index: 4, kind: output, shape index: {}]  }
   0x1   :  { %v623_v0 = vld [vmem:[%s826_s1 + $0x40] sm:$0xff]   ;;  %v627_v4 = vld [vmem:[%s826_s1 + $0x48] sm:$0xff]   ;;  %v631_v8 = vld [vmem:[%s826_s1 + $0x50] sm:$0xff]  }
   0x2   :  { %v624_v1 = vld [vmem:[%s826_s1 + $0xc0] sm:$0xff]   ;;  %567 = vmatprep.subr.bf16.mxu0 %v623_v0  ;;  %v628_v5 = vld [vmem:[%s826_s1 + $0xc8] sm:$0xff]   ;;  %v632_v9 = vld [vmem:[%s826_s1 + $0xd0] sm:$0xff]  }
   0x3   :  { %v625_v2 = vld [vmem:[%s826_s1] sm:$0xff]   ;;  %595 = vmatprep.subr.bf16.mxu1 %v624_v1  ;;  %v629_v6 = vld [vmem:[%s826_s1 + $0x8] sm:$0xff]   ;;  %v633_v10 = vld [vmem:[%s826_s1 + $0x10] sm:$0xff]  }
   0x4   :  { %v626_v3 = vld [vmem:[%s826_s1 + $0x80] sm:$0xff]   ;;  %568 = vmatpush3.bf16.msra.mxu0 %v625_v2  ;;  %v630_v7 = vld [vmem:[%s826_s1 + $0x88] sm:$0xff]   ;;  %v634_v11 = vld [vmem:[%s826_s1 + $0x90] sm:$0xff]  }
   0x5   :  { %596 = vmatpush3.bf16.msra.mxu1 %v626_v3  ;;  %569 = vmatprep.subr.bf16.mxu0 %v627_v4  ;;  %v635_v12 = vld [vmem:[%s826_s1 + $0x58] sm:$0xff]   ;;  %v639_v16 = vld [vmem:[%s826_s1 + $0x60] sm:$0xff]   ;;  %v643_v20 = vld [vmem:[%s826_s1 + $0x68] sm:$0xff]  }
   0x6   :  { %597 = vmatprep.subr.bf16.mxu1 %v628_v5  ;;  %v636_v13 = vld [vmem:[%s826_s1 + $0xd8] sm:$0xff]   ;;  %v640_v17 = vld [vmem:[%s826_s1 + $0xe0] sm:$0xff]   ;;  %v644_v21 = vld [vmem:[%s826_s1 + $0xe8] sm:$0xff]  }
   0x7   :  { %v637_v14 = vld [vmem:[%s826_s1 + $0x18] sm:$0xff]   ;;  %v641_v18 = vld [vmem:[%s826_s1 + $0x20] sm:$0xff]   ;;  %v645_v22 = vld [vmem:[%s826_s1 + $0x28] sm:$0xff]  }
   0x8   :  { %570 = vmatpush3.bf16.msra.mxu0 %v629_v6  ;;  %v638_v15 = vld [vmem:[%s826_s1 + $0x98] sm:$0xff]   ;;  %v642_v19 = vld [vmem:[%s826_s1 + $0xa0] sm:$0xff]   ;;  %v646_v23 = vld [vmem:[%s826_s1 + $0xa8] sm:$0xff]  }
   0x9   :  { %598 = vmatpush3.bf16.msra.mxu1 %v630_v7  ;;  %571 = vmatprep.subr.bf16.mxu0 %v631_v8  ;;  %v647_v24 = vld [vmem:[%s826_s1 + $0x70] sm:$0xff]   ;;  %v651_v28 = vld [vmem:[%s826_s1 + $0x78] sm:$0xff]  }
   0xa   :  { %599 = vmatprep.subr.bf16.mxu1 %v632_v9  ;;  %v648_v25 = vld [vmem:[%s826_s1 + $0xf0] sm:$0xff]   ;;  %v652_v29 = vld [vmem:[%s826_s1 + $0xf8] sm:$0xff]  }
   0xb   :  { %v649_v26 = vld [vmem:[%s826_s1 + $0x30] sm:$0xff]   ;;  %v653_v30 = vld [vmem:[%s826_s1 + $0x38] sm:$0xff]  }
   0xc   :  { %572 = vmatpush3.bf16.msra.mxu0 %v633_v10  ;;  %v650_v27 = vld [vmem:[%s826_s1 + $0xb0] sm:$0xff]   ;;  %v654_v31 = vld [vmem:[%s826_s1 + $0xb8] sm:$0xff]  }
   0xd   :  { %600 = vmatpush3.bf16.msra.mxu1 %v634_v11  ;;  %573 = vmatprep.subr.bf16.mxu0 %v635_v12  ;;  %v655_v32 = vld [vmem:[%s827_s0] ss:$16 sps:$4 sm:$0xff]   ;;  %v657_v33 = vld [vmem:[%s827_s0 + $0x4] ss:$16 sps:$4 sm:$0xff]   ;;  %v658_v34 = vld [vmem:[%s827_s0 + $0x8] ss:$16 sps:$4 sm:$0xff]  }
   0xe   :  { %601 = vmatprep.subr.bf16.mxu1 %v636_v13  ;;  %v660_v35 = vld [vmem:[%s827_s0 + $0xc] ss:$16 sps:$4 sm:$0xff]   ;;  %354 = vmatprep.mubr.bf16.mxu0 %v657_v33  ;;  %v661_v36 = vld [vmem:[%s827_s0 + $0x24] ss:$16 sps:$4 sm:$0xff]   ;;  %v665_v38 = vld [vmem:[%s827_s0 + $0x20] ss:$16 sps:$4 sm:$0xff]   ;;  %v452_v33 = vlaneseq }
   0xf   :  { %403 = vmatprep.mubr.bf16.mxu1 %v660_v35  ;;  %v663_v37 = vld [vmem:[%s827_s0 + $0x2c] ss:$16 sps:$4 sm:$0xff]   ;;  %v666_v39 = vld [vmem:[%s827_s0 + $0x28] ss:$16 sps:$4 sm:$0xff]   ;;  %v450_v35 = vld [vmem:[%s828_s2] sm:$0x1] }
  0x10   :  { %574 = vmatpush3.bf16.msra.mxu0 %v637_v14 }
  0x11   :  { %602 = vmatpush3.bf16.msra.mxu1 %v638_v15  ;;  %575 = vmatprep.subr.bf16.mxu0 %v639_v16 }
  0x12   :  { %603 = vmatprep.subr.bf16.mxu1 %v640_v17 }
  0x14   :  { %576 = vmatpush3.bf16.msra.mxu0 %v641_v18 }
  0x15   :  { %604 = vmatpush3.bf16.msra.mxu1 %v642_v19  ;;  %577 = vmatprep.subr.bf16.mxu0 %v643_v20 }
  0x16   :  { %605 = vmatprep.subr.bf16.mxu1 %v644_v21 }
  0x18   :  { %578 = vmatpush3.bf16.msra.mxu0 %v645_v22 }
  0x19   :  { %606 = vmatpush3.bf16.msra.mxu1 %v646_v23  ;;  %579 = vmatprep.subr.bf16.mxu0 %v647_v24 }
  0x1a   :  { %607 = vmatprep.subr.bf16.mxu1 %v648_v25 }
  0x1c   :  { %580 = vmatpush3.bf16.msra.mxu0 %v649_v26 }
  0x1d   :  { %608 = vmatpush3.bf16.msra.mxu1 %v650_v27  ;;  %581 = vmatprep.subr.bf16.mxu0 %v651_v28 }
  0x1e   :  { %609 = vmatprep.subr.bf16.mxu1 %v652_v29 }
  0x20   :  { %582 = vmatpush3.bf16.msra.mxu0 %v653_v30 }
  0x21   :  { %610 = vmatpush3.bf16.msra.mxu1 %v654_v31 }
  0x23   :  { %355 = vmatmul.mubr.bf16.vlgmr.msra.gmra.mrb[0].mxu0 %v655_v32 }
  0x24   :  { %404 = vmatmul.mubr.bf16.vlgmr.msra.gmra.mrb[0].mxu1 %v658_v34  ;;  %362 = vmatprep.mubr.bf16.mxu0 %v661_v36  ;;  %v453_v34 = vshrl.u32 %v452_v33, 7 }
  0x25   :  { %411 = vmatprep.mubr.bf16.mxu1 %v663_v37 }
  0x26   :  { %v454_v36 = vsub.s32 0, %v453_v34 }
  0x2b   :  { %363 = vmatmul.mubr.bf16.gmra.mrb[4].mxu0 %v665_v38 }
  0x2c   :  { %412 = vmatmul.mubr.bf16.gmra.mrb[4].mxu1 %v666_v39 }
  0xf6   :  { %v583_v40 = vpop.f32.mrb[0].mxu0 }
  0xf7   :  { %v611_v41 = vpop.f32.mrb[0].mxu1  ;;  %v584_v42 = vpop.f32.mrb[1].mxu0 }
  0xf8   :  { %v585_v43 = vadd.f32 %v584_v42, %v583_v40  ;;  %v612_v44 = vpop.f32.mrb[1].mxu1  ;;  %v586_v45 = vpop.f32.mrb[2].mxu0  ;;  %v547_v40 = vld [vmem:[%s829_s3] ss:$0 sm:$0xff] }
  0xf9   :  { %v613_v46 = vadd.f32 %v612_v44, %v611_v41  ;;  %v614_v47 = vpop.f32.mrb[2].mxu1  ;;  %v587_v48 = vpop.f32.mrb[3].mxu0 }
  0xfa   :  { %v588_v49 = vadd.f32 %v587_v48, %v586_v45  ;;  %v615_v50 = vpop.f32.mrb[3].mxu1 }
  0xfb   :  { %v406_v51 = vadd.f32 %v613_v46, %v585_v43  ;;  %v616_v52 = vadd.f32 %v615_v50, %v614_v47 }
  0xfd   :  { %v409_v53 = vadd.f32 %v616_v52, %v588_v49 }
  0xfe   :  { %v589_v54 = vpop.f32.mrb[4].mxu0 }
  0xff   :  { %v420_v55 = vadd.f32 %v409_v53, %v406_v51  ;;  %v617_v56 = vpop.f32.mrb[4].mxu1  ;;  %v590_v57 = vpop.f32.mrb[5].mxu0 }
 0x100   :  { %v591_v58 = vadd.f32 %v590_v57, %v589_v54  ;;  %v618_v59 = vpop.f32.mrb[5].mxu1  ;;  %v592_v60 = vpop.f32.mrb[6].mxu0 }
 0x101   :  { %v619_v61 = vadd.f32 %v618_v59, %v617_v56  ;;  %v620_v62 = vpop.f32.mrb[6].mxu1  ;;  %v593_v63 = vpop.f32.mrb[7].mxu0 }
 0x102   :  { %v594_v0 = vadd.f32 %v593_v63, %v592_v60  ;;  %v621_v1 = vpop.f32.mrb[7].mxu1 }
 0x103   :  { %v414_v2 = vadd.f32 %v619_v61, %v591_v58  ;;  %v622_v3 = vadd.f32 %v621_v1, %v620_v62 }
 0x105   :  { %v421_v4 = vadd.f32 %v420_v55, %v414_v2  ;;  %v417_v5 = vadd.f32 %v622_v3, %v594_v0 }
 0x107   :  { %v422_v6 = vadd.f32 %v421_v4, %v417_v5 }
 0x109   :  { %v423_v7 = vrot.slane %v422_v6, 4 }
 0x10b   :  { %v424_v8 = vadd.f32 %v423_v7, %v422_v6 }
 0x10d   :  { %v425_v9 = vrot.slane %v424_v8, 2 }
 0x10f   :  { %v426_v10 = vadd.f32 %v425_v9, %v424_v8 }
 0x111   :  { %v427_v11 = vrot.slane %v426_v10, 1 }
 0x113   :  { %v428_v12 = vadd.f32 %v427_v11, %v426_v10 }
 0x115   :  { %v429_v13 = vmul.f32 0.03125, %v428_v12 }
 0x117   :  { %v430_v14 = vsub.f32 %v406_v51, %v429_v13  ;;  %v431_v15 = vsub.f32 %v409_v53, %v429_v13  ;;  %v432_v16 = vsub.f32 %v414_v2, %v429_v13  ;;  %v433_v17 = vsub.f32 %v417_v5, %v429_v13 }
 0x119   :  { %v434_v18 = vmul.f32 %v430_v14, %v430_v14  ;;  %v435_v19 = vmul.f32 %v431_v15, %v431_v15  ;;  %v436_v20 = vmul.f32 %v432_v16, %v432_v16  ;;  %v437_v22 = vmul.f32 %v433_v17, %v433_v17 }
 0x11b   :  { %v438_v21 = vadd.f32 %v435_v19, %v434_v18 }
 0x11d   :  { %v439_v23 = vadd.f32 %v438_v21, %v436_v20 }
 0x11f   :  { %v440_v24 = vadd.f32 %v439_v23, %v437_v22 }
 0x121   :  { %v441_v25 = vrot.slane %v440_v24, 4 }
 0x123   :  { %v442_v26 = vadd.f32 %v441_v25, %v440_v24 }
 0x125   :  { %v443_v27 = vrot.slane %v442_v26, 2 }
 0x127   :  { %v444_v28 = vadd.f32 %v443_v27, %v442_v26 }
 0x129   :  { %v445_v29 = vrot.slane %v444_v28, 1 }
 0x12b   :  { %v446_v30 = vadd.f32 %v445_v29, %v444_v28 }
 0x12d   :  { %v447_v31 = vmul.f32 0.03125, %v446_v30 }
 0x12f   :  { %v448_v32 = vadd.f32 1e-05, %v447_v31 }
 0x131   :  { %667 = vrsqrt.f32 %v448_v32 }
 0x13b   :  { %v668_v37 = vpop.eup %667 }
 0x13c   :  { %v451_v38 = vmul.f32 %v668_v37, %v450_v35 }
 0x13e   :  { %v455_v39 = vrot.slane %v451_v38, %v454_v36 }
 0x140   :  { %v456_v41 = vmul.f32 %v455_v39, %v430_v14  ;;  %v457_v42 = vmul.f32 %v455_v39, %v431_v15  ;;  %v458_v43 = vmul.f32 %v455_v39, %v432_v16  ;;  %v459_v44 = vmul.f32 %v455_v39, %v433_v17 }
 0x142   :  { %v467_v45 = vadd.f32 %v547_v40, %v456_v41  ;;  %v468_v46 = vadd.f32 %v547_v40, %v457_v42  ;;  %v469_v47 = vadd.f32 %v547_v40, %v458_v43  ;;  %v470_v48 = vadd.f32 %v547_v40, %v459_v44 }
 0x144   :  { %vm471_vm0 = vcmp.ge.f32.partialorder %v467_v45, 0.0  ;;  %vm472_vm1 = vcmp.ge.f32.partialorder %v468_v46, 0.0  ;;  %vm473_vm2 = vcmp.ge.f32.partialorder %v469_v47, 0.0  ;;  %vm474_vm3 = vcmp.ge.f32.partialorder %v470_v48, 0.0 }
 0x145   :  { %v475_v49 = vmul.f32 0.2, %v467_v45  ;;  %v476_v50 = vmul.f32 0.2, %v468_v46  ;;  %v477_v51 = vmul.f32 0.2, %v469_v47 }
 0x146   :  { %v478_v52 = vmul.f32 0.2, %v470_v48 }
 0x147   :  { %v479_v53 = vsel %vm471_vm0, %v467_v45, %v475_v49  ;;  %v480_v54 = vsel %vm472_vm1, %v468_v46, %v476_v50  ;;  %v481_v55 = vsel %vm473_vm2, %v469_v47, %v477_v51 }
 0x148   :  { %v482_v56 = vsel %vm474_vm3, %v470_v48, %v478_v52  ;;  %v559_v57 = vpack.c.bf16 %v480_v54, %v479_v53 }
 0x149   :  { %v564_v58 = vpack.c.bf16 %v482_v56, %v481_v55 }
 0x14a   :  { %560 = vst [vmem:[%s830_s4] sm:$0xff] %v559_v57  }
 0x14b   :  { %566 = vst [vmem:[%s830_s4 + $0x8] sm:$0xff] %v564_v58  }

// kernel: _forward_impl.9
= control target key start
LH: loop header
LB: loop body
LE: loop exit
PB: predicated region body
PF: predicated region fallthrough
CT: control target
= control target key end

     0   :  { %s1188_s1 = inlined_call_operand.vmem [shape: bf16[1024,128], index: 1, kind: input, shape index: {}]   ;;  %s1189_s0 = inlined_call_operand.vmem [shape: bf16[8,1024], index: 0, kind: input, shape index: {}]   ;;  %s1190_s2 = inlined_call_operand.vmem [shape: f32[8,128], index: 2, kind: output, shape index: {}]  }
   0x1   :  { %v890_v0 = vld [vmem:[%s1188_s1 + $0x40] sm:$0xff]   ;;  %v894_v4 = vld [vmem:[%s1188_s1 + $0x48] sm:$0xff]   ;;  %v898_v8 = vld [vmem:[%s1188_s1 + $0x50] sm:$0xff]  }
   0x2   :  { %v891_v1 = vld [vmem:[%s1188_s1 + $0xc0] sm:$0xff]   ;;  %802 = vmatprep.subr.bf16.mxu0 %v890_v0  ;;  %v895_v5 = vld [vmem:[%s1188_s1 + $0xc8] sm:$0xff]   ;;  %v899_v9 = vld [vmem:[%s1188_s1 + $0xd0] sm:$0xff]  }
   0x3   :  { %v892_v2 = vld [vmem:[%s1188_s1] sm:$0xff]   ;;  %824 = vmatprep.subr.bf16.mxu1 %v891_v1  ;;  %v896_v6 = vld [vmem:[%s1188_s1 + $0x8] sm:$0xff]   ;;  %v900_v10 = vld [vmem:[%s1188_s1 + $0x10] sm:$0xff]  }
   0x4   :  { %v893_v3 = vld [vmem:[%s1188_s1 + $0x80] sm:$0xff]   ;;  %803 = vmatpush3.bf16.msra.mxu0 %v892_v2  ;;  %v897_v7 = vld [vmem:[%s1188_s1 + $0x88] sm:$0xff]   ;;  %v901_v11 = vld [vmem:[%s1188_s1 + $0x90] sm:$0xff]  }
   0x5   :  { %825 = vmatpush3.bf16.msra.mxu1 %v893_v3  ;;  %804 = vmatprep.subr.bf16.mxu0 %v894_v4  ;;  %v902_v12 = vld [vmem:[%s1188_s1 + $0x58] sm:$0xff]   ;;  %v906_v16 = vld [vmem:[%s1188_s1 + $0x60] sm:$0xff]   ;;  %v910_v20 = vld [vmem:[%s1188_s1 + $0x68] sm:$0xff]  }
   0x6   :  { %826 = vmatprep.subr.bf16.mxu1 %v895_v5  ;;  %v903_v13 = vld [vmem:[%s1188_s1 + $0xd8] sm:$0xff]   ;;  %v907_v17 = vld [vmem:[%s1188_s1 + $0xe0] sm:$0xff]   ;;  %v911_v21 = vld [vmem:[%s1188_s1 + $0xe8] sm:$0xff]  }
   0x7   :  { %v904_v14 = vld [vmem:[%s1188_s1 + $0x18] sm:$0xff]   ;;  %v908_v18 = vld [vmem:[%s1188_s1 + $0x20] sm:$0xff]   ;;  %v912_v22 = vld [vmem:[%s1188_s1 + $0x28] sm:$0xff]  }
   0x8   :  { %805 = vmatpush3.bf16.msra.mxu0 %v896_v6  ;;  %v905_v15 = vld [vmem:[%s1188_s1 + $0x98] sm:$0xff]   ;;  %v909_v19 = vld [vmem:[%s1188_s1 + $0xa0] sm:$0xff]   ;;  %v913_v23 = vld [vmem:[%s1188_s1 + $0xa8] sm:$0xff]  }
   0x9   :  { %827 = vmatpush3.bf16.msra.mxu1 %v897_v7  ;;  %806 = vmatprep.subr.bf16.mxu0 %v898_v8  ;;  %v914_v24 = vld [vmem:[%s1188_s1 + $0x70] sm:$0xff]   ;;  %v918_v28 = vld [vmem:[%s1188_s1 + $0x78] sm:$0xff]   ;;  %v12_v32 = vld [vmem:[%s1189_s0] sm:$0xff] }
   0xa   :  { %828 = vmatprep.subr.bf16.mxu1 %v899_v9  ;;  %v915_v25 = vld [vmem:[%s1188_s1 + $0xf0] sm:$0xff]   ;;  %v919_v29 = vld [vmem:[%s1188_s1 + $0xf8] sm:$0xff]   ;;  %v13_v33 = vld [vmem:[%s1189_s0 + $0x8] sm:$0xff]  ;;  %v730_v34 = vcombine.low %v12_v32, %v12_v32  ;;  %v731_v35 = vcombine.high %v12_v32, %v12_v32 }
   0xb   :  { %v916_v26 = vld [vmem:[%s1188_s1 + $0x30] sm:$0xff]   ;;  %v920_v30 = vld [vmem:[%s1188_s1 + $0x38] sm:$0xff]   ;;  %v732_v36 = vcombine.low %v13_v33, %v13_v33  ;;  %v733_v37 = vcombine.high %v13_v33, %v13_v33  ;;  %v926_v38 = vld [vmem:[%s1188_s1 + $0x140] sm:$0xff]  }
   0xc   :  { %807 = vmatpush3.bf16.msra.mxu0 %v900_v10  ;;  %v917_v27 = vld [vmem:[%s1188_s1 + $0xb0] sm:$0xff]   ;;  %v921_v31 = vld [vmem:[%s1188_s1 + $0xb8] sm:$0xff]   ;;  %v927_v39 = vld [vmem:[%s1188_s1 + $0x1c0] sm:$0xff]   ;;  %588 = vmatprep.mubr.bf16.mxu0 %v731_v35 }
   0xd   :  { %829 = vmatpush3.bf16.msra.mxu1 %v901_v11  ;;  %808 = vmatprep.subr.bf16.mxu0 %v902_v12  ;;  %v928_v40 = vld [vmem:[%s1188_s1 + $0x100] sm:$0xff]   ;;  %v930_v42 = vld [vmem:[%s1188_s1 + $0x148] sm:$0xff]   ;;  %v934_v46 = vld [vmem:[%s1188_s1 + $0x150] sm:$0xff]  }
   0xe   :  { %830 = vmatprep.subr.bf16.mxu1 %v903_v13  ;;  %628 = vmatprep.mubr.bf16.mxu1 %v733_v37  ;;  %v929_v41 = vld [vmem:[%s1188_s1 + $0x180] sm:$0xff]   ;;  %v931_v43 = vld [vmem:[%s1188_s1 + $0x1c8] sm:$0xff]   ;;  %v935_v47 = vld [vmem:[%s1188_s1 + $0x1d0] sm:$0xff]  }
   0xf   :  { %v932_v44 = vld [vmem:[%s1188_s1 + $0x108] sm:$0xff]   ;;  %v936_v48 = vld [vmem:[%s1188_s1 + $0x110] sm:$0xff]   ;;  %v938_v50 = vld [vmem:[%s1188_s1 + $0x158] sm:$0xff]  }
  0x10   :  { %809 = vmatpush3.bf16.msra.mxu0 %v904_v14  ;;  %v933_v45 = vld [vmem:[%s1188_s1 + $0x188] sm:$0xff]   ;;  %v937_v49 = vld [vmem:[%s1188_s1 + $0x190] sm:$0xff]   ;;  %v939_v51 = vld [vmem:[%s1188_s1 + $0x1d8] sm:$0xff]  }
  0x11   :  { %831 = vmatpush3.bf16.msra.mxu1 %v905_v15  ;;  %810 = vmatprep.subr.bf16.mxu0 %v906_v16  ;;  %v940_v52 = vld [vmem:[%s1188_s1 + $0x118] sm:$0xff]   ;;  %v942_v54 = vld [vmem:[%s1188_s1 + $0x160] sm:$0xff]   ;;  %v946_v58 = vld [vmem:[%s1188_s1 + $0x168] sm:$0xff]  }
  0x12   :  { %832 = vmatprep.subr.bf16.mxu1 %v907_v17  ;;  %v941_v53 = vld [vmem:[%s1188_s1 + $0x198] sm:$0xff]   ;;  %v943_v55 = vld [vmem:[%s1188_s1 + $0x1e0] sm:$0xff]   ;;  %v947_v59 = vld [vmem:[%s1188_s1 + $0x1e8] sm:$0xff]  }
  0x13   :  { %v944_v56 = vld [vmem:[%s1188_s1 + $0x120] sm:$0xff]   ;;  %v948_v60 = vld [vmem:[%s1188_s1 + $0x128] sm:$0xff]   ;;  %v950_v62 = vld [vmem:[%s1188_s1 + $0x170] sm:$0xff]  }
  0x14   :  { %811 = vmatpush3.bf16.msra.mxu0 %v908_v18  ;;  %v945_v57 = vld [vmem:[%s1188_s1 + $0x1a0] sm:$0xff]   ;;  %v949_v61 = vld [vmem:[%s1188_s1 + $0x1a8] sm:$0xff]   ;;  %v951_v63 = vld [vmem:[%s1188_s1 + $0x1f0] sm:$0xff]  }
  0x15   :  { %833 = vmatpush3.bf16.msra.mxu1 %v909_v19  ;;  %812 = vmatprep.subr.bf16.mxu0 %v910_v20  ;;  %v952_v0 = vld [vmem:[%s1188_s1 + $0x130] sm:$0xff]   ;;  %v954_v2 = vld [vmem:[%s1188_s1 + $0x178] sm:$0xff]  }
  0x16   :  { %834 = vmatprep.subr.bf16.mxu1 %v911_v21  ;;  %v953_v1 = vld [vmem:[%s1188_s1 + $0x1b0] sm:$0xff]   ;;  %v955_v3 = vld [vmem:[%s1188_s1 + $0x1f8] sm:$0xff]  }
  0x17   :  { %v956_v4 = vld [vmem:[%s1188_s1 + $0x138] sm:$0xff]   ;;  %v14_v6 = vld [vmem:[%s1189_s0 + $0x10] sm:$0xff] }
  0x18   :  { %813 = vmatpush3.bf16.msra.mxu0 %v912_v22  ;;  %v957_v5 = vld [vmem:[%s1188_s1 + $0x1b8] sm:$0xff]   ;;  %v734_v7 = vcombine.low %v14_v6, %v14_v6  ;;  %v735_v8 = vcombine.high %v14_v6, %v14_v6 }
  0x19   :  { %835 = vmatpush3.bf16.msra.mxu1 %v913_v23  ;;  %814 = vmatprep.subr.bf16.mxu0 %v914_v24  ;;  %v15_v9 = vld [vmem:[%s1189_s0 + $0x18] sm:$0xff] }
  0x1a   :  { %836 = vmatprep.subr.bf16.mxu1 %v915_v25  ;;  %v736_v10 = vcombine.low %v15_v9, %v15_v9  ;;  %v737_v11 = vcombine.high %v15_v9, %v15_v9 }
  0x1c   :  { %815 = vmatpush3.bf16.msra.mxu0 %v916_v26 }
  0x1d   :  { %837 = vmatpush3.bf16.msra.mxu1 %v917_v27  ;;  %816 = vmatprep.subr.bf16.mxu0 %v918_v28 }
  0x1e   :  { %838 = vmatprep.subr.bf16.mxu1 %v919_v29 }
  0x20   :  { %817 = vmatpush3.bf16.msra.mxu0 %v920_v30 }
  0x21   :  { %839 = vmatpush3.bf16.msra.mxu1 %v921_v31  ;;  %846 = vmatprep.subr.bf16.mxu0 %v926_v38 }
  0x22   :  { %868 = vmatprep.subr.bf16.mxu1 %v927_v39 }
  0x23   :  { %589 = vmatmul.mubr.bf16.vlgmr.msra.gmra.mrb[0].mxu0 %v730_v34 }
  0x24   :  { %629 = vmatmul.mubr.bf16.vlgmr.msra.gmra.mrb[0].mxu1 %v732_v36  ;;  %847 = vmatpush3.bf16.msra.mxu0 %v928_v40 }
  0x25   :  { %869 = vmatpush3.bf16.msra.mxu1 %v929_v41  ;;  %848 = vmatprep.subr.bf16.mxu0 %v930_v42 }
  0x26   :  { %870 = vmatprep.subr.bf16.mxu1 %v931_v43  ;;  %668 = vmatprep.mubr.bf16.mxu0 %v735_v8 }
  0x27   :  { %708 = vmatprep.mubr.bf16.mxu1 %v737_v11 }
  0x28   :  { %849 = vmatpush3.bf16.msra.mxu0 %v932_v44 }
  0x29   :  { %871 = vmatpush3.bf16.msra.mxu1 %v933_v45  ;;  %850 = vmatprep.subr.bf16.mxu0 %v934_v46 }
  0x2a   :  { %872 = vmatprep.subr.bf16.mxu1 %v935_v47 }
  0x2c   :  { %851 = vmatpush3.bf16.msra.mxu0 %v936_v48 }
  0x2d   :  { %873 = vmatpush3.bf16.msra.mxu1 %v937_v49  ;;  %852 = vmatprep.subr.bf16.mxu0 %v938_v50 }
  0x2e   :  { %874 = vmatprep.subr.bf16.mxu1 %v939_v51 }
  0x30   :  { %853 = vmatpush3.bf16.msra.mxu0 %v940_v52 }
  0x31   :  { %875 = vmatpush3.bf16.msra.mxu1 %v941_v53  ;;  %854 = vmatprep.subr.bf16.mxu0 %v942_v54 }
  0x32   :  { %876 = vmatprep.subr.bf16.mxu1 %v943_v55 }
  0x34   :  { %855 = vmatpush3.bf16.msra.mxu0 %v944_v56 }
  0x35   :  { %877 = vmatpush3.bf16.msra.mxu1 %v945_v57  ;;  %856 = vmatprep.subr.bf16.mxu0 %v946_v58 }
  0x36   :  { %878 = vmatprep.subr.bf16.mxu1 %v947_v59 }
  0x38   :  { %857 = vmatpush3.bf16.msra.mxu0 %v948_v60 }
  0x39   :  { %879 = vmatpush3.bf16.msra.mxu1 %v949_v61  ;;  %858 = vmatprep.subr.bf16.mxu0 %v950_v62 }
  0x3a   :  { %880 = vmatprep.subr.bf16.mxu1 %v951_v63 }
  0x3c   :  { %859 = vmatpush3.bf16.msra.mxu0 %v952_v0 }
  0x3d   :  { %881 = vmatpush3.bf16.msra.mxu1 %v953_v1  ;;  %860 = vmatprep.subr.bf16.mxu0 %v954_v2 }
  0x3e   :  { %882 = vmatprep.subr.bf16.mxu1 %v955_v3 }
  0x40   :  { %861 = vmatpush3.bf16.msra.mxu0 %v956_v4 }
  0x41   :  { %883 = vmatpush3.bf16.msra.mxu1 %v957_v5 }
  0x43   :  { %669 = vmatmul.mubr.bf16.vlgmr.msra.gmra.mrb[4].mxu0 %v734_v7 }
  0x44   :  { %709 = vmatmul.mubr.bf16.vlgmr.msra.gmra.mrb[4].mxu1 %v736_v10 }
  0xf6   :  { %v818_v12 = vpop.f32.mrb[0].mxu0 }
  0xf7   :  { %v840_v13 = vpop.f32.mrb[0].mxu1  ;;  %v819_v14 = vpop.f32.mrb[1].mxu0 }
  0xf8   :  { %v841_v15 = vpop.f32.mrb[1].mxu1  ;;  %v820_v16 = vadd.f32 %v819_v14, %v818_v12  ;;  %v821_v18 = vpop.f32.mrb[2].mxu0 }
  0xf9   :  { %v842_v17 = vadd.f32 %v841_v15, %v840_v13  ;;  %v843_v19 = vpop.f32.mrb[2].mxu1  ;;  %v822_v20 = vpop.f32.mrb[3].mxu0 }
  0xfa   :  { %v844_v21 = vpop.f32.mrb[3].mxu1 }
  0xfb   :  { %v631_v22 = vadd.f32 %v842_v17, %v820_v16 }
 0x116   :  { %v862_v23 = vpop.f32.mrb[4].mxu0 }
 0x117   :  { %v884_v24 = vpop.f32.mrb[4].mxu1  ;;  %v863_v25 = vpop.f32.mrb[5].mxu0 }
 0x118   :  { %v885_v26 = vpop.f32.mrb[5].mxu1  ;;  %v864_v27 = vadd.f32 %v863_v25, %v862_v23  ;;  %v865_v29 = vpop.f32.mrb[6].mxu0 }
 0x119   :  { %v886_v28 = vadd.f32 %v885_v26, %v884_v24  ;;  %v887_v30 = vpop.f32.mrb[6].mxu1  ;;  %v866_v31 = vpop.f32.mrb[7].mxu0 }
 0x11a   :  { %v888_v32 = vpop.f32.mrb[7].mxu1  ;;  %v671_v33 = vadd.f32 %v864_v27, %v631_v22 }
 0x11c   :  { %v711_v34 = vadd.f32 %v886_v28, %v671_v33 }
 0x11e   :  { %v716_v35 = vand.u32 2147483647, %v711_v34  ;;  %vm720_vm0 = vcmp.ge.f32.partialorder %v711_v34, 0.0 }
 0x120   :  { %v717_v36 = vsub.f32 0.0, %v716_v35 }
 0x122   :  { %v718_v37 = vmul.f32 1.442695, %v717_v36 }
 0x124   :  { %962 = vpow2.f32 %v718_v37 }
 0x12e   :  { %v963_v38 = vpop.eup %962 }
 0x12f   :  { %v722_v39 = vadd.f32 1.0, %v963_v38  ;;  %v721_v41 = vsel %vm720_vm0, 1.0, %v963_v38 }
 0x131   :  { %964 = vrcp.f32 %v722_v39 }
 0x13b   :  { %v965_v40 = vpop.eup %964 }
 0x13c   :  { %v724_v42 = vmul.f32 %v965_v40, %v721_v41 }
 0x13e   :  { %725 = vst [vmem:[%s1190_s2] sm:$0xff] %v724_v42 }

</bundles_post_ra>
